<compile_context>
chip_gen: v7x
topology: tpu7x:2x2x1
jax: 0.10.0
libtpu: 0.0.40
codegen_flags: <defaults>
</compile_context>

<pallas_src>
import numpy as np
import jax
import jax.numpy as jnp
from jax.experimental import pallas as pl
from jax.experimental.pallas import tpu as pltpu


def _round_up(n, m):
    return ((n + m - 1) // m) * m


def caption_rnn_kernel(x_ref, w_tok_ref, w_hh_ref, b_gate_ref, w_dec_ref,
                       b_dec_ref, pred_ref):
    BB, H_pad = x_ref.shape                        # padded hidden width (lane-aligned)
    V_pad = w_dec_ref.shape[1]                     # padded vocab width (lane-aligned)
    T = pred_ref.shape[1]

    w_tok = w_tok_ref[...]                         # (V_pad, 4*H_pad)  [r|z|gi_n|0]
    w_hh = w_hh_ref[...]                           # (H_pad, 4*H_pad)  [r|z|0|gh_n]
    w_dec = w_dec_ref[...]                         # (H_pad, V_pad)

    # Hoisted broadcasts: JAX does not CSE broadcast_in_dim, so do them once.
    b_gate = jnp.broadcast_to(b_gate_ref[...], (BB, 4 * H_pad))   # (BB, 4*H_pad)
    b_dec = jnp.broadcast_to(b_dec_ref[...], (BB, V_pad))         # padded cols = -1e30

    lane_V = jax.lax.broadcasted_iota(jnp.int32, (BB, V_pad), 1)

    # Initial hidden state already padded to H_pad lanes (padding lanes are zero and
    # stay exactly zero through every GRU update by construction of the weights).
    h = x_ref[...]                                 # (BB, H_pad)

    # First decoder input is the 'SoS' token (index 1) via the one-hot token path.
    idx = jnp.full((BB, 1), 1, jnp.int32)

    idx_cols = []
    # Trace-time unroll: T is a small static trip count, gives the scheduler
    # cross-iteration visibility (h-path GEMM of step t+1 overlaps decoder/argmax of t).
    for _ in range(T):
        onehot = (lane_V == idx).astype(jnp.float32)               # (BB, V_pad)

        # Two accumulating MXU calls; gate columns lane-aligned at 0/H_pad/2H_pad/3H_pad.
        g = (jnp.dot(h, w_hh, preferred_element_type=jnp.float32)
             + jnp.dot(onehot, w_tok, preferred_element_type=jnp.float32)
             + b_gate)                                             # (BB, 4*H_pad)

        rz = jax.nn.sigmoid(g[:, 0:2 * H_pad])                     # one EUP pass for r,z
        r = rz[:, 0:H_pad]
        z = rz[:, H_pad:2 * H_pad]
        n = jnp.tanh(g[:, 2 * H_pad:3 * H_pad] + r * g[:, 3 * H_pad:4 * H_pad])
        h = (1.0 - z) * n + z * h                                  # GRU update

        out = jnp.maximum(h, 0.0)                                  # self.gate = F.relu
        logits = jnp.dot(out, w_dec,
                         preferred_element_type=jnp.float32) + b_dec   # (BB, V_pad)

        # argmax on raw logits (softmax is monotone), first-max tie break.
        lmax = jnp.max(logits, axis=-1, keepdims=True)
        idx = jnp.min(jnp.where(logits >= lmax, lane_V, V_pad),
                      axis=-1, keepdims=True)                      # (BB, 1) int32
        idx_cols.append(idx)

    # Aggregated prediction write: one store instead of T masked 1-lane stores.
    pred_ref[...] = jnp.concatenate(idx_cols, axis=-1)


def make_padded_params(params):
    """Fold Embedding @ W_ih offline and lay out gate blocks lane-aligned (128-wide)."""
    hp = jax.lax.Precision.HIGHEST
    emb = params["emb"]                                            # (V, E)
    w_ih_t = params["w_ih_t"]                                      # (E, 3H)
    w_hh_t = params["w_hh_t"]                                      # (H, 3H)
    H = w_hh_t.shape[0]
    V = emb.shape[0]
    H_pad = _round_up(H, 128)
    V_pad = _round_up(V, 128)

    w_tok = jnp.dot(emb, w_ih_t, precision=hp)                     # (V, 3H) per-token gi

    # Token path weight: gate blocks [r | z | gi_n | 0], each padded to H_pad lanes.
    w_tok4 = jnp.zeros((V_pad, 4 * H_pad), jnp.float32)
    w_tok4 = w_tok4.at[:V, 0 * H_pad:0 * H_pad + H].set(w_tok[:, 0:H])
    w_tok4 = w_tok4.at[:V, 1 * H_pad:1 * H_pad + H].set(w_tok[:, H:2 * H])
    w_tok4 = w_tok4.at[:V, 2 * H_pad:2 * H_pad + H].set(w_tok[:, 2 * H:3 * H])

    # Hidden path weight: gate blocks [r | z | 0 | gh_n].
    w_hh4 = jnp.zeros((H_pad, 4 * H_pad), jnp.float32)
    w_hh4 = w_hh4.at[:H, 0 * H_pad:0 * H_pad + H].set(w_hh_t[:, 0:H])
    w_hh4 = w_hh4.at[:H, 1 * H_pad:1 * H_pad + H].set(w_hh_t[:, H:2 * H])
    w_hh4 = w_hh4.at[:H, 3 * H_pad:3 * H_pad + H].set(w_hh_t[:, 2 * H:3 * H])

    b_ih = params["b_ih"][0]
    b_hh = params["b_hh"][0]
    b4 = jnp.zeros((1, 4 * H_pad), jnp.float32)
    b4 = b4.at[0, 0 * H_pad:0 * H_pad + H].set(b_ih[0:H] + b_hh[0:H])
    b4 = b4.at[0, 1 * H_pad:1 * H_pad + H].set(b_ih[H:2 * H] + b_hh[H:2 * H])
    b4 = b4.at[0, 2 * H_pad:2 * H_pad + H].set(b_ih[2 * H:3 * H])
    b4 = b4.at[0, 3 * H_pad:3 * H_pad + H].set(b_hh[2 * H:3 * H])

    # Decoder, lane-padded; padded logit columns get a -1e30 bias so argmax skips them.
    w_dec_p = jnp.zeros((H_pad, V_pad), jnp.float32).at[:H, :V].set(params["w_dec_t"])
    b_dec_p = jnp.full((1, V_pad), -1e30, jnp.float32).at[0, :V].set(params["b_dec"][0])

    return w_tok4, w_hh4, b4, w_dec_p, b_dec_p


def caption_rnn_forward(x, params, max_sentence_length, batch_block=8):
    B = x.shape[0]
    H = params["w_hh_t"].shape[0]
    V = params["emb"].shape[0]
    H_pad = _round_up(H, 128)
    V_pad = _round_up(V, 128)
    T = max_sentence_length

    x2 = x.reshape(B, -1).astype(jnp.float32)               # h_0[0] = x.reshape(B, -1)
    x2p = jnp.zeros((B, H_pad), jnp.float32).at[:, :H].set(x2)   # padded hidden layout

    w_tok4, w_hh4, b4, w_dec_p, b_dec_p = make_padded_params(params)

    bb = min(batch_block, B)
    assert B % bb == 0 and bb % 8 == 0
    grid = (B // bb,)

    return pl.pallas_call(
        caption_rnn_kernel,
        out_shape=jax.ShapeDtypeStruct((B, T), jnp.int32),
        grid_spec=pltpu.PrefetchScalarGridSpec(
            num_scalar_prefetch=0,
            grid=grid,
            in_specs=[
                pl.BlockSpec((bb, H_pad), lambda i: (i, 0)),          # h_0 batch block
                pl.BlockSpec((V_pad, 4 * H_pad), lambda i: (0, 0)),   # W_tok4
                pl.BlockSpec((H_pad, 4 * H_pad), lambda i: (0, 0)),   # W_hh4
                pl.BlockSpec((1, 4 * H_pad), lambda i: (0, 0)),       # b4
                pl.BlockSpec((H_pad, V_pad), lambda i: (0, 0)),       # W_dec
                pl.BlockSpec((1, V_pad), lambda i: (0, 0)),           # b_dec
            ],
            out_specs=pl.BlockSpec((bb, T), lambda i: (i, 0)),
        ),
        compiler_params=pltpu.CompilerParams(
            dimension_semantics=("parallel",),          # batch blocks -> both v7x TCs
            vmem_limit_bytes=32 * 1024 * 1024,          # > v5e's 16 MiB default
        ),
    )(x2p, w_tok4, w_hh4, b4, w_dec_p, b_dec_p)


def init_params(key, voc_size, embedding_size, hidden_units):
    H, E, V = hidden_units, embedding_size, voc_size
    ks = jax.random.split(key, 7)
    s = 1.0 / np.sqrt(H)
    w_ih = jax.random.uniform(ks[0], (3 * H, E), jnp.float32, -s, s)
    w_hh = jax.random.uniform(ks[1], (3 * H, H), jnp.float32, -s, s)
    b_ih = jax.random.uniform(ks[2], (3 * H,), jnp.float32, -s, s)
    b_hh = jax.random.uniform(ks[3], (3 * H,), jnp.float32, -s, s)
    emb = jax.random.normal(ks[4], (V, E), jnp.float32)
    emb = emb.at[0].set(0.0)                      # padding_idx = 0
    w_dec = jax.random.uniform(ks[5], (V, H), jnp.float32, -s, s)
    b_dec = jax.random.uniform(ks[6], (V,), jnp.float32, -s, s)
    return {
        "w_ih_t": w_ih.T, "w_hh_t": w_hh.T,
        "b_ih": b_ih[None, :], "b_hh": b_hh[None, :],
        "emb": emb, "w_dec_t": w_dec.T, "b_dec": b_dec[None, :],
    }


def reference_forward(x, params, T):
    """Pure-JAX reference mirroring the PyTorch module's decode loop."""
    B = x.shape[0]
    h = x.reshape(B, -1).astype(jnp.float32)
    H = h.shape[1]
    emb = params["emb"]
    inp = jnp.broadcast_to(emb[1:2], (B, emb.shape[1]))
    hp = jax.lax.Precision.HIGHEST

    def step(carry, _):
        h, inp = carry
        gi = jnp.dot(inp, params["w_ih_t"], precision=hp) + params["b_ih"]
        gh = jnp.dot(h, params["w_hh_t"], precision=hp) + params["b_hh"]
        r = jax.nn.sigmoid(gi[:, :H] + gh[:, :H])
        z = jax.nn.sigmoid(gi[:, H:2 * H] + gh[:, H:2 * H])
        n = jnp.tanh(gi[:, 2 * H:] + r * gh[:, 2 * H:])
        h_new = (1.0 - z) * n + z * h
        out = jax.nn.relu(h_new)
        probs = jax.nn.softmax(
            jnp.dot(out, params["w_dec_t"], precision=hp) + params["b_dec"], axis=-1)
        idx = jnp.argmax(probs, axis=-1).astype(jnp.int32)
        return (h_new, emb[idx]), idx

    _, idxs = jax.lax.scan(step, (h, inp), xs=None, length=T)
    return idxs.T


if __name__ == "__main__":
    # Vocabulary exactly like the module: specials + lowered unique words.
    words = ["Cat", "dog", "ball", "Red", "blue"]
    vocab = ["PAD", "SoS", "EoS"] + sorted({w.lower() for w in words})
    voc_size = len(vocab)                         # 8

    # batch, hidden, embed, max_sentence_length.  B=16 -> 2 batch blocks of 8
    # sublane-full rows (exercises the batch-parallel grid axis used on v7x).
    B, H, E, T = 16, 32, 16, 8
    key = jax.random.PRNGKey(0)
    kp, kx = jax.random.split(key)
    params = init_params(kp, voc_size, E, H)

    # x flattens to (B, hidden_units) just as the module's forward requires.
    x = jax.random.normal(kx, (B, 4, 8), jnp.float32)

    fwd = jax.jit(caption_rnn_forward, static_argnums=(2, 3))
    pred = jax.block_until_ready(fwd(x, params, T, 8))
    ref = jax.block_until_ready(reference_forward(x, params, T))

    assert pred.shape == (B, T) and pred.dtype == jnp.int32
    np.testing.assert_array_equal(np.asarray(pred), np.asarray(ref))
    print("KERNEL_OK")
</pallas_src>

<mosaic_0001>
module attributes {stable_mosaic.version = 11 : i64} {
  func.func @caption_rnn_kernel(%arg0: i32, %arg1: memref<8x128xf32, #tpu.memory_space<vmem>>, %arg2: memref<128x512xf32, #tpu.memory_space<vmem>>, %arg3: memref<128x512xf32, #tpu.memory_space<vmem>>, %arg4: memref<1x512xf32, #tpu.memory_space<vmem>>, %arg5: memref<128x128xf32, #tpu.memory_space<vmem>>, %arg6: memref<1x128xf32, #tpu.memory_space<vmem>>, %arg7: memref<8x8xi32, #tpu.memory_space<vmem>>) attributes {dimension_semantics = [#tpu.dimension_semantics<parallel>], iteration_bounds = array<i64: 2>, scalar_prefetch = 0 : i64, scratch_operands = 0 : i64, tpu.core_type = #tpu.core_type<tc>, window_params = [{transform_indices = @transform_0, window_bounds = array<i64: 8, 128>}, {pipeline_mode = #tpu.pipeline_mode<synchronous>, transform_indices = @transform_1, window_bounds = array<i64: 128, 512>}, {pipeline_mode = #tpu.pipeline_mode<synchronous>, transform_indices = @transform_2, window_bounds = array<i64: 128, 512>}, {pipeline_mode = #tpu.pipeline_mode<synchronous>, transform_indices = @transform_3, window_bounds = array<i64: 1, 512>}, {pipeline_mode = #tpu.pipeline_mode<synchronous>, transform_indices = @transform_4, window_bounds = array<i64: 128, 128>}, {pipeline_mode = #tpu.pipeline_mode<synchronous>, transform_indices = @transform_5, window_bounds = array<i64: 1, 128>}, {transform_indices = @transform_6, window_bounds = array<i64: 8, 8>}]} {
    %c0 = arith.constant 0 : index
    %c0_0 = arith.constant 0 : index
    %0 = vector.load %arg2[%c0, %c0_0] : memref<128x512xf32, #tpu.memory_space<vmem>>, vector<128x512xf32>
    %c0_1 = arith.constant 0 : index
    %c0_2 = arith.constant 0 : index
    %1 = vector.load %arg3[%c0_1, %c0_2] : memref<128x512xf32, #tpu.memory_space<vmem>>, vector<128x512xf32>
    %c0_3 = arith.constant 0 : index
    %c0_4 = arith.constant 0 : index
    %2 = vector.load %arg5[%c0_3, %c0_4] : memref<128x128xf32, #tpu.memory_space<vmem>>, vector<128x128xf32>
    %c0_5 = arith.constant 0 : index
    %c0_6 = arith.constant 0 : index
    %3 = vector.load %arg4[%c0_5, %c0_6] : memref<1x512xf32, #tpu.memory_space<vmem>>, vector<1x512xf32>
    %4 = vector.shape_cast %3 : vector<1x512xf32> to vector<1x512xf32>
    %5 = vector.broadcast %4 : vector<1x512xf32> to vector<8x512xf32>
    %c0_7 = arith.constant 0 : index
    %c0_8 = arith.constant 0 : index
    %6 = vector.load %arg6[%c0_7, %c0_8] : memref<1x128xf32, #tpu.memory_space<vmem>>, vector<1x128xf32>
    %7 = vector.shape_cast %6 : vector<1x128xf32> to vector<1x128xf32>
    %8 = vector.broadcast %7 : vector<1x128xf32> to vector<8x128xf32>
    %9 = tpu.iota {dimensions = array<i32: 1>} : vector<8x128xi32>
    %c0_9 = arith.constant 0 : index
    %c0_10 = arith.constant 0 : index
    %10 = vector.load %arg1[%c0_9, %c0_10] : memref<8x128xf32, #tpu.memory_space<vmem>>, vector<8x128xf32>
    %c1_i32 = arith.constant 1 : i32
    %11 = vector.broadcast %c1_i32 : i32 to vector<8x1xi32>
    %12 = vector.broadcast %11 : vector<8x1xi32> to vector<8x128xi32>
    %13 = arith.cmpi eq, %9, %12 : vector<8x128xi32>
    %14 = arith.extui %13 : vector<8x128xi1> to vector<8x128xi32>
    %15 = arith.sitofp %14 : vector<8x128xi32> to vector<8x128xf32>
    %cst = arith.constant dense<0.000000e+00> : vector<8x512xf32>
    %16 = tpu.matmul %10, %1, %cst {dimension_numbers = #tpu.dot_dimension_numbers<[1], [0], [0], [1], [0, 0, 1, 1], [], []>} : vector<8x128xf32>, vector<128x512xf32>, vector<8x512xf32> -> vector<8x512xf32>
    %cst_11 = arith.constant dense<0.000000e+00> : vector<8x512xf32>
    %17 = tpu.matmul %15, %0, %cst_11 {dimension_numbers = #tpu.dot_dimension_numbers<[1], [0], [0], [1], [0, 0, 1, 1], [], []>} : vector<8x128xf32>, vector<128x512xf32>, vector<8x512xf32> -> vector<8x512xf32>
    %18 = arith.addf %16, %17 : vector<8x512xf32>
    %19 = arith.addf %18, %5 : vector<8x512xf32>
    %20 = vector.extract_strided_slice %19 {offsets = [0, 0], sizes = [8, 256], strides = [1, 1]} : vector<8x512xf32> to vector<8x256xf32>
    %21 = arith.negf %20 : vector<8x256xf32>
    %22 = math.exp %21 : vector<8x256xf32>
    %cst_12 = arith.constant 1.000000e+00 : f32
    %23 = vector.broadcast %cst_12 : f32 to vector<8x256xf32>
    %24 = arith.addf %23, %22 : vector<8x256xf32>
    %25 = arith.divf %23, %24 : vector<8x256xf32>
    %26 = vector.extract_strided_slice %25 {offsets = [0, 0], sizes = [8, 128], strides = [1, 1]} : vector<8x256xf32> to vector<8x128xf32>
    %27 = vector.extract_strided_slice %25 {offsets = [0, 128], sizes = [8, 128], strides = [1, 1]} : vector<8x256xf32> to vector<8x128xf32>
    %28 = vector.extract_strided_slice %19 {offsets = [0, 256], sizes = [8, 128], strides = [1, 1]} : vector<8x512xf32> to vector<8x128xf32>
    %29 = vector.extract_strided_slice %19 {offsets = [0, 384], sizes = [8, 128], strides = [1, 1]} : vector<8x512xf32> to vector<8x128xf32>
    %30 = arith.mulf %26, %29 : vector<8x128xf32>
    %31 = arith.addf %28, %30 : vector<8x128xf32>
    %32 = math.tanh %31 : vector<8x128xf32>
    %cst_13 = arith.constant 1.000000e+00 : f32
    %33 = vector.broadcast %cst_13 : f32 to vector<8x128xf32>
    %34 = arith.subf %33, %27 : vector<8x128xf32>
    %35 = arith.mulf %34, %32 : vector<8x128xf32>
    %36 = arith.mulf %27, %10 : vector<8x128xf32>
    %37 = arith.addf %35, %36 : vector<8x128xf32>
    %cst_14 = arith.constant 0.000000e+00 : f32
    %38 = vector.broadcast %cst_14 : f32 to vector<8x128xf32>
    %39 = arith.maximumf %37, %38 : vector<8x128xf32>
    %cst_15 = arith.constant dense<0.000000e+00> : vector<8x128xf32>
    %40 = tpu.matmul %39, %2, %cst_15 {dimension_numbers = #tpu.dot_dimension_numbers<[1], [0], [0], [1], [0, 0, 1, 1], [], []>} : vector<8x128xf32>, vector<128x128xf32>, vector<8x128xf32> -> vector<8x128xf32>
    %41 = arith.addf %40, %8 : vector<8x128xf32>
    %cst_16 = arith.constant dense<0xFF800000> : vector<8xf32>
    %42 = vector.multi_reduction <maximumf>, %41, %cst_16 [1] : vector<8x128xf32> to vector<8xf32>
    %43 = vector.shape_cast %42 : vector<8xf32> to vector<8x1xf32>
    %44 = vector.broadcast %43 : vector<8x1xf32> to vector<8x128xf32>
    %45 = arith.cmpf oge, %41, %44 : vector<8x128xf32>
    %c128_i32 = arith.constant 128 : i32
    %46 = vector.broadcast %c128_i32 : i32 to vector<8x128xi32>
    %47 = arith.select %45, %9, %46 : vector<8x128xi1>, vector<8x128xi32>
    %cst_17 = arith.constant dense<2147483647> : vector<8xi32>
    %48 = vector.multi_reduction <minsi>, %47, %cst_17 [1] : vector<8x128xi32> to vector<8xi32>
    %49 = vector.shape_cast %48 : vector<8xi32> to vector<8x1xi32>
    %50 = vector.broadcast %49 : vector<8x1xi32> to vector<8x128xi32>
    %51 = arith.cmpi eq, %9, %50 : vector<8x128xi32>
    %52 = arith.extui %51 : vector<8x128xi1> to vector<8x128xi32>
    %53 = arith.sitofp %52 : vector<8x128xi32> to vector<8x128xf32>
    %cst_18 = arith.constant dense<0.000000e+00> : vector<8x512xf32>
    %54 = tpu.matmul %37, %1, %cst_18 {dimension_numbers = #tpu.dot_dimension_numbers<[1], [0], [0], [1], [0, 0, 1, 1], [], []>} : vector<8x128xf32>, vector<128x512xf32>, vector<8x512xf32> -> vector<8x512xf32>
    %cst_19 = arith.constant dense<0.000000e+00> : vector<8x512xf32>
    %55 = tpu.matmul %53, %0, %cst_19 {dimension_numbers = #tpu.dot_dimension_numbers<[1], [0], [0], [1], [0, 0, 1, 1], [], []>} : vector<8x128xf32>, vector<128x512xf32>, vector<8x512xf32> -> vector<8x512xf32>
    %56 = arith.addf %54, %55 : vector<8x512xf32>
    %57 = arith.addf %56, %5 : vector<8x512xf32>
    %58 = vector.extract_strided_slice %57 {offsets = [0, 0], sizes = [8, 256], strides = [1, 1]} : vector<8x512xf32> to vector<8x256xf32>
    %59 = arith.negf %58 : vector<8x256xf32>
    %60 = math.exp %59 : vector<8x256xf32>
    %cst_20 = arith.constant 1.000000e+00 : f32
    %61 = vector.broadcast %cst_20 : f32 to vector<8x256xf32>
    %62 = arith.addf %61, %60 : vector<8x256xf32>
    %63 = arith.divf %61, %62 : vector<8x256xf32>
    %64 = vector.extract_strided_slice %63 {offsets = [0, 0], sizes = [8, 128], strides = [1, 1]} : vector<8x256xf32> to vector<8x128xf32>
    %65 = vector.extract_strided_slice %63 {offsets = [0, 128], sizes = [8, 128], strides = [1, 1]} : vector<8x256xf32> to vector<8x128xf32>
    %66 = vector.extract_strided_slice %57 {offsets = [0, 256], sizes = [8, 128], strides = [1, 1]} : vector<8x512xf32> to vector<8x128xf32>
    %67 = vector.extract_strided_slice %57 {offsets = [0, 384], sizes = [8, 128], strides = [1, 1]} : vector<8x512xf32> to vector<8x128xf32>
    %68 = arith.mulf %64, %67 : vector<8x128xf32>
    %69 = arith.addf %66, %68 : vector<8x128xf32>
    %70 = math.tanh %69 : vector<8x128xf32>
    %cst_21 = arith.constant 1.000000e+00 : f32
    %71 = vector.broadcast %cst_21 : f32 to vector<8x128xf32>
    %72 = arith.subf %71, %65 : vector<8x128xf32>
    %73 = arith.mulf %72, %70 : vector<8x128xf32>
    %74 = arith.mulf %65, %37 : vector<8x128xf32>
    %75 = arith.addf %73, %74 : vector<8x128xf32>
    %cst_22 = arith.constant 0.000000e+00 : f32
    %76 = vector.broadcast %cst_22 : f32 to vector<8x128xf32>
    %77 = arith.maximumf %75, %76 : vector<8x128xf32>
    %cst_23 = arith.constant dense<0.000000e+00> : vector<8x128xf32>
    %78 = tpu.matmul %77, %2, %cst_23 {dimension_numbers = #tpu.dot_dimension_numbers<[1], [0], [0], [1], [0, 0, 1, 1], [], []>} : vector<8x128xf32>, vector<128x128xf32>, vector<8x128xf32> -> vector<8x128xf32>
    %79 = arith.addf %78, %8 : vector<8x128xf32>
    %cst_24 = arith.constant dense<0xFF800000> : vector<8xf32>
    %80 = vector.multi_reduction <maximumf>, %79, %cst_24 [1] : vector<8x128xf32> to vector<8xf32>
    %81 = vector.shape_cast %80 : vector<8xf32> to vector<8x1xf32>
    %82 = vector.broadcast %81 : vector<8x1xf32> to vector<8x128xf32>
    %83 = arith.cmpf oge, %79, %82 : vector<8x128xf32>
    %c128_i32_25 = arith.constant 128 : i32
    %84 = vector.broadcast %c128_i32_25 : i32 to vector<8x128xi32>
    %85 = arith.select %83, %9, %84 : vector<8x128xi1>, vector<8x128xi32>
    %cst_26 = arith.constant dense<2147483647> : vector<8xi32>
    %86 = vector.multi_reduction <minsi>, %85, %cst_26 [1] : vector<8x128xi32> to vector<8xi32>
    %87 = vector.shape_cast %86 : vector<8xi32> to vector<8x1xi32>
    %88 = vector.broadcast %87 : vector<8x1xi32> to vector<8x128xi32>
    %89 = arith.cmpi eq, %9, %88 : vector<8x128xi32>
    %90 = arith.extui %89 : vector<8x128xi1> to vector<8x128xi32>
    %91 = arith.sitofp %90 : vector<8x128xi32> to vector<8x128xf32>
    %cst_27 = arith.constant dense<0.000000e+00> : vector<8x512xf32>
    %92 = tpu.matmul %75, %1, %cst_27 {dimension_numbers = #tpu.dot_dimension_numbers<[1], [0], [0], [1], [0, 0, 1, 1], [], []>} : vector<8x128xf32>, vector<128x512xf32>, vector<8x512xf32> -> vector<8x512xf32>
    %cst_28 = arith.constant dense<0.000000e+00> : vector<8x512xf32>
    %93 = tpu.matmul %91, %0, %cst_28 {dimension_numbers = #tpu.dot_dimension_numbers<[1], [0], [0], [1], [0, 0, 1, 1], [], []>} : vector<8x128xf32>, vector<128x512xf32>, vector<8x512xf32> -> vector<8x512xf32>
    %94 = arith.addf %92, %93 : vector<8x512xf32>
    %95 = arith.addf %94, %5 : vector<8x512xf32>
    %96 = vector.extract_strided_slice %95 {offsets = [0, 0], sizes = [8, 256], strides = [1, 1]} : vector<8x512xf32> to vector<8x256xf32>
    %97 = arith.negf %96 : vector<8x256xf32>
    %98 = math.exp %97 : vector<8x256xf32>
    %cst_29 = arith.constant 1.000000e+00 : f32
    %99 = vector.broadcast %cst_29 : f32 to vector<8x256xf32>
    %100 = arith.addf %99, %98 : vector<8x256xf32>
    %101 = arith.divf %99, %100 : vector<8x256xf32>
    %102 = vector.extract_strided_slice %101 {offsets = [0, 0], sizes = [8, 128], strides = [1, 1]} : vector<8x256xf32> to vector<8x128xf32>
    %103 = vector.extract_strided_slice %101 {offsets = [0, 128], sizes = [8, 128], strides = [1, 1]} : vector<8x256xf32> to vector<8x128xf32>
    %104 = vector.extract_strided_slice %95 {offsets = [0, 256], sizes = [8, 128], strides = [1, 1]} : vector<8x512xf32> to vector<8x128xf32>
    %105 = vector.extract_strided_slice %95 {offsets = [0, 384], sizes = [8, 128], strides = [1, 1]} : vector<8x512xf32> to vector<8x128xf32>
    %106 = arith.mulf %102, %105 : vector<8x128xf32>
    %107 = arith.addf %104, %106 : vector<8x128xf32>
    %108 = math.tanh %107 : vector<8x128xf32>
    %cst_30 = arith.constant 1.000000e+00 : f32
    %109 = vector.broadcast %cst_30 : f32 to vector<8x128xf32>
    %110 = arith.subf %109, %103 : vector<8x128xf32>
    %111 = arith.mulf %110, %108 : vector<8x128xf32>
    %112 = arith.mulf %103, %75 : vector<8x128xf32>
    %113 = arith.addf %111, %112 : vector<8x128xf32>
    %cst_31 = arith.constant 0.000000e+00 : f32
    %114 = vector.broadcast %cst_31 : f32 to vector<8x128xf32>
    %115 = arith.maximumf %113, %114 : vector<8x128xf32>
    %cst_32 = arith.constant dense<0.000000e+00> : vector<8x128xf32>
    %116 = tpu.matmul %115, %2, %cst_32 {dimension_numbers = #tpu.dot_dimension_numbers<[1], [0], [0], [1], [0, 0, 1, 1], [], []>} : vector<8x128xf32>, vector<128x128xf32>, vector<8x128xf32> -> vector<8x128xf32>
    %117 = arith.addf %116, %8 : vector<8x128xf32>
    %cst_33 = arith.constant dense<0xFF800000> : vector<8xf32>
    %118 = vector.multi_reduction <maximumf>, %117, %cst_33 [1] : vector<8x128xf32> to vector<8xf32>
    %119 = vector.shape_cast %118 : vector<8xf32> to vector<8x1xf32>
    %120 = vector.broadcast %119 : vector<8x1xf32> to vector<8x128xf32>
    %121 = arith.cmpf oge, %117, %120 : vector<8x128xf32>
    %c128_i32_34 = arith.constant 128 : i32
    %122 = vector.broadcast %c128_i32_34 : i32 to vector<8x128xi32>
    %123 = arith.select %121, %9, %122 : vector<8x128xi1>, vector<8x128xi32>
    %cst_35 = arith.constant dense<2147483647> : vector<8xi32>
    %124 = vector.multi_reduction <minsi>, %123, %cst_35 [1] : vector<8x128xi32> to vector<8xi32>
    %125 = vector.shape_cast %124 : vector<8xi32> to vector<8x1xi32>
    %126 = vector.broadcast %125 : vector<8x1xi32> to vector<8x128xi32>
    %127 = arith.cmpi eq, %9, %126 : vector<8x128xi32>
    %128 = arith.extui %127 : vector<8x128xi1> to vector<8x128xi32>
    %129 = arith.sitofp %128 : vector<8x128xi32> to vector<8x128xf32>
    %cst_36 = arith.constant dense<0.000000e+00> : vector<8x512xf32>
    %130 = tpu.matmul %113, %1, %cst_36 {dimension_numbers = #tpu.dot_dimension_numbers<[1], [0], [0], [1], [0, 0, 1, 1], [], []>} : vector<8x128xf32>, vector<128x512xf32>, vector<8x512xf32> -> vector<8x512xf32>
    %cst_37 = arith.constant dense<0.000000e+00> : vector<8x512xf32>
    %131 = tpu.matmul %129, %0, %cst_37 {dimension_numbers = #tpu.dot_dimension_numbers<[1], [0], [0], [1], [0, 0, 1, 1], [], []>} : vector<8x128xf32>, vector<128x512xf32>, vector<8x512xf32> -> vector<8x512xf32>
    %132 = arith.addf %130, %131 : vector<8x512xf32>
    %133 = arith.addf %132, %5 : vector<8x512xf32>
    %134 = vector.extract_strided_slice %133 {offsets = [0, 0], sizes = [8, 256], strides = [1, 1]} : vector<8x512xf32> to vector<8x256xf32>
    %135 = arith.negf %134 : vector<8x256xf32>
    %136 = math.exp %135 : vector<8x256xf32>
    %cst_38 = arith.constant 1.000000e+00 : f32
    %137 = vector.broadcast %cst_38 : f32 to vector<8x256xf32>
    %138 = arith.addf %137, %136 : vector<8x256xf32>
    %139 = arith.divf %137, %138 : vector<8x256xf32>
    %140 = vector.extract_strided_slice %139 {offsets = [0, 0], sizes = [8, 128], strides = [1, 1]} : vector<8x256xf32> to vector<8x128xf32>
    %141 = vector.extract_strided_slice %139 {offsets = [0, 128], sizes = [8, 128], strides = [1, 1]} : vector<8x256xf32> to vector<8x128xf32>
    %142 = vector.extract_strided_slice %133 {offsets = [0, 256], sizes = [8, 128], strides = [1, 1]} : vector<8x512xf32> to vector<8x128xf32>
    %143 = vector.extract_strided_slice %133 {offsets = [0, 384], sizes = [8, 128], strides = [1, 1]} : vector<8x512xf32> to vector<8x128xf32>
    %144 = arith.mulf %140, %143 : vector<8x128xf32>
    %145 = arith.addf %142, %144 : vector<8x128xf32>
    %146 = math.tanh %145 : vector<8x128xf32>
    %cst_39 = arith.constant 1.000000e+00 : f32
    %147 = vector.broadcast %cst_39 : f32 to vector<8x128xf32>
    %148 = arith.subf %147, %141 : vector<8x128xf32>
    %149 = arith.mulf %148, %146 : vector<8x128xf32>
    %150 = arith.mulf %141, %113 : vector<8x128xf32>
    %151 = arith.addf %149, %150 : vector<8x128xf32>
    %cst_40 = arith.constant 0.000000e+00 : f32
    %152 = vector.broadcast %cst_40 : f32 to vector<8x128xf32>
    %153 = arith.maximumf %151, %152 : vector<8x128xf32>
    %cst_41 = arith.constant dense<0.000000e+00> : vector<8x128xf32>
    %154 = tpu.matmul %153, %2, %cst_41 {dimension_numbers = #tpu.dot_dimension_numbers<[1], [0], [0], [1], [0, 0, 1, 1], [], []>} : vector<8x128xf32>, vector<128x128xf32>, vector<8x128xf32> -> vector<8x128xf32>
    %155 = arith.addf %154, %8 : vector<8x128xf32>
    %cst_42 = arith.constant dense<0xFF800000> : vector<8xf32>
    %156 = vector.multi_reduction <maximumf>, %155, %cst_42 [1] : vector<8x128xf32> to vector<8xf32>
    %157 = vector.shape_cast %156 : vector<8xf32> to vector<8x1xf32>
    %158 = vector.broadcast %157 : vector<8x1xf32> to vector<8x128xf32>
    %159 = arith.cmpf oge, %155, %158 : vector<8x128xf32>
    %c128_i32_43 = arith.constant 128 : i32
    %160 = vector.broadcast %c128_i32_43 : i32 to vector<8x128xi32>
    %161 = arith.select %159, %9, %160 : vector<8x128xi1>, vector<8x128xi32>
    %cst_44 = arith.constant dense<2147483647> : vector<8xi32>
    %162 = vector.multi_reduction <minsi>, %161, %cst_44 [1] : vector<8x128xi32> to vector<8xi32>
    %163 = vector.shape_cast %162 : vector<8xi32> to vector<8x1xi32>
    %164 = vector.broadcast %163 : vector<8x1xi32> to vector<8x128xi32>
    %165 = arith.cmpi eq, %9, %164 : vector<8x128xi32>
    %166 = arith.extui %165 : vector<8x128xi1> to vector<8x128xi32>
    %167 = arith.sitofp %166 : vector<8x128xi32> to vector<8x128xf32>
    %cst_45 = arith.constant dense<0.000000e+00> : vector<8x512xf32>
    %168 = tpu.matmul %151, %1, %cst_45 {dimension_numbers = #tpu.dot_dimension_numbers<[1], [0], [0], [1], [0, 0, 1, 1], [], []>} : vector<8x128xf32>, vector<128x512xf32>, vector<8x512xf32> -> vector<8x512xf32>
    %cst_46 = arith.constant dense<0.000000e+00> : vector<8x512xf32>
    %169 = tpu.matmul %167, %0, %cst_46 {dimension_numbers = #tpu.dot_dimension_numbers<[1], [0], [0], [1], [0, 0, 1, 1], [], []>} : vector<8x128xf32>, vector<128x512xf32>, vector<8x512xf32> -> vector<8x512xf32>
    %170 = arith.addf %168, %169 : vector<8x512xf32>
    %171 = arith.addf %170, %5 : vector<8x512xf32>
    %172 = vector.extract_strided_slice %171 {offsets = [0, 0], sizes = [8, 256], strides = [1, 1]} : vector<8x512xf32> to vector<8x256xf32>
    %173 = arith.negf %172 : vector<8x256xf32>
    %174 = math.exp %173 : vector<8x256xf32>
    %cst_47 = arith.constant 1.000000e+00 : f32
    %175 = vector.broadcast %cst_47 : f32 to vector<8x256xf32>
    %176 = arith.addf %175, %174 : vector<8x256xf32>
    %177 = arith.divf %175, %176 : vector<8x256xf32>
    %178 = vector.extract_strided_slice %177 {offsets = [0, 0], sizes = [8, 128], strides = [1, 1]} : vector<8x256xf32> to vector<8x128xf32>
    %179 = vector.extract_strided_slice %177 {offsets = [0, 128], sizes = [8, 128], strides = [1, 1]} : vector<8x256xf32> to vector<8x128xf32>
    %180 = vector.extract_strided_slice %171 {offsets = [0, 256], sizes = [8, 128], strides = [1, 1]} : vector<8x512xf32> to vector<8x128xf32>
    %181 = vector.extract_strided_slice %171 {offsets = [0, 384], sizes = [8, 128], strides = [1, 1]} : vector<8x512xf32> to vector<8x128xf32>
    %182 = arith.mulf %178, %181 : vector<8x128xf32>
    %183 = arith.addf %180, %182 : vector<8x128xf32>
    %184 = math.tanh %183 : vector<8x128xf32>
    %cst_48 = arith.constant 1.000000e+00 : f32
    %185 = vector.broadcast %cst_48 : f32 to vector<8x128xf32>
    %186 = arith.subf %185, %179 : vector<8x128xf32>
    %187 = arith.mulf %186, %184 : vector<8x128xf32>
    %188 = arith.mulf %179, %151 : vector<8x128xf32>
    %189 = arith.addf %187, %188 : vector<8x128xf32>
    %cst_49 = arith.constant 0.000000e+00 : f32
    %190 = vector.broadcast %cst_49 : f32 to vector<8x128xf32>
    %191 = arith.maximumf %189, %190 : vector<8x128xf32>
    %cst_50 = arith.constant dense<0.000000e+00> : vector<8x128xf32>
    %192 = tpu.matmul %191, %2, %cst_50 {dimension_numbers = #tpu.dot_dimension_numbers<[1], [0], [0], [1], [0, 0, 1, 1], [], []>} : vector<8x128xf32>, vector<128x128xf32>, vector<8x128xf32> -> vector<8x128xf32>
    %193 = arith.addf %192, %8 : vector<8x128xf32>
    %cst_51 = arith.constant dense<0xFF800000> : vector<8xf32>
    %194 = vector.multi_reduction <maximumf>, %193, %cst_51 [1] : vector<8x128xf32> to vector<8xf32>
    %195 = vector.shape_cast %194 : vector<8xf32> to vector<8x1xf32>
    %196 = vector.broadcast %195 : vector<8x1xf32> to vector<8x128xf32>
    %197 = arith.cmpf oge, %193, %196 : vector<8x128xf32>
    %c128_i32_52 = arith.constant 128 : i32
    %198 = vector.broadcast %c128_i32_52 : i32 to vector<8x128xi32>
    %199 = arith.select %197, %9, %198 : vector<8x128xi1>, vector<8x128xi32>
    %cst_53 = arith.constant dense<2147483647> : vector<8xi32>
    %200 = vector.multi_reduction <minsi>, %199, %cst_53 [1] : vector<8x128xi32> to vector<8xi32>
    %201 = vector.shape_cast %200 : vector<8xi32> to vector<8x1xi32>
    %202 = vector.broadcast %201 : vector<8x1xi32> to vector<8x128xi32>
    %203 = arith.cmpi eq, %9, %202 : vector<8x128xi32>
    %204 = arith.extui %203 : vector<8x128xi1> to vector<8x128xi32>
    %205 = arith.sitofp %204 : vector<8x128xi32> to vector<8x128xf32>
    %cst_54 = arith.constant dense<0.000000e+00> : vector<8x512xf32>
    %206 = tpu.matmul %189, %1, %cst_54 {dimension_numbers = #tpu.dot_dimension_numbers<[1], [0], [0], [1], [0, 0, 1, 1], [], []>} : vector<8x128xf32>, vector<128x512xf32>, vector<8x512xf32> -> vector<8x512xf32>
    %cst_55 = arith.constant dense<0.000000e+00> : vector<8x512xf32>
    %207 = tpu.matmul %205, %0, %cst_55 {dimension_numbers = #tpu.dot_dimension_numbers<[1], [0], [0], [1], [0, 0, 1, 1], [], []>} : vector<8x128xf32>, vector<128x512xf32>, vector<8x512xf32> -> vector<8x512xf32>
    %208 = arith.addf %206, %207 : vector<8x512xf32>
    %209 = arith.addf %208, %5 : vector<8x512xf32>
    %210 = vector.extract_strided_slice %209 {offsets = [0, 0], sizes = [8, 256], strides = [1, 1]} : vector<8x512xf32> to vector<8x256xf32>
    %211 = arith.negf %210 : vector<8x256xf32>
    %212 = math.exp %211 : vector<8x256xf32>
    %cst_56 = arith.constant 1.000000e+00 : f32
    %213 = vector.broadcast %cst_56 : f32 to vector<8x256xf32>
    %214 = arith.addf %213, %212 : vector<8x256xf32>
    %215 = arith.divf %213, %214 : vector<8x256xf32>
    %216 = vector.extract_strided_slice %215 {offsets = [0, 0], sizes = [8, 128], strides = [1, 1]} : vector<8x256xf32> to vector<8x128xf32>
    %217 = vector.extract_strided_slice %215 {offsets = [0, 128], sizes = [8, 128], strides = [1, 1]} : vector<8x256xf32> to vector<8x128xf32>
    %218 = vector.extract_strided_slice %209 {offsets = [0, 256], sizes = [8, 128], strides = [1, 1]} : vector<8x512xf32> to vector<8x128xf32>
    %219 = vector.extract_strided_slice %209 {offsets = [0, 384], sizes = [8, 128], strides = [1, 1]} : vector<8x512xf32> to vector<8x128xf32>
    %220 = arith.mulf %216, %219 : vector<8x128xf32>
    %221 = arith.addf %218, %220 : vector<8x128xf32>
    %222 = math.tanh %221 : vector<8x128xf32>
    %cst_57 = arith.constant 1.000000e+00 : f32
    %223 = vector.broadcast %cst_57 : f32 to vector<8x128xf32>
    %224 = arith.subf %223, %217 : vector<8x128xf32>
    %225 = arith.mulf %224, %222 : vector<8x128xf32>
    %226 = arith.mulf %217, %189 : vector<8x128xf32>
    %227 = arith.addf %225, %226 : vector<8x128xf32>
    %cst_58 = arith.constant 0.000000e+00 : f32
    %228 = vector.broadcast %cst_58 : f32 to vector<8x128xf32>
    %229 = arith.maximumf %227, %228 : vector<8x128xf32>
    %cst_59 = arith.constant dense<0.000000e+00> : vector<8x128xf32>
    %230 = tpu.matmul %229, %2, %cst_59 {dimension_numbers = #tpu.dot_dimension_numbers<[1], [0], [0], [1], [0, 0, 1, 1], [], []>} : vector<8x128xf32>, vector<128x128xf32>, vector<8x128xf32> -> vector<8x128xf32>
    %231 = arith.addf %230, %8 : vector<8x128xf32>
    %cst_60 = arith.constant dense<0xFF800000> : vector<8xf32>
    %232 = vector.multi_reduction <maximumf>, %231, %cst_60 [1] : vector<8x128xf32> to vector<8xf32>
    %233 = vector.shape_cast %232 : vector<8xf32> to vector<8x1xf32>
    %234 = vector.broadcast %233 : vector<8x1xf32> to vector<8x128xf32>
    %235 = arith.cmpf oge, %231, %234 : vector<8x128xf32>
    %c128_i32_61 = arith.constant 128 : i32
    %236 = vector.broadcast %c128_i32_61 : i32 to vector<8x128xi32>
    %237 = arith.select %235, %9, %236 : vector<8x128xi1>, vector<8x128xi32>
    %cst_62 = arith.constant dense<2147483647> : vector<8xi32>
    %238 = vector.multi_reduction <minsi>, %237, %cst_62 [1] : vector<8x128xi32> to vector<8xi32>
    %239 = vector.shape_cast %238 : vector<8xi32> to vector<8x1xi32>
    %240 = vector.broadcast %239 : vector<8x1xi32> to vector<8x128xi32>
    %241 = arith.cmpi eq, %9, %240 : vector<8x128xi32>
    %242 = arith.extui %241 : vector<8x128xi1> to vector<8x128xi32>
    %243 = arith.sitofp %242 : vector<8x128xi32> to vector<8x128xf32>
    %cst_63 = arith.constant dense<0.000000e+00> : vector<8x512xf32>
    %244 = tpu.matmul %227, %1, %cst_63 {dimension_numbers = #tpu.dot_dimension_numbers<[1], [0], [0], [1], [0, 0, 1, 1], [], []>} : vector<8x128xf32>, vector<128x512xf32>, vector<8x512xf32> -> vector<8x512xf32>
    %cst_64 = arith.constant dense<0.000000e+00> : vector<8x512xf32>
    %245 = tpu.matmul %243, %0, %cst_64 {dimension_numbers = #tpu.dot_dimension_numbers<[1], [0], [0], [1], [0, 0, 1, 1], [], []>} : vector<8x128xf32>, vector<128x512xf32>, vector<8x512xf32> -> vector<8x512xf32>
    %246 = arith.addf %244, %245 : vector<8x512xf32>
    %247 = arith.addf %246, %5 : vector<8x512xf32>
    %248 = vector.extract_strided_slice %247 {offsets = [0, 0], sizes = [8, 256], strides = [1, 1]} : vector<8x512xf32> to vector<8x256xf32>
    %249 = arith.negf %248 : vector<8x256xf32>
    %250 = math.exp %249 : vector<8x256xf32>
    %cst_65 = arith.constant 1.000000e+00 : f32
    %251 = vector.broadcast %cst_65 : f32 to vector<8x256xf32>
    %252 = arith.addf %251, %250 : vector<8x256xf32>
    %253 = arith.divf %251, %252 : vector<8x256xf32>
    %254 = vector.extract_strided_slice %253 {offsets = [0, 0], sizes = [8, 128], strides = [1, 1]} : vector<8x256xf32> to vector<8x128xf32>
    %255 = vector.extract_strided_slice %253 {offsets = [0, 128], sizes = [8, 128], strides = [1, 1]} : vector<8x256xf32> to vector<8x128xf32>
    %256 = vector.extract_strided_slice %247 {offsets = [0, 256], sizes = [8, 128], strides = [1, 1]} : vector<8x512xf32> to vector<8x128xf32>
    %257 = vector.extract_strided_slice %247 {offsets = [0, 384], sizes = [8, 128], strides = [1, 1]} : vector<8x512xf32> to vector<8x128xf32>
    %258 = arith.mulf %254, %257 : vector<8x128xf32>
    %259 = arith.addf %256, %258 : vector<8x128xf32>
    %260 = math.tanh %259 : vector<8x128xf32>
    %cst_66 = arith.constant 1.000000e+00 : f32
    %261 = vector.broadcast %cst_66 : f32 to vector<8x128xf32>
    %262 = arith.subf %261, %255 : vector<8x128xf32>
    %263 = arith.mulf %262, %260 : vector<8x128xf32>
    %264 = arith.mulf %255, %227 : vector<8x128xf32>
    %265 = arith.addf %263, %264 : vector<8x128xf32>
    %cst_67 = arith.constant 0.000000e+00 : f32
    %266 = vector.broadcast %cst_67 : f32 to vector<8x128xf32>
    %267 = arith.maximumf %265, %266 : vector<8x128xf32>
    %cst_68 = arith.constant dense<0.000000e+00> : vector<8x128xf32>
    %268 = tpu.matmul %267, %2, %cst_68 {dimension_numbers = #tpu.dot_dimension_numbers<[1], [0], [0], [1], [0, 0, 1, 1], [], []>} : vector<8x128xf32>, vector<128x128xf32>, vector<8x128xf32> -> vector<8x128xf32>
    %269 = arith.addf %268, %8 : vector<8x128xf32>
    %cst_69 = arith.constant dense<0xFF800000> : vector<8xf32>
    %270 = vector.multi_reduction <maximumf>, %269, %cst_69 [1] : vector<8x128xf32> to vector<8xf32>
    %271 = vector.shape_cast %270 : vector<8xf32> to vector<8x1xf32>
    %272 = vector.broadcast %271 : vector<8x1xf32> to vector<8x128xf32>
    %273 = arith.cmpf oge, %269, %272 : vector<8x128xf32>
    %c128_i32_70 = arith.constant 128 : i32
    %274 = vector.broadcast %c128_i32_70 : i32 to vector<8x128xi32>
    %275 = arith.select %273, %9, %274 : vector<8x128xi1>, vector<8x128xi32>
    %cst_71 = arith.constant dense<2147483647> : vector<8xi32>
    %276 = vector.multi_reduction <minsi>, %275, %cst_71 [1] : vector<8x128xi32> to vector<8xi32>
    %277 = vector.shape_cast %276 : vector<8xi32> to vector<8x1xi32>
    %278 = vector.broadcast %277 : vector<8x1xi32> to vector<8x128xi32>
    %279 = arith.cmpi eq, %9, %278 : vector<8x128xi32>
    %280 = arith.extui %279 : vector<8x128xi1> to vector<8x128xi32>
    %281 = arith.sitofp %280 : vector<8x128xi32> to vector<8x128xf32>
    %cst_72 = arith.constant dense<0.000000e+00> : vector<8x512xf32>
    %282 = tpu.matmul %265, %1, %cst_72 {dimension_numbers = #tpu.dot_dimension_numbers<[1], [0], [0], [1], [0, 0, 1, 1], [], []>} : vector<8x128xf32>, vector<128x512xf32>, vector<8x512xf32> -> vector<8x512xf32>
    %cst_73 = arith.constant dense<0.000000e+00> : vector<8x512xf32>
    %283 = tpu.matmul %281, %0, %cst_73 {dimension_numbers = #tpu.dot_dimension_numbers<[1], [0], [0], [1], [0, 0, 1, 1], [], []>} : vector<8x128xf32>, vector<128x512xf32>, vector<8x512xf32> -> vector<8x512xf32>
    %284 = arith.addf %282, %283 : vector<8x512xf32>
    %285 = arith.addf %284, %5 : vector<8x512xf32>
    %286 = vector.extract_strided_slice %285 {offsets = [0, 0], sizes = [8, 256], strides = [1, 1]} : vector<8x512xf32> to vector<8x256xf32>
    %287 = arith.negf %286 : vector<8x256xf32>
    %288 = math.exp %287 : vector<8x256xf32>
    %cst_74 = arith.constant 1.000000e+00 : f32
    %289 = vector.broadcast %cst_74 : f32 to vector<8x256xf32>
    %290 = arith.addf %289, %288 : vector<8x256xf32>
    %291 = arith.divf %289, %290 : vector<8x256xf32>
    %292 = vector.extract_strided_slice %291 {offsets = [0, 0], sizes = [8, 128], strides = [1, 1]} : vector<8x256xf32> to vector<8x128xf32>
    %293 = vector.extract_strided_slice %291 {offsets = [0, 128], sizes = [8, 128], strides = [1, 1]} : vector<8x256xf32> to vector<8x128xf32>
    %294 = vector.extract_strided_slice %285 {offsets = [0, 256], sizes = [8, 128], strides = [1, 1]} : vector<8x512xf32> to vector<8x128xf32>
    %295 = vector.extract_strided_slice %285 {offsets = [0, 384], sizes = [8, 128], strides = [1, 1]} : vector<8x512xf32> to vector<8x128xf32>
    %296 = arith.mulf %292, %295 : vector<8x128xf32>
    %297 = arith.addf %294, %296 : vector<8x128xf32>
    %298 = math.tanh %297 : vector<8x128xf32>
    %cst_75 = arith.constant 1.000000e+00 : f32
    %299 = vector.broadcast %cst_75 : f32 to vector<8x128xf32>
    %300 = arith.subf %299, %293 : vector<8x128xf32>
    %301 = arith.mulf %300, %298 : vector<8x128xf32>
    %302 = arith.mulf %293, %265 : vector<8x128xf32>
    %303 = arith.addf %301, %302 : vector<8x128xf32>
    %cst_76 = arith.constant 0.000000e+00 : f32
    %304 = vector.broadcast %cst_76 : f32 to vector<8x128xf32>
    %305 = arith.maximumf %303, %304 : vector<8x128xf32>
    %cst_77 = arith.constant dense<0.000000e+00> : vector<8x128xf32>
    %306 = tpu.matmul %305, %2, %cst_77 {dimension_numbers = #tpu.dot_dimension_numbers<[1], [0], [0], [1], [0, 0, 1, 1], [], []>} : vector<8x128xf32>, vector<128x128xf32>, vector<8x128xf32> -> vector<8x128xf32>
    %307 = arith.addf %306, %8 : vector<8x128xf32>
    %cst_78 = arith.constant dense<0xFF800000> : vector<8xf32>
    %308 = vector.multi_reduction <maximumf>, %307, %cst_78 [1] : vector<8x128xf32> to vector<8xf32>
    %309 = vector.shape_cast %308 : vector<8xf32> to vector<8x1xf32>
    %310 = vector.broadcast %309 : vector<8x1xf32> to vector<8x128xf32>
    %311 = arith.cmpf oge, %307, %310 : vector<8x128xf32>
    %c128_i32_79 = arith.constant 128 : i32
    %312 = vector.broadcast %c128_i32_79 : i32 to vector<8x128xi32>
    %313 = arith.select %311, %9, %312 : vector<8x128xi1>, vector<8x128xi32>
    %cst_80 = arith.constant dense<2147483647> : vector<8xi32>
    %314 = vector.multi_reduction <minsi>, %313, %cst_80 [1] : vector<8x128xi32> to vector<8xi32>
    %315 = vector.shape_cast %314 : vector<8xi32> to vector<8x1xi32>
    %316 = tpu.concatenate %49, %87, %125, %163, %201, %239, %277, %315 in 1 : vector<8x1xi32>, vector<8x1xi32>, vector<8x1xi32>, vector<8x1xi32>, vector<8x1xi32>, vector<8x1xi32>, vector<8x1xi32>, vector<8x1xi32> -> vector<8x8xi32>
    %c0_81 = arith.constant 0 : index
    %c0_82 = arith.constant 0 : index
    %317 = vector.load %arg7[%c0_81, %c0_82] : memref<8x8xi32, #tpu.memory_space<vmem>>, vector<8x8xi32>
    tpu.vector_store %arg7[%c0_81, %c0_82], %316 {strides = array<i32>} : memref<8x8xi32, #tpu.memory_space<vmem>>, vector<8x8xi32>,
    return
  }
  func.func @transform_0(%arg0: i32) -> (i32, i32) {
    %c0_i32 = arith.constant 0 : i32
    %c0_i32_0 = arith.constant 0 : i32
    return %arg0, %c0_i32 : i32, i32
  }
  func.func @transform_1(%arg0: i32) -> (i32, i32) {
    %c0_i32 = arith.constant 0 : i32
    %c0_i32_0 = arith.constant 0 : i32
    %c0_i32_1 = arith.constant 0 : i32
    return %c0_i32, %c0_i32_0 : i32, i32
  }
  func.func @transform_2(%arg0: i32) -> (i32, i32) {
    %c0_i32 = arith.constant 0 : i32
    %c0_i32_0 = arith.constant 0 : i32
    %c0_i32_1 = arith.constant 0 : i32
    return %c0_i32, %c0_i32_0 : i32, i32
  }
  func.func @transform_3(%arg0: i32) -> (i32, i32) {
    %c0_i32 = arith.constant 0 : i32
    %c0_i32_0 = arith.constant 0 : i32
    %c0_i32_1 = arith.constant 0 : i32
    return %c0_i32, %c0_i32_0 : i32, i32
  }
  func.func @transform_4(%arg0: i32) -> (i32, i32) {
    %c0_i32 = arith.constant 0 : i32
    %c0_i32_0 = arith.constant 0 : i32
    %c0_i32_1 = arith.constant 0 : i32
    return %c0_i32, %c0_i32_0 : i32, i32
  }
  func.func @transform_5(%arg0: i32) -> (i32, i32) {
    %c0_i32 = arith.constant 0 : i32
    %c0_i32_0 = arith.constant 0 : i32
    %c0_i32_1 = arith.constant 0 : i32
    return %c0_i32, %c0_i32_0 : i32, i32
  }
  func.func @transform_6(%arg0: i32) -> (i32, i32) {
    %c0_i32 = arith.constant 0 : i32
    %c0_i32_0 = arith.constant 0 : i32
    return %arg0, %c0_i32 : i32, i32
  }
}

</mosaic_0001>

<bundles_post_ra>
// kernel: caption_rnn_forward.1
= control target key start
LH: loop header
LB: loop body
LE: loop exit
PB: predicated region body
PF: predicated region fallthrough
CT: control target
= control target key end

     0   :  { %s5538_s21 = smov 0   ;;  %s7007_s0 = inlined_call_operand.vmem [shape: f32[16,128], index: 0, kind: input, shape index: {}]   ;;  %s7008_s1 = inlined_call_operand.vmem [shape: f32[128,512], index: 1, kind: input, shape index: {}]   ;;  %s7009_s2 = inlined_call_operand.vmem [shape: f32[128,512], index: 2, kind: input, shape index: {}]   ;;  %s7010_s3 = inlined_call_operand.vmem [shape: f32[1,512], index: 3, kind: input, shape index: {}]   ;;  %s7011_s4 = inlined_call_operand.vmem [shape: f32[128,128], index: 4, kind: input, shape index: {}]   ;;  %s7012_s5 = inlined_call_operand.vmem [shape: f32[1,128], index: 5, kind: input, shape index: {}]   ;;  %s7013_s6 = inlined_call_operand.vmem [shape: s32[16,8], index: 6, kind: output, shape index: {}]  }
   0x1 LB: > { %s3684_s22 = sadd.s32 4294967295, %s5497_s21   ;;  %p3688_p0 = scmp.ge.s32.totalorder %s5497_s21, 1  ;;  %s5497_s21 = sphi %s5538_s21, %s16_s21  }
   0x2   : > { %p211_p1 = scmp.lt.s32.totalorder %s5497_s21, 3 }
   0x4   : > { %p212_p2 = pnand %p3688_p0, %p211_p1 }
   0x6   : > { %215 = sbr.rel (%p212_p2) target bundleno = 7618 (0x1dc2), region = 44 }
   0xd   : > { %v248_v0 = vld [vmem:[%s7008_s1 + $0x8] sm:$0xff]  ;;  %v250_v2 = vld [vmem:[%s7008_s1 + $0x18] sm:$0xff]  ;;  %v247_v5 = vld [vmem:[%s7008_s1] sm:$0xff]  ;;  %v7017_v7 = vmov 0.0   ;;  %p6062_p3 = scmp.lt.s32.totalorder %s3684_s22, 1  ;;  %vm5502_vm1 = vmmov 0  }
   0xe   : > { %v252_v1 = vld [vmem:[%s7008_s1 + $0x28] sm:$0xff]  ;;  %v254_v4 = vld [vmem:[%s7008_s1 + $0x38] sm:$0xff]  ;;  %v251_v6 = vld [vmem:[%s7008_s1 + $0x20] sm:$0xff]  ;;  %490 = vmatprep.mubr.f32.mxu0 %v7017_v7  ;;  %561 = vmatprep.mubr.f32.mxu1 %v7017_v7  ;;  %vm3615_vm10 = vcmask 7168   ;;  %vm3617_vm11 = vcmask 15360   ;;  %vm3619_vm15 = vcmask 23552  }
   0xf   : > { %v5555_v3 = vpack.c.bf16 %v252_v1, %v248_v0  ;;  %v5568_v8 = vpack.c.bf16 %v254_v4, %v250_v2  ;;  %v5570_v9 = vpack.c.bf16 %v251_v6, %v247_v5  ;;  %v249_v10 = vld [vmem:[%s7008_s1 + $0x10] sm:$0xff]  ;;  %v256_v12 = vld [vmem:[%s7008_s1 + $0x48] sm:$0xff]  ;;  %v258_v15 = vld [vmem:[%s7008_s1 + $0x58] sm:$0xff]  ;;  %s7394_s22 = smov (!%p6062_p3, %s3684_s22), 1 }
  0x10   : > { %v253_v11 = vld [vmem:[%s7008_s1 + $0x30] sm:$0xff]  ;;  %v260_v14 = vld [vmem:[%s7008_s1 + $0x68] sm:$0xff]  ;;  %v262_v16 = vld [vmem:[%s7008_s1 + $0x78] sm:$0xff]  ;;  %s3689_s14 = sshll.u32 %s7394_s22, 3 }
  0x11   : > { %7115 = vst [vmem:[#allocation2_spill] sm:$0xff] %v5555_v3  ;;  %7116 = vst [vmem:[#allocation3_spill] sm:$0xff] %v5568_v8  ;;  %4151 = vmatprep.subr.bf16.mxu0 %v5555_v3  ;;  %v5582_v13 = vpack.c.bf16 %v253_v11, %v249_v10  ;;  %4183 = vmatprep.subr.bf16.mxu1 %v5568_v8  ;;  %v5595_v17 = vpack.c.bf16 %v260_v14, %v256_v12  ;;  %v255_v19 = vld [vmem:[%s7008_s1 + $0x40] sm:$0xff]  ;;  %v257_v21 = vld [vmem:[%s7008_s1 + $0x50] sm:$0xff]  ;;  %s242_s17 = scalar_lea.vmem %s7007_s0, %s3689_s14  ;;  %s246_s16 = scalar_lea.vmem %s7013_s6, %s3689_s14 }
  0x12   : > { %7117 = vst [vmem:[#allocation4_spill] sm:$0xff] %v5570_v9  ;;  %4153 = vmatpush1.bf16.msra.mxu0 %v5570_v9  ;;  %v5597_v18 = vpack.c.bf16 %v262_v16, %v258_v15  ;;  %v259_v20 = vld [vmem:[%s7008_s1 + $0x60] sm:$0xff]  ;;  %v261_v23 = vld [vmem:[%s7008_s1 + $0x70] sm:$0xff]  ;;  %v264_v24 = vld [vmem:[%s7008_s1 + $0x88] sm:$0xff] }
  0x13   : > { %7118 = vst [vmem:[#allocation5_spill] sm:$0xff] %v5595_v17  ;;  %4185 = vmatpush1.bf16.msra.mxu1 %v5582_v13  ;;  %v5609_v22 = vpack.c.bf16 %v259_v20, %v255_v19  ;;  %v268_v25 = vld [vmem:[%s7008_s1 + $0xa8] sm:$0xff]  ;;  %4155 = vmatprep.subr.bf16.mxu0 %v5595_v17  ;;  %v5622_v26 = vpack.c.bf16 %v261_v23, %v257_v21  ;;  %v266_v28 = vld [vmem:[%s7008_s1 + $0x98] sm:$0xff]  ;;  %v263_v30 = vld [vmem:[%s7008_s1 + $0x80] sm:$0xff] }
  0x14   : > { %4187 = vmatprep.subr.bf16.mxu1 %v5597_v18  ;;  %v5624_v27 = vpack.c.bf16 %v268_v25, %v264_v24  ;;  %v270_v29 = vld [vmem:[%s7008_s1 + $0xb8] sm:$0xff]  ;;  %v267_v32 = vld [vmem:[%s7008_s1 + $0xa0] sm:$0xff]  ;;  %v265_v33 = vld [vmem:[%s7008_s1 + $0x90] sm:$0xff] }
  0x15   : > { %7119 = vst [vmem:[#allocation6_spill] sm:$0xff] %v5609_v22  ;;  %v5635_v31 = vpack.c.bf16 %v270_v29, %v266_v28  ;;  %v269_v34 = vld [vmem:[%s7008_s1 + $0xb0] sm:$0xff]  ;;  %v5647_v35 = vpack.c.bf16 %v267_v32, %v263_v30  ;;  %v272_v36 = vld [vmem:[%s7008_s1 + $0xc8] sm:$0xff]  ;;  %v274_v38 = vld [vmem:[%s7008_s1 + $0xd8] sm:$0xff] }
  0x16   : > { %7120 = vst [vmem:[#allocation7_spill] sm:$0xff] %v5624_v27  ;;  %4157 = vmatpush1.bf16.msra.mxu0 %v5609_v22  ;;  %v276_v37 = vld [vmem:[%s7008_s1 + $0xe8] sm:$0xff]  ;;  %v5660_v39 = vpack.c.bf16 %v269_v34, %v265_v33  ;;  %v278_v41 = vld [vmem:[%s7008_s1 + $0xf8] sm:$0xff]  ;;  %v271_v42 = vld [vmem:[%s7008_s1 + $0xc0] sm:$0xff] }
  0x17   : > { %7121 = vst [vmem:[#allocation8_spill] sm:$0xff] %v5647_v35  ;;  %4189 = vmatpush1.bf16.msra.mxu1 %v5622_v26  ;;  %4159 = vmatprep.subr.bf16.mxu0 %v5624_v27  ;;  %v5662_v40 = vpack.c.bf16 %v276_v37, %v272_v36  ;;  %v275_v43 = vld [vmem:[%s7008_s1 + $0xe0] sm:$0xff]  ;;  %v5674_v44 = vpack.c.bf16 %v278_v41, %v274_v38  ;;  %v273_v45 = vld [vmem:[%s7008_s1 + $0xd0] sm:$0xff]  ;;  %v280_v47 = vld [vmem:[%s7008_s1 + $0x108] sm:$0xff]  ;;  %v7016_v36 = vlaneseq }
  0x18   : > { %4191 = vmatprep.subr.bf16.mxu1 %v5635_v31  ;;  %v277_v46 = vld [vmem:[%s7008_s1 + $0xf0] sm:$0xff]  ;;  %v284_v48 = vld [vmem:[%s7008_s1 + $0x128] sm:$0xff]  ;;  %v282_v49 = vld [vmem:[%s7008_s1 + $0x118] sm:$0xff]  ;;  %v5695_v51 = vpack.c.bf16 %v275_v43, %v271_v42 }
  0x19   : > { %7122 = vst [vmem:[#allocation9_spill] sm:$0xff] %v5662_v40  ;;  %v286_v50 = vld [vmem:[%s7008_s1 + $0x138] sm:$0xff]  ;;  %v5699_v52 = vpack.c.bf16 %v277_v46, %v273_v45  ;;  %v5701_v53 = vpack.c.bf16 %v284_v48, %v280_v47  ;;  %v279_v54 = vld [vmem:[%s7008_s1 + $0x100] sm:$0xff]  ;;  %v281_v56 = vld [vmem:[%s7008_s1 + $0x110] sm:$0xff] }
  0x1a   : > { %4161 = vmatpush1.bf16.msra.mxu0 %v5647_v35  ;;  %7123 = vst [vmem:[#allocation10_spill] sm:$0xff] %v5695_v51  ;;  %v283_v55 = vld [vmem:[%s7008_s1 + $0x120] sm:$0xff]  ;;  %v5713_v57 = vpack.c.bf16 %v286_v50, %v282_v49  ;;  %v285_v58 = vld [vmem:[%s7008_s1 + $0x130] sm:$0xff]  ;;  %v288_v59 = vld [vmem:[%s7008_s1 + $0x148] sm:$0xff] }
  0x1b   : > { %4193 = vmatpush1.bf16.msra.mxu1 %v5660_v39  ;;  %4163 = vmatprep.subr.bf16.mxu0 %v5662_v40  ;;  %7124 = vst [vmem:[#allocation11_spill] sm:$0xff] %v5701_v53  ;;  %v292_v60 = vld [vmem:[%s7008_s1 + $0x168] sm:$0xff]  ;;  %v290_v61 = vld [vmem:[%s7008_s1 + $0x158] sm:$0xff]  ;;  %v5731_v63 = vpack.c.bf16 %v283_v55, %v279_v54  ;;  %v5735_v0 = vpack.c.bf16 %v285_v58, %v281_v56  ;;  %v287_v2 = vld [vmem:[%s7008_s1 + $0x140] sm:$0xff]  ;;  %v5842_v55 = vand.u32 127, %v7016_v36 }
  0x1c   : > { %4195 = vmatprep.subr.bf16.mxu1 %v5674_v44  ;;  %v294_v62 = vld [vmem:[%s7008_s1 + $0x178] sm:$0xff]  ;;  %v5737_v1 = vpack.c.bf16 %v292_v60, %v288_v59  ;;  %v291_v4 = vld [vmem:[%s7008_s1 + $0x160] sm:$0xff]  ;;  %v289_v5 = vld [vmem:[%s7008_s1 + $0x150] sm:$0xff] }
  0x1d   : > { %7125 = vst [vmem:[#allocation12_spill] sm:$0xff] %v5731_v63  ;;  %v5749_v6 = vpack.c.bf16 %v294_v62, %v290_v61  ;;  %v293_v10 = vld [vmem:[%s7008_s1 + $0x170] sm:$0xff]  ;;  %v296_v11 = vld [vmem:[%s7008_s1 + $0x188] sm:$0xff]  ;;  %v298_v14 = vld [vmem:[%s7008_s1 + $0x198] sm:$0xff]  ;;  %v5767_v16 = vpack.c.bf16 %v291_v4, %v287_v2  ;;  %vm423_vm0 = vcmp.eq.s32.totalorder %v5842_v55, 1 }
  0x1e   : > { %4165 = vmatpush1.bf16.msra.mxu0 %v5695_v51  ;;  %7126 = vst [vmem:[#allocation13_spill] sm:$0xff] %v5737_v1  ;;  %v300_v12 = vld [vmem:[%s7008_s1 + $0x1a8] sm:$0xff]  ;;  %v302_v15 = vld [vmem:[%s7008_s1 + $0x1b8] sm:$0xff]  ;;  %v5771_v19 = vpack.c.bf16 %v293_v10, %v289_v5  ;;  %v295_v21 = vld [vmem:[%s7008_s1 + $0x180] sm:$0xff] }
  0x1f   : > { %4197 = vmatpush1.bf16.msra.mxu1 %v5699_v52  ;;  %4167 = vmatprep.subr.bf16.mxu0 %v5701_v53  ;;  %7127 = vst [vmem:[#allocation14_spill] sm:$0xff] %v5767_v16  ;;  %v5773_v20 = vpack.c.bf16 %v300_v12, %v296_v11  ;;  %v299_v23 = vld [vmem:[%s7008_s1 + $0x1a0] sm:$0xff]  ;;  %v297_v24 = vld [vmem:[%s7008_s1 + $0x190] sm:$0xff]  ;;  %v5785_v25 = vpack.c.bf16 %v302_v15, %v298_v14  ;;  %v304_v29 = vld [vmem:[%s7008_s1 + $0x1c8] sm:$0xff] }
  0x20   : > { %4199 = vmatprep.subr.bf16.mxu1 %v5713_v57  ;;  %v301_v28 = vld [vmem:[%s7008_s1 + $0x1b0] sm:$0xff]  ;;  %v308_v30 = vld [vmem:[%s7008_s1 + $0x1e8] sm:$0xff]  ;;  %v306_v32 = vld [vmem:[%s7008_s1 + $0x1d8] sm:$0xff]  ;;  %v5803_v34 = vpack.c.bf16 %v299_v23, %v295_v21 }
  0x21   : > { %7128 = vst [vmem:[#allocation15_spill] sm:$0xff] %v5773_v20  ;;  %v310_v33 = vld [vmem:[%s7008_s1 + $0x1f8] sm:$0xff]  ;;  %v5807_v37 = vpack.c.bf16 %v301_v28, %v297_v24  ;;  %v5809_v38 = vpack.c.bf16 %v308_v30, %v304_v29  ;;  %v303_v41 = vld [vmem:[%s7008_s1 + $0x1c0] sm:$0xff]  ;;  %v305_v43 = vld [vmem:[%s7008_s1 + $0x1d0] sm:$0xff] }
  0x22   : > { %4169 = vmatpush1.bf16.msra.mxu0 %v5731_v63  ;;  %7129 = vst [vmem:[#allocation16_spill] sm:$0xff] %v5803_v34  ;;  %v307_v42 = vld [vmem:[%s7008_s1 + $0x1e0] sm:$0xff]  ;;  %v5821_v45 = vpack.c.bf16 %v310_v33, %v306_v32  ;;  %v309_v46 = vld [vmem:[%s7008_s1 + $0x1f0] sm:$0xff]  ;;  %v312_v47 = vld [vmem:[%s7009_s2 + $0x8] sm:$0xff]  ;;  %v7014_v33 = vmov 1.0  }
  0x23   : > { %4201 = vmatpush1.bf16.msra.mxu1 %v5735_v0  ;;  %4171 = vmatprep.subr.bf16.mxu0 %v5737_v1  ;;  %7130 = vst [vmem:[#allocation17_spill] sm:$0xff] %v5809_v38  ;;  %v316_v48 = vld [vmem:[%s7009_s2 + $0x28] sm:$0xff]  ;;  %v314_v49 = vld [vmem:[%s7009_s2 + $0x18] sm:$0xff]  ;;  %v5839_v54 = vpack.c.bf16 %v307_v42, %v303_v41  ;;  %v5846_v56 = vpack.c.bf16 %v309_v46, %v305_v43  ;;  %v311_v59 = vld [vmem:[%s7009_s2] sm:$0xff] }
  0x24   : > { %4203 = vmatprep.subr.bf16.mxu1 %v5749_v6  ;;  %v318_v50 = vld [vmem:[%s7009_s2 + $0x38] sm:$0xff]  ;;  %v5848_v58 = vpack.c.bf16 %v316_v48, %v312_v47  ;;  %v315_v60 = vld [vmem:[%s7009_s2 + $0x20] sm:$0xff]  ;;  %v313_v61 = vld [vmem:[%s7009_s2 + $0x10] sm:$0xff] }
  0x25   : > { %7131 = vst [vmem:[#allocation18_spill] sm:$0xff] %v5839_v54  ;;  %v5860_v62 = vpack.c.bf16 %v318_v50, %v314_v49  ;;  %v317_v2 = vld [vmem:[%s7009_s2 + $0x30] sm:$0xff]  ;;  %v320_v4 = vld [vmem:[%s7009_s2 + $0x48] sm:$0xff]  ;;  %v322_v10 = vld [vmem:[%s7009_s2 + $0x58] sm:$0xff]  ;;  %v5879_v12 = vpack.c.bf16 %v315_v60, %v311_v59 }
  0x26   : > { %4173 = vmatpush1.bf16.msra.mxu0 %v5767_v16  ;;  %7132 = vst [vmem:[#allocation19_spill] sm:$0xff] %v5848_v58  ;;  %v324_v5 = vld [vmem:[%s7009_s2 + $0x68] sm:$0xff]  ;;  %v326_v11 = vld [vmem:[%s7009_s2 + $0x78] sm:$0xff]  ;;  %v5883_v14 = vpack.c.bf16 %v317_v2, %v313_v61  ;;  %v319_v21 = vld [vmem:[%s7009_s2 + $0x40] sm:$0xff] }
  0x27   : > { %4205 = vmatpush1.bf16.msra.mxu1 %v5771_v19  ;;  %4175 = vmatprep.subr.bf16.mxu0 %v5773_v20  ;;  %v5885_v15 = vpack.c.bf16 %v324_v5, %v320_v4  ;;  %v323_v23 = vld [vmem:[%s7009_s2 + $0x60] sm:$0xff]  ;;  %v321_v24 = vld [vmem:[%s7009_s2 + $0x50] sm:$0xff]  ;;  %v5897_v28 = vpack.c.bf16 %v326_v11, %v322_v10  ;;  %v328_v30 = vld [vmem:[%s7009_s2 + $0x88] sm:$0xff] }
  0x28   : > { %4207 = vmatprep.subr.bf16.mxu1 %v5785_v25  ;;  %v325_v29 = vld [vmem:[%s7009_s2 + $0x70] sm:$0xff]  ;;  %v332_v32 = vld [vmem:[%s7009_s2 + $0xa8] sm:$0xff]  ;;  %v330_v41 = vld [vmem:[%s7009_s2 + $0x98] sm:$0xff]  ;;  %v5921_v43 = vpack.c.bf16 %v323_v23, %v319_v21 }
  0x29   : > { %v334_v42 = vld [vmem:[%s7009_s2 + $0xb8] sm:$0xff]  ;;  %v5925_v46 = vpack.c.bf16 %v325_v29, %v321_v24  ;;  %v5927_v47 = vpack.c.bf16 %v332_v32, %v328_v30  ;;  %v327_v48 = vld [vmem:[%s7009_s2 + $0x80] sm:$0xff]  ;;  %v329_v50 = vld [vmem:[%s7009_s2 + $0x90] sm:$0xff] }
  0x2a   : > { %4177 = vmatpush1.bf16.msra.mxu0 %v5803_v34  ;;  %v331_v49 = vld [vmem:[%s7009_s2 + $0xa0] sm:$0xff]  ;;  %v5939_v59 = vpack.c.bf16 %v334_v42, %v330_v41  ;;  %v333_v60 = vld [vmem:[%s7009_s2 + $0xb0] sm:$0xff]  ;;  %v336_v61 = vld [vmem:[%s7009_s2 + $0xc8] sm:$0xff] }
  0x2b   : > { %4209 = vmatpush1.bf16.msra.mxu1 %v5807_v37  ;;  %4179 = vmatprep.subr.bf16.mxu0 %v5809_v38  ;;  %v340_v2 = vld [vmem:[%s7009_s2 + $0xe8] sm:$0xff]  ;;  %v338_v4 = vld [vmem:[%s7009_s2 + $0xd8] sm:$0xff]  ;;  %v5959_v10 = vpack.c.bf16 %v331_v49, %v327_v48  ;;  %v5963_v11 = vpack.c.bf16 %v333_v60, %v329_v50  ;;  %v335_v23 = vld [vmem:[%s7009_s2 + $0xc0] sm:$0xff] }
  0x2c   : > { %4211 = vmatprep.subr.bf16.mxu1 %v5821_v45  ;;  %v342_v5 = vld [vmem:[%s7009_s2 + $0xf8] sm:$0xff]  ;;  %v5965_v21 = vpack.c.bf16 %v340_v2, %v336_v61  ;;  %v339_v24 = vld [vmem:[%s7009_s2 + $0xe0] sm:$0xff]  ;;  %v337_v29 = vld [vmem:[%s7009_s2 + $0xd0] sm:$0xff] }
  0x2d   : > { %v5977_v30 = vpack.c.bf16 %v342_v5, %v338_v4  ;;  %v341_v32 = vld [vmem:[%s7009_s2 + $0xf0] sm:$0xff]  ;;  %v344_v41 = vld [vmem:[%s7009_s2 + $0x108] sm:$0xff]  ;;  %v346_v48 = vld [vmem:[%s7009_s2 + $0x118] sm:$0xff]  ;;  %v5995_v50 = vpack.c.bf16 %v339_v24, %v335_v23 }
  0x2e   : > { %4181 = vmatpush1.bf16.msra.mxu0 %v5839_v54  ;;  %v348_v42 = vld [vmem:[%s7009_s2 + $0x128] sm:$0xff]  ;;  %v350_v49 = vld [vmem:[%s7009_s2 + $0x138] sm:$0xff]  ;;  %v5999_v60 = vpack.c.bf16 %v341_v32, %v337_v29  ;;  %v343_v2 = vld [vmem:[%s7009_s2 + $0x100] sm:$0xff] }
  0x2f   : > { %4213 = vmatpush1.bf16.msra.mxu1 %v5846_v56  ;;  %4215 = vmatprep.subr.bf16.mxu0 %v5848_v58  ;;  %7133 = vst [vmem:[#allocation20_spill] sm:$0xff] %v5995_v50  ;;  %v6001_v61 = vpack.c.bf16 %v348_v42, %v344_v41  ;;  %v347_v4 = vld [vmem:[%s7009_s2 + $0x120] sm:$0xff]  ;;  %v345_v5 = vld [vmem:[%s7009_s2 + $0x110] sm:$0xff]  ;;  %v6013_v23 = vpack.c.bf16 %v350_v49, %v346_v48  ;;  %v352_v29 = vld [vmem:[%s7009_s2 + $0x148] sm:$0xff] }
  0x30   : > { %4247 = vmatprep.subr.bf16.mxu1 %v5860_v62  ;;  %7134 = vst [vmem:[#allocation21_spill] sm:$0xff] %v5999_v60  ;;  %v349_v24 = vld [vmem:[%s7009_s2 + $0x130] sm:$0xff]  ;;  %v356_v32 = vld [vmem:[%s7009_s2 + $0x168] sm:$0xff]  ;;  %v354_v41 = vld [vmem:[%s7009_s2 + $0x158] sm:$0xff]  ;;  %v6031_v48 = vpack.c.bf16 %v347_v4, %v343_v2 }
  0x31   : > { %3693 = vmatmul.mubr.msk.f32.vlgmr.msra.gmra.mrb[0].mxu0 %vm423_vm0, %v7014_v33  ;;  %7135 = vst [vmem:[#allocation22_spill] sm:$0xff] %v6001_v61  ;;  %7136 = vst [vmem:[#allocation23_spill] sm:$0xff] %v6013_v23  ;;  %v358_v42 = vld [vmem:[%s7009_s2 + $0x178] sm:$0xff]  ;;  %v6035_v49 = vpack.c.bf16 %v349_v24, %v345_v5  ;;  %v351_v36 = vld [vmem:[%s7009_s2 + $0x140] sm:$0xff] }
  0x32   : > { %3694 = vmatmul.mubr.msk.f32.vlgmr.msra.gmra.mrb[0].mxu1 %vm423_vm0, %v7014_v33  ;;  %4217 = vmatpush1.bf16.msra.mxu0 %v5879_v12  ;;  %7137 = vst [vmem:[#allocation24_spill] sm:$0xff] %v6031_v48  ;;  %v6037_v33 = vpack.c.bf16 %v356_v32, %v352_v29  ;;  %v353_v2 = vld [vmem:[%s7009_s2 + $0x150] sm:$0xff]  ;;  %v6049_v4 = vpack.c.bf16 %v358_v42, %v354_v41  ;;  %v360_v24 = vld [vmem:[%s7009_s2 + $0x188] sm:$0xff]  ;;  %v362_v32 = vld [vmem:[%s7009_s2 + $0x198] sm:$0xff] }
  0x33   : > { %4249 = vmatpush1.bf16.msra.mxu1 %v5883_v14  ;;  %4219 = vmatprep.subr.bf16.mxu0 %v5885_v15  ;;  %7138 = vst [vmem:[#allocation25_spill] sm:$0xff] %v6035_v49  ;;  %v357_v5 = vld [vmem:[%s7009_s2 + $0x170] sm:$0xff]  ;;  %v364_v29 = vld [vmem:[%s7009_s2 + $0x1a8] sm:$0xff]  ;;  %v366_v41 = vld [vmem:[%s7009_s2 + $0x1b8] sm:$0xff] }
  0x34   : > { %4251 = vmatprep.subr.bf16.mxu1 %v5897_v28  ;;  %632 = vmatprep.mubr.f32.mxu0 %v7017_v7  ;;  %7139 = vst [vmem:[#allocation26_spill] sm:$0xff] %v6037_v33  ;;  %7140 = vst [vmem:[#allocation27_spill] sm:$0xff] %v6049_v4 }
  0x35   : > { %703 = vmatprep.mubr.f32.mxu1 %v7017_v7  ;;  %v355_v7 = vld [vmem:[%s7009_s2 + $0x160] sm:$0xff] }
  0x36   : > { %4221 = vmatpush1.bf16.msra.mxu0 %v5921_v43  ;;  %v6073_v42 = vpack.c.bf16 %v355_v7, %v351_v36  ;;  %v361_v7 = vld [vmem:[%s7009_s2 + $0x190] sm:$0xff]  ;;  %v6091_v36 = vpack.c.bf16 %v366_v41, %v362_v32  ;;  %v374_v32 = vld [vmem:[%s7009_s2 + $0x1f8] sm:$0xff] }
  0x37   : > { %4253 = vmatpush1.bf16.msra.mxu1 %v5925_v46  ;;  %4223 = vmatprep.subr.bf16.mxu0 %v5927_v47 }
  0x38   : > { %4255 = vmatprep.subr.bf16.mxu1 %v5939_v59  ;;  %7143 = vst [vmem:[#allocation29_spill] sm:$0xff] %v6091_v36 }
  0x3a   : > { %4225 = vmatpush1.bf16.msra.mxu0 %v5959_v10 }
  0x3b   : > { %4257 = vmatpush1.bf16.msra.mxu1 %v5963_v11  ;;  %4227 = vmatprep.subr.bf16.mxu0 %v5965_v21 }
  0x3c   : > { %4259 = vmatprep.subr.bf16.mxu1 %v5977_v30 }
  0x3e   : > { %4229 = vmatpush1.bf16.msra.mxu0 %v5995_v50  ;;  %v363_v50 = vld [vmem:[%s7009_s2 + $0x1a0] sm:$0xff] }
  0x3f   : > { %4261 = vmatpush1.bf16.msra.mxu1 %v5999_v60  ;;  %4231 = vmatprep.subr.bf16.mxu0 %v6001_v61  ;;  %v6079_v61 = vpack.c.bf16 %v364_v29, %v360_v24  ;;  %v359_v60 = vld [vmem:[%s7009_s2 + $0x180] sm:$0xff]  ;;  %v372_v24 = vld [vmem:[%s7009_s2 + $0x1e8] sm:$0xff]  ;;  %v370_v29 = vld [vmem:[%s7009_s2 + $0x1d8] sm:$0xff] }
  0x40   : > { %4263 = vmatprep.subr.bf16.mxu1 %v6013_v23  ;;  %v6077_v23 = vpack.c.bf16 %v357_v5, %v353_v2  ;;  %v365_v2 = vld [vmem:[%s7009_s2 + $0x1b0] sm:$0xff]  ;;  %v368_v5 = vld [vmem:[%s7009_s2 + $0x1c8] sm:$0xff]  ;;  %v6115_v41 = vpack.c.bf16 %v363_v50, %v359_v60  ;;  %v6130_v50 = vpack.c.bf16 %v374_v32, %v370_v29 }
  0x41   : > { %7142 = vst [vmem:[#allocation28_spill] sm:$0xff] %v6079_v61  ;;  %v369_v60 = vld [vmem:[%s7009_s2 + $0x1d0] sm:$0xff]  ;;  %v376_v29 = vld [vmem:[%s7011_s4 + $0x8] sm:$0xff] }
  0x42   : > { %4233 = vmatpush1.bf16.msra.mxu0 %v6031_v48  ;;  %7144 = vst [vmem:[#allocation30_spill] sm:$0xff] %v6115_v41  ;;  %v371_v48 = vld [vmem:[%s7009_s2 + $0x1e0] sm:$0xff]  ;;  %7147 = vst [vmem:[#allocation33_spill] sm:$0xff] %v6130_v50 }
  0x43   : > { %4265 = vmatpush1.bf16.msra.mxu1 %v6035_v49  ;;  %4235 = vmatprep.subr.bf16.mxu0 %v6037_v33  ;;  %v6121_v33 = vpack.c.bf16 %v372_v24, %v368_v5  ;;  %v367_v49 = vld [vmem:[%s7009_s2 + $0x1c0] sm:$0xff] }
  0x44   : > { %4267 = vmatprep.subr.bf16.mxu1 %v6049_v4  ;;  %v6119_v4 = vpack.c.bf16 %v365_v2, %v361_v7  ;;  %v373_v7 = vld [vmem:[%s7009_s2 + $0x1f0] sm:$0xff]  ;;  %v6140_v2 = vpack.c.bf16 %v371_v48, %v367_v49  ;;  %v6153_v24 = vld [vmem:[%s242_s17] sm:$0xff]  ;;  %v7150_v48 = vmov 0.0  }
  0x45   : > { %7146 = vst [vmem:[#allocation32_spill] sm:$0xff] %v6121_v33  ;;  %v6144_v5 = vpack.c.bf16 %v373_v7, %v369_v60  ;;  %v375_v49 = vld [vmem:[%s7011_s4] sm:$0xff]  ;;  %v7059_v60 = vmov 0.0|0.0   ;;  %v377_v7 = vld [vmem:[%s7011_s4 + $0x10] sm:$0xff] }
  0x46   : > { %4237 = vmatpush1.bf16.msra.mxu0 %v6073_v42  ;;  %7145 = vst [vmem:[#allocation31_spill] sm:$0xff] %v6119_v4  ;;  %7148 = vst [vmem:[#allocation34_spill] sm:$0xff] %v6140_v2  ;;  %v6182_v32 = vpack.c.bf16 %v376_v29, %v375_v49  ;;  %v379_v49 = vld [vmem:[%s7011_s4 + $0x20] sm:$0xff]  ;;  %v380_v29 = vld [vmem:[%s7011_s4 + $0x28] sm:$0xff] }
  0x47   : > { %4269 = vmatpush1.bf16.msra.mxu1 %v6077_v23  ;;  %4239 = vmatprep.subr.bf16.mxu0 %v6079_v61  ;;  %7149 = vst [vmem:[#allocation35_spill] sm:$0xff] %v6144_v5 }
  0x48   : > { %4271 = vmatprep.subr.bf16.mxu1 %v6091_v36  ;;  %7151 = vst [vmem:[#allocation36_spill] sm:$0xff] %v6182_v32 }
  0x4a   : > { %4241 = vmatpush1.bf16.msra.mxu0 %v6115_v41 }
  0x4b   : > { %4273 = vmatpush1.bf16.msra.mxu1 %v6119_v4  ;;  %4243 = vmatprep.subr.bf16.mxu0 %v6121_v33 }
  0x4c   : > { %4275 = vmatprep.subr.bf16.mxu1 %v6130_v50 }
  0x4e   : > { %4245 = vmatpush1.bf16.msra.mxu0 %v6140_v2 }
  0x4f   : > { %4277 = vmatpush1.bf16.msra.mxu1 %v6144_v5  ;;  %4278 = vmatprep.subr.bf16.mxu0 %v7059_v60 }
  0x50   : > { %4303 = vmatprep.subr.bf16.mxu1 %v5555_v3 }
  0x51   : > { %633 = vmatmul.mubr.f32.vlgmr.msra.gmra.mrb[0].mxu0 %v6153_v24 }
  0x52   : > { %704 = vmatmul.mubr.f32.vlgmr.msra.gmra.mrb[0].mxu1 %v6153_v24  ;;  %4280 = vmatpush3.bf16.msra.mxu0 %v6182_v32 }
  0x53   : > { %4305 = vmatpush1.bf16.msra.mxu1 %v5570_v9  ;;  %889 = vmatprep.mubr.f32.mxu1 %v7150_v48 }
  0x54   : > { %4307 = vmatprep.subr.bf16.mxu1 %v5595_v17  ;;  %4281 = vmatprep.subr.bf16.mxu0 %v7059_v60 }
  0x55   : > { %3902 = vmatprep.mubr.msk.f32.mxu0 %vm5502_vm1, %v7150_v48 }
  0x57   : > { %4309 = vmatpush1.bf16.msra.mxu1 %v5609_v22 }
  0x58   : > { %4311 = vmatprep.subr.bf16.mxu1 %v5624_v27 }
  0x5b   : > { %4313 = vmatpush1.bf16.msra.mxu1 %v5647_v35 }
  0x5c   : > { %4315 = vmatprep.subr.bf16.mxu1 %v5662_v40 }
  0x5f   : > { %4317 = vmatpush1.bf16.msra.mxu1 %v5695_v51 }
  0x60   : > { %4319 = vmatprep.subr.bf16.mxu1 %v5701_v53 }
  0x63   : > { %4321 = vmatpush1.bf16.msra.mxu1 %v5731_v63  ;;  %v391_v63 = vld [vmem:[%s7010_s3] sm:$0xf] }
  0x64   : > { %4323 = vmatprep.subr.bf16.mxu1 %v5737_v1 }
  0x67   : > { %4325 = vmatpush1.bf16.msra.mxu1 %v5767_v16 }
  0x68   : > { %4327 = vmatprep.subr.bf16.mxu1 %v5773_v20 }
  0x6b   : > { %4329 = vmatpush1.bf16.msra.mxu1 %v5803_v34 }
  0x6c   : > { %4331 = vmatprep.subr.bf16.mxu1 %v5809_v38  ;;  %v6203_v38 = vpack.c.bf16 %v380_v29, %v379_v49  ;;  %v383_v49 = vld [vmem:[%s7011_s4 + $0x40] sm:$0xff]  ;;  %v384_v29 = vld [vmem:[%s7011_s4 + $0x48] sm:$0xff] }
  0x6d   : > { %v6223_v20 = vpack.c.bf16 %v384_v29, %v383_v49  ;;  %v387_v49 = vld [vmem:[%s7011_s4 + $0x60] sm:$0xff]  ;;  %v388_v29 = vld [vmem:[%s7011_s4 + $0x68] sm:$0xff] }
  0x6e   : > { %7153 = vst [vmem:[#allocation38_spill] sm:$0xff] %v6203_v38  ;;  %v6243_v1 = vpack.c.bf16 %v388_v29, %v387_v49  ;;  %v7159_v49 = vlaneseq }
  0x6f   : > { %4333 = vmatpush1.bf16.msra.mxu1 %v5839_v54  ;;  %7155 = vst [vmem:[#allocation40_spill] sm:$0xff] %v6223_v20 }
  0x70   : > { %4367 = vmatprep.subr.bf16.mxu1 %v5848_v58  ;;  %v378_v58 = vld [vmem:[%s7011_s4 + $0x18] sm:$0xff]  ;;  %7157 = vst [vmem:[#allocation42_spill] sm:$0xff] %v6243_v1  ;;  %v394_v29 = vshrl.u32 %v7159_v49, 7 }
  0x71   : > { %v6193_v54 = vpack.c.bf16 %v378_v58, %v377_v7  ;;  %v381_v58 = vld [vmem:[%s7011_s4 + $0x30] sm:$0xff]  ;;  %v382_v7 = vld [vmem:[%s7011_s4 + $0x38] sm:$0xff] }
  0x72   : > { %v6213_v34 = vpack.c.bf16 %v382_v7, %v381_v58  ;;  %v385_v58 = vld [vmem:[%s7011_s4 + $0x50] sm:$0xff]  ;;  %v386_v7 = vld [vmem:[%s7011_s4 + $0x58] sm:$0xff]  ;;  %v407_v27 = vsub.s32 3, %v394_v29 }
  0x73   : > { %7152 = vst [vmem:[#allocation37_spill] sm:$0xff] %v6193_v54  ;;  %4283 = vmatpush3.bf16.msra.mxu0 %v6193_v54  ;;  %v6233_v16 = vpack.c.bf16 %v386_v7, %v385_v58  ;;  %v389_v58 = vld [vmem:[%s7011_s4 + $0x70] sm:$0xff]  ;;  %v390_v7 = vld [vmem:[%s7011_s4 + $0x78] sm:$0xff] }
  0x74   : > { %4284 = vmatprep.subr.bf16.mxu0 %v7059_v60  ;;  %7154 = vst [vmem:[#allocation39_spill] sm:$0xff] %v6213_v34  ;;  %v6269_v54 = vrot.slane %v391_v63, %v407_v27 }
  0x75   : > { %7156 = vst [vmem:[#allocation41_spill] sm:$0xff] %v6233_v16 }
  0x77   : > { %4286 = vmatpush3.bf16.msra.mxu0 %v6203_v38 }
  0x78   : > { %4287 = vmatprep.subr.bf16.mxu0 %v7059_v60 }
  0x7b   : > { %4289 = vmatpush3.bf16.msra.mxu0 %v6213_v34 }
  0x7c   : > { %4290 = vmatprep.subr.bf16.mxu0 %v7059_v60 }
  0x7f   : > { %4292 = vmatpush3.bf16.msra.mxu0 %v6223_v20  ;;  %v399_v20 = vsub.s32 1, %v394_v29 }
  0x80   : > { %4293 = vmatprep.subr.bf16.mxu0 %v7059_v60 }
  0x83   : > { %4295 = vmatpush3.bf16.msra.mxu0 %v6233_v16  ;;  %v6253_v16 = vpack.c.bf16 %v390_v7, %v389_v58  ;;  %v6265_v7 = vrot.slane %v391_v63, %v399_v20 }
  0x84   : > { %4296 = vmatprep.subr.bf16.mxu0 %v7059_v60 }
  0x85   : > { %7158 = vst [vmem:[#allocation43_spill] sm:$0xff] %v6253_v16 }
  0x87   : > { %4298 = vmatpush3.bf16.msra.mxu0 %v6243_v1  ;;  %v395_v1 = vsub.s32 0, %v394_v29 }
  0x88   : > { %4299 = vmatprep.subr.bf16.mxu0 %v7059_v60 }
  0x89   : > { %v6263_v53 = vrot.slane %v391_v63, %v395_v1  ;;  %v403_v1 = vsub.s32 2, %v394_v29 }
  0x8b   : > { %4301 = vmatpush3.bf16.msra.mxu0 %v6253_v16  ;;  %7160 = vst [vmem:[#allocation44_spill] sm:$0xff] %v6263_v53  ;;  %v6271_v20 = vrot.slane %v391_v63, %v403_v1 }
  0x8c   : > { %4335 = vmatprep.subr.bf16.mxu0 %v5568_v8 }
 0x124   : > { %v634_v58 = vpop.f32.mrb[0].mxu0 }
 0x125   : > { %v710_v60 = vadd.f32 %v634_v58, %v6263_v53  ;;  %v705_v51 = vpop.f32.mrb[0].mxu1  ;;  %v636_v34 = vpop.f32.mrb[1].mxu0 }
 0x126   : > { %v707_v16 = vpop.f32.mrb[1].mxu1  ;;  %v711_v8 = vadd.f32 %v636_v34, %v6265_v7 }
 0x127   : > { %v3695_v40 = vmul.f32 -1.442695, %v710_v60  ;;  %v713_v53 = vadd.f32 %v707_v16, %v6269_v54  ;;  %v712_v60 = vadd.f32 %v705_v51, %v6271_v20 }
 0x128   : > { %v3696_v49 = vmul.f32 -1.442695, %v711_v8 }
 0x129   : > { %5410 = vpow2.f32 %v3695_v40 }
 0x12a   : > { %5412 = vpow2.f32 %v3696_v49 }
 0x133   : > { %v5411_v35 = vpop.eup %5410 }
 0x134   : > { %v720_v38 = vadd.f32 1.0, %v5411_v35  ;;  %v5413_v22 = vpop.eup %5412 }
 0x135   : > { %v721_v58 = vadd.f32 1.0, %v5413_v22 }
 0x136   : > { %5414 = vrcp.f32 %v720_v38 }
 0x137   : > { %5416 = vrcp.f32 %v721_v58 }
 0x140   : > { %v5415_v17 = vpop.eup %5414 }
 0x141   : > { %v726_v40 = vmul.f32 %v5415_v17, %v713_v53  ;;  %v5417_v34 = vpop.eup %5416  ;;  %v6299_v17 = vld [vmem:[%s7012_s5] ss:$0 sm:$0xff] }
 0x142   : > { %v729_v35 = vsub.f32 1.0, %v5417_v34  ;;  %v731_v29 = vmul.f32 %v5417_v34, %v6153_v24 }
 0x143   : > { %v727_v8 = vadd.f32 %v726_v40, %v712_v60 }
 0x145   : > { %5418 = vtanh.f32 %v727_v8 }
 0x14f   : > { %v5419_v38 = vpop.eup %5418 }
 0x150   : > { %v730_v49 = vmul.f32 %v5419_v38, %v729_v35 }
 0x152   : > { %v6276_v27 = vadd.f32 %v731_v29, %v730_v49 }
 0x154   : > { %v733_v63 = vmax.f32 %v6276_v27, 0.0 }
 0x156   : > { %3903 = vmatmul.mubr.f32.vlgmr.msra.gmra.mrb[2].mxu0 %v733_v63 }
 0x157   : > { %4337 = vmatpush1.bf16.msra.mxu0 %v5582_v13  ;;  %960 = vmatprep.mubr.f32.mxu0 %v7150_v48 }
 0x158   : > { %4339 = vmatprep.subr.bf16.mxu0 %v5597_v18 }
 0x15b   : > { %4341 = vmatpush1.bf16.msra.mxu0 %v5622_v26 }
 0x15c   : > { %4343 = vmatprep.subr.bf16.mxu0 %v5635_v31 }
 0x15f   : > { %4345 = vmatpush1.bf16.msra.mxu0 %v5660_v39 }
 0x160   : > { %4347 = vmatprep.subr.bf16.mxu0 %v5674_v44 }
 0x163   : > { %4349 = vmatpush1.bf16.msra.mxu0 %v5699_v52 }
 0x164   : > { %4351 = vmatprep.subr.bf16.mxu0 %v5713_v57 }
 0x167   : > { %4353 = vmatpush1.bf16.msra.mxu0 %v5735_v0 }
 0x168   : > { %4355 = vmatprep.subr.bf16.mxu0 %v5749_v6 }
 0x16b   : > { %4357 = vmatpush1.bf16.msra.mxu0 %v5771_v19 }
 0x16c   : > { %4359 = vmatprep.subr.bf16.mxu0 %v5785_v25 }
 0x16f   : > { %4361 = vmatpush1.bf16.msra.mxu0 %v5807_v37 }
 0x170   : > { %4363 = vmatprep.subr.bf16.mxu0 %v5821_v45 }
 0x173   : > { %4365 = vmatpush1.bf16.msra.mxu0 %v5846_v56 }
 0x174   : > { %4399 = vmatprep.subr.bf16.mxu0 %v5860_v62 }
 0x229   : > { %v800_v22 = vpop.f32.mrb[2].mxu0 }
 0x22a   : > { %v801_v51 = vadd.f32 %v6299_v17, %v800_v22  ;;  %v3904_v53 = vpop.f32.mrb[3].mxu0  ;;  %v7162_v22 = vmov 1.0  }
 0x22b   : > { %v7164_v53 = vld [vmem:[#allocation21_spill] sm:$0xff] }
 0x22c   : > { %804 = vmax.xlane.f32.xlu0 %v801_v51 }
 0x2b9   : > { %v805_v16 = vpop.xlane.xlu0 %804 }
 0x2ba   : > { %vm806_vm2 = vcmp.ge.f32.partialorder %v801_v51, %v805_v16  ;;  %v7163_v51 = vld [vmem:[#allocation20_spill] sm:$0xff]  ;;  %v7165_v16 = vld [vmem:[#allocation22_spill] sm:$0xff] }
 0x2bb   : > { %v807_v24 = vsel %vm806_vm2, %v5842_v55, 128 }
 0x2bc   : > { %v809_v1 = vshra.s32 %v807_v24, 16  ;;  %v808_v60 = vand.u32 65535, %v807_v24  ;;  %v7166_v24 = vld [vmem:[#allocation23_spill] sm:$0xff] }
 0x2be   : > { %v811_v58 = vcvt.s32.f32 %v809_v1  ;;  %v810_v8 = vcvt.s32.f32 %v808_v60  ;;  %v7167_v1 = vld [vmem:[#allocation24_spill] sm:$0xff]  ;;  %v7169_v60 = vld [vmem:[#allocation26_spill] sm:$0xff] }
 0x2c0   : > { %812 = vmin.xlane.f32.xlu0 %v811_v58 }
 0x34d   : > { %v813_v40 = vpop.xlane.xlu0 %812 }
 0x34e   : > { %vm814_vm3 = vcmp.eq.f32.partialorder %v811_v58, %v813_v40  ;;  %v819_v35 = vcvt.f32.s32 %v813_v40  ;;  %v7168_v58 = vld [vmem:[#allocation25_spill] sm:$0xff]  ;;  %v7170_v40 = vld [vmem:[#allocation27_spill] sm:$0xff] }
 0x34f   : > { %v815_v34 = vsel %vm814_vm3, %v810_v8, inf  ;;  %v7171_v8 = vmov 0.0|0.0  }
 0x350   : > { %816 = vmin.xlane.f32.xlu1 %v815_v34  ;;  %v820_v29 = vshll.u32 %v819_v35, 16  ;;  %v7172_v34 = vld [vmem:[#allocation5_spill] sm:$0xff] }
 0x351   : > { %v7173_v35 = vld [vmem:[#allocation37_spill] sm:$0xff] }
 0x3dd   : > { %v817_v38 = vpop.xlane.xlu1 %816 }
 0x3de   : > { %v818_v49 = vcvt.f32.s32 %v817_v38  ;;  %v7174_v38 = vld [vmem:[#allocation6_spill] sm:$0xff] }
 0x3e0   : > { %v6303_v63 = vadd.s32 %v820_v29, %v818_v49  ;;  %v7175_v29 = vld [vmem:[#allocation7_spill] sm:$0xff]  ;;  %v7176_v49 = vld [vmem:[#allocation38_spill] sm:$0xff] }
 0x3e2   : > { %7161 = vst [vmem:[#allocation45_spill] sm:$0xff] %v6303_v63  ;;  %vm822_vm4 = vcmp.eq.s32.totalorder %v5842_v55, %v6303_v63  ;;  %v7177_v63 = vld [vmem:[#allocation8_spill] sm:$0xff] }
 0x3e3   : > { %3698 = vmatmul.mubr.msk.f32.vlgmr.msra.gmra.mrb[2].mxu1 %vm822_vm4, %v7162_v22  ;;  %3699 = vmatmul.mubr.msk.f32.vlgmr.msra.gmra.mrb[4].mxu0 %vm822_vm4, %v7162_v22  ;;  %vm3621_vm4 = vcmask 31744  }
 0x3e4   : > { %4369 = vmatpush1.bf16.msra.mxu1 %v5879_v12  ;;  %4401 = vmatpush1.bf16.msra.mxu0 %v5883_v14 }
 0x3e5   : > { %4371 = vmatprep.subr.bf16.mxu1 %v5885_v15  ;;  %4403 = vmatprep.subr.bf16.mxu0 %v5897_v28 }
 0x3e6   : > { %1031 = vmatprep.mubr.f32.mxu1 %v7150_v48  ;;  %1102 = vmatprep.mubr.f32.mxu0 %v7150_v48 }
 0x3e8   : > { %4373 = vmatpush1.bf16.msra.mxu1 %v5921_v43  ;;  %4405 = vmatpush1.bf16.msra.mxu0 %v5925_v46 }
 0x3e9   : > { %4375 = vmatprep.subr.bf16.mxu1 %v5927_v47  ;;  %4407 = vmatprep.subr.bf16.mxu0 %v5939_v59 }
 0x3ec   : > { %4377 = vmatpush1.bf16.msra.mxu1 %v5959_v10  ;;  %4409 = vmatpush1.bf16.msra.mxu0 %v5963_v11 }
 0x3ed   : > { %4379 = vmatprep.subr.bf16.mxu1 %v5965_v21  ;;  %4411 = vmatprep.subr.bf16.mxu0 %v5977_v30 }
 0x3f0   : > { %4381 = vmatpush1.bf16.msra.mxu1 %v7163_v51  ;;  %4413 = vmatpush1.bf16.msra.mxu0 %v7164_v53 }
 0x3f1   : > { %4383 = vmatprep.subr.bf16.mxu1 %v7165_v16  ;;  %4415 = vmatprep.subr.bf16.mxu0 %v7166_v24 }
 0x3f4   : > { %4385 = vmatpush1.bf16.msra.mxu1 %v7167_v1  ;;  %4417 = vmatpush1.bf16.msra.mxu0 %v7168_v58 }
 0x3f5   : > { %4387 = vmatprep.subr.bf16.mxu1 %v7169_v60  ;;  %4419 = vmatprep.subr.bf16.mxu0 %v7170_v40 }
 0x3f8   : > { %4389 = vmatpush1.bf16.msra.mxu1 %v6073_v42  ;;  %4421 = vmatpush1.bf16.msra.mxu0 %v6077_v23 }
 0x3f9   : > { %4391 = vmatprep.subr.bf16.mxu1 %v6079_v61  ;;  %4423 = vmatprep.subr.bf16.mxu0 %v6091_v36 }
 0x3fc   : > { %4393 = vmatpush1.bf16.msra.mxu1 %v6115_v41  ;;  %4425 = vmatpush1.bf16.msra.mxu0 %v6119_v4 }
 0x3fd   : > { %4395 = vmatprep.subr.bf16.mxu1 %v6121_v33  ;;  %4427 = vmatprep.subr.bf16.mxu0 %v6130_v50 }
 0x400   : > { %4397 = vmatpush1.bf16.msra.mxu1 %v6140_v2  ;;  %4429 = vmatpush1.bf16.msra.mxu0 %v6144_v5  ;;  %v7195_v2 = vld [vmem:[#allocation44_spill] sm:$0xff] }
 0x401   : > { %4430 = vmatprep.subr.bf16.mxu1 %v7171_v8  ;;  %4455 = vmatprep.subr.bf16.mxu0 %v5555_v3  ;;  %v7182_v3 = vld [vmem:[#allocation40_spill] sm:$0xff] }
 0x403   : > { %1032 = vmatmul.mubr.f32.vlgmr.msra.gmra.mrb[2].mxu1 %v6276_v27  ;;  %1103 = vmatmul.mubr.f32.vlgmr.msra.gmra.mrb[4].mxu0 %v6276_v27 }
 0x404   : > { %4432 = vmatpush3.bf16.msra.mxu1 %v6182_v32  ;;  %3937 = vmatprep.mubr.msk.f32.mxu1 %vm5502_vm1, %v7150_v48  ;;  %v7178_v32 = vld [vmem:[#allocation9_spill] sm:$0xff] }
 0x405   : > { %4433 = vmatprep.subr.bf16.mxu1 %v7171_v8  ;;  %4457 = vmatpush1.bf16.msra.mxu0 %v5570_v9  ;;  %v7179_v9 = vld [vmem:[#allocation39_spill] sm:$0xff] }
 0x406   : > { %4459 = vmatprep.subr.bf16.mxu0 %v7172_v34  ;;  %1288 = vmatprep.mubr.f32.mxu0 %v7150_v48  ;;  %v7180_v34 = vld [vmem:[#allocation10_spill] sm:$0xff] }
 0x408   : > { %4435 = vmatpush3.bf16.msra.mxu1 %v7173_v35  ;;  %v7181_v35 = vld [vmem:[#allocation11_spill] sm:$0xff] }
 0x409   : > { %4436 = vmatprep.subr.bf16.mxu1 %v7171_v8  ;;  %4461 = vmatpush1.bf16.msra.mxu0 %v7174_v38  ;;  %v7185_v38 = vld [vmem:[#allocation41_spill] sm:$0xff] }
 0x40a   : > { %4463 = vmatprep.subr.bf16.mxu0 %v7175_v29  ;;  %v7183_v29 = vld [vmem:[#allocation12_spill] sm:$0xff] }
 0x40c   : > { %4438 = vmatpush3.bf16.msra.mxu1 %v7176_v49  ;;  %v7184_v49 = vld [vmem:[#allocation13_spill] sm:$0xff] }
 0x40d   : > { %4439 = vmatprep.subr.bf16.mxu1 %v7171_v8  ;;  %4465 = vmatpush1.bf16.msra.mxu0 %v7177_v63  ;;  %v7188_v63 = vld [vmem:[#allocation42_spill] sm:$0xff] }
 0x40e   : > { %4467 = vmatprep.subr.bf16.mxu0 %v7178_v32  ;;  %v7186_v32 = vld [vmem:[#allocation14_spill] sm:$0xff] }
 0x410   : > { %4441 = vmatpush3.bf16.msra.mxu1 %v7179_v9  ;;  %v7187_v9 = vld [vmem:[#allocation15_spill] sm:$0xff] }
 0x411   : > { %4442 = vmatprep.subr.bf16.mxu1 %v7171_v8  ;;  %4469 = vmatpush1.bf16.msra.mxu0 %v7180_v34  ;;  %v7191_v34 = vld [vmem:[#allocation43_spill] sm:$0xff] }
 0x412   : > { %4471 = vmatprep.subr.bf16.mxu0 %v7181_v35  ;;  %v7189_v35 = vld [vmem:[#allocation16_spill] sm:$0xff] }
 0x414   : > { %4444 = vmatpush3.bf16.msra.mxu1 %v7182_v3  ;;  %v7190_v3 = vld [vmem:[#allocation17_spill] sm:$0xff] }
 0x415   : > { %4445 = vmatprep.subr.bf16.mxu1 %v7171_v8  ;;  %4473 = vmatpush1.bf16.msra.mxu0 %v7183_v29  ;;  %v7192_v29 = vld [vmem:[#allocation3_spill] sm:$0xff] }
 0x416   : > { %4475 = vmatprep.subr.bf16.mxu0 %v7184_v49  ;;  %v7193_v49 = vld [vmem:[#allocation18_spill] sm:$0xff] }
 0x418   : > { %4447 = vmatpush3.bf16.msra.mxu1 %v7185_v38  ;;  %v7194_v38 = vld [vmem:[#allocation19_spill] sm:$0xff] }
 0x419   : > { %4448 = vmatprep.subr.bf16.mxu1 %v7171_v8  ;;  %4477 = vmatpush1.bf16.msra.mxu0 %v7186_v32 }
 0x41a   : > { %4479 = vmatprep.subr.bf16.mxu0 %v7187_v9 }
 0x41c   : > { %4450 = vmatpush3.bf16.msra.mxu1 %v7188_v63 }
 0x41d   : > { %4451 = vmatprep.subr.bf16.mxu1 %v7171_v8  ;;  %4481 = vmatpush1.bf16.msra.mxu0 %v7189_v35 }
 0x41e   : > { %4483 = vmatprep.subr.bf16.mxu0 %v7190_v3 }
 0x420   : > { %4453 = vmatpush3.bf16.msra.mxu1 %v7191_v34 }
 0x421   : > { %4487 = vmatprep.subr.bf16.mxu1 %v7192_v29  ;;  %4485 = vmatpush1.bf16.msra.mxu0 %v7193_v49 }
 0x422   : > { %4519 = vmatprep.subr.bf16.mxu0 %v7194_v38 }
 0x4d6   : > { %v1033_v5 = vpop.f32.mrb[2].mxu1  ;;  %v1104_v32 = vpop.f32.mrb[4].mxu0 }
 0x4d7   : > { %v1109_v9 = vadd.f32 %v1033_v5, %v7195_v2  ;;  %v1035_v50 = vpop.f32.mrb[3].mxu1  ;;  %v1106_v63 = vpop.f32.mrb[5].mxu0  ;;  %v1111_v41 = vadd.f32 %v1104_v32, %v6271_v20 }
 0x4d8   : > { %v1110_v8 = vadd.f32 %v1035_v50, %v6265_v7  ;;  %v1112_v49 = vadd.f32 %v1106_v63, %v6269_v54 }
 0x4d9   : > { %v3700_v33 = vmul.f32 -1.442695, %v1109_v9 }
 0x4da   : > { %v3701_v35 = vmul.f32 -1.442695, %v1110_v8 }
 0x4db   : > { %5420 = vpow2.f32 %v3700_v33 }
 0x4dc   : > { %5422 = vpow2.f32 %v3701_v35 }
 0x4e5   : > { %v5421_v3 = vpop.eup %5420 }
 0x4e6   : > { %v1119_v34 = vadd.f32 1.0, %v5421_v3  ;;  %v5423_v29 = vpop.eup %5422 }
 0x4e7   : > { %v1120_v4 = vadd.f32 1.0, %v5423_v29 }
 0x4e8   : > { %5424 = vrcp.f32 %v1119_v34 }
 0x4e9   : > { %5426 = vrcp.f32 %v1120_v4 }
 0x4f2   : > { %v5425_v38 = vpop.eup %5424 }
 0x4f3   : > { %v1125_v5 = vmul.f32 %v5425_v38, %v1112_v49  ;;  %v5427_v9 = vpop.eup %5426 }
 0x4f4   : > { %v1128_v36 = vsub.f32 1.0, %v5427_v9  ;;  %v1130_v33 = vmul.f32 %v5427_v9, %v6276_v27 }
 0x4f5   : > { %v1126_v2 = vadd.f32 %v1125_v5, %v1111_v41 }
 0x4f7   : > { %5428 = vtanh.f32 %v1126_v2 }
 0x501   : > { %v5429_v50 = vpop.eup %5428 }
 0x502   : > { %v1129_v8 = vmul.f32 %v5429_v50, %v1128_v36 }
 0x504   : > { %v6385_v35 = vadd.f32 %v1130_v33, %v1129_v8 }
 0x506   : > { %v1132_v3 = vmax.f32 %v6385_v35, 0.0 }
 0x508   : > { %3938 = vmatmul.mubr.f32.vlgmr.msra.gmra.mrb[4].mxu1 %v1132_v3  ;;  %v7196_v3 = vld [vmem:[#allocation29_spill] sm:$0xff] }
 0x509   : > { %4489 = vmatpush1.bf16.msra.mxu1 %v5582_v13  ;;  %1359 = vmatprep.mubr.f32.mxu1 %v7150_v48 }
 0x50a   : > { %4491 = vmatprep.subr.bf16.mxu1 %v5597_v18 }
 0x50d   : > { %4493 = vmatpush1.bf16.msra.mxu1 %v5622_v26 }
 0x50e   : > { %4495 = vmatprep.subr.bf16.mxu1 %v5635_v31 }
 0x511   : > { %4497 = vmatpush1.bf16.msra.mxu1 %v5660_v39 }
 0x512   : > { %4499 = vmatprep.subr.bf16.mxu1 %v5674_v44 }
 0x515   : > { %4501 = vmatpush1.bf16.msra.mxu1 %v5699_v52 }
 0x516   : > { %4503 = vmatprep.subr.bf16.mxu1 %v5713_v57 }
 0x519   : > { %4505 = vmatpush1.bf16.msra.mxu1 %v5735_v0 }
 0x51a   : > { %4507 = vmatprep.subr.bf16.mxu1 %v5749_v6 }
 0x51d   : > { %4509 = vmatpush1.bf16.msra.mxu1 %v5771_v19 }
 0x51e   : > { %4511 = vmatprep.subr.bf16.mxu1 %v5785_v25 }
 0x521   : > { %4513 = vmatpush1.bf16.msra.mxu1 %v5807_v37 }
 0x522   : > { %4515 = vmatprep.subr.bf16.mxu1 %v5821_v45 }
 0x525   : > { %4517 = vmatpush1.bf16.msra.mxu1 %v5846_v56 }
 0x526   : > { %4551 = vmatprep.subr.bf16.mxu1 %v5860_v62 }
 0x5db   : > { %v1199_v4 = vpop.f32.mrb[4].mxu1 }
 0x5dc   : > { %v1200_v36 = vadd.f32 %v6299_v17, %v1199_v4  ;;  %v3939_v41 = vpop.f32.mrb[5].mxu1  ;;  %v7197_v4 = vld [vmem:[#allocation30_spill] sm:$0xff] }
 0x5dd   : > { %v7199_v41 = vld [vmem:[#allocation32_spill] sm:$0xff] }
 0x5de   : > { %1203 = vmax.xlane.f32.xlu1 %v1200_v36 }
 0x66b   : > { %v1204_v2 = vpop.xlane.xlu1 %1203 }
 0x66c   : > { %vm1205_vm5 = vcmp.ge.f32.partialorder %v1200_v36, %v1204_v2  ;;  %v7198_v36 = vld [vmem:[#allocation31_spill] sm:$0xff]  ;;  %v7200_v2 = vld [vmem:[#allocation33_spill] sm:$0xff] }
 0x66d   : > { %v1206_v32 = vsel %vm1205_vm5, %v5842_v55, 128 }
 0x66e   : > { %v1208_v27 = vshra.s32 %v1206_v32, 16  ;;  %v1207_v34 = vand.u32 65535, %v1206_v32  ;;  %v7201_v32 = vld [vmem:[#allocation34_spill] sm:$0xff] }
 0x670   : > { %v1210_v63 = vcvt.s32.f32 %v1208_v27  ;;  %v1209_v29 = vcvt.s32.f32 %v1207_v34  ;;  %v7202_v27 = vld [vmem:[#allocation35_spill] sm:$0xff]  ;;  %v7204_v34 = vld [vmem:[#allocation2_spill] sm:$0xff] }
 0x672   : > { %1211 = vmin.xlane.f32.xlu0 %v1210_v63 }
 0x6ff   : > { %v1212_v38 = vpop.xlane.xlu0 %1211 }
 0x700   : > { %vm1213_vm6 = vcmp.eq.f32.partialorder %v1210_v63, %v1212_v38  ;;  %v1218_v5 = vcvt.f32.s32 %v1212_v38  ;;  %v7203_v63 = vmov 0.0|0.0   ;;  %v7205_v38 = vld [vmem:[#allocation36_spill] sm:$0xff] }
 0x701   : > { %v1214_v49 = vsel %vm1213_vm6, %v1209_v29, inf  ;;  %v7206_v29 = vld [vmem:[#allocation4_spill] sm:$0xff] }
 0x702   : > { %1215 = vmin.xlane.f32.xlu1 %v1214_v49  ;;  %v1219_v50 = vshll.u32 %v1218_v5, 16  ;;  %v7207_v49 = vld [vmem:[#allocation5_spill] sm:$0xff] }
 0x703   : > { %v7208_v5 = vld [vmem:[#allocation37_spill] sm:$0xff] }
 0x78f   : > { %v1216_v9 = vpop.xlane.xlu1 %1215 }
 0x790   : > { %v1217_v33 = vcvt.f32.s32 %v1216_v9  ;;  %v7209_v9 = vld [vmem:[#allocation6_spill] sm:$0xff] }
 0x792   : > { %v6407_v8 = vadd.s32 %v1219_v50, %v1217_v33  ;;  %v7210_v50 = vld [vmem:[#allocation7_spill] sm:$0xff]  ;;  %v7211_v33 = vld [vmem:[#allocation38_spill] sm:$0xff] }
 0x794   : > { %vm1221_vm7 = vcmp.eq.s32.totalorder %v5842_v55, %v6407_v8 }
 0x795   : > { %3703 = vmatmul.mubr.msk.f32.vlgmr.msra.gmra.mrb[6].mxu0 %vm1221_vm7, %v7162_v22  ;;  %3704 = vmatmul.mubr.msk.f32.vlgmr.msra.gmra.mrb[6].mxu1 %vm1221_vm7, %v7162_v22 }
 0x796   : > { %4521 = vmatpush1.bf16.msra.mxu0 %v5879_v12  ;;  %4553 = vmatpush1.bf16.msra.mxu1 %v5883_v14 }
 0x797   : > { %4523 = vmatprep.subr.bf16.mxu0 %v5885_v15  ;;  %4555 = vmatprep.subr.bf16.mxu1 %v5897_v28 }
 0x798   : > { %1430 = vmatprep.mubr.f32.mxu0 %v7150_v48  ;;  %1501 = vmatprep.mubr.f32.mxu1 %v7150_v48 }
 0x79a   : > { %4525 = vmatpush1.bf16.msra.mxu0 %v5921_v43  ;;  %4557 = vmatpush1.bf16.msra.mxu1 %v5925_v46 }
 0x79b   : > { %4527 = vmatprep.subr.bf16.mxu0 %v5927_v47  ;;  %4559 = vmatprep.subr.bf16.mxu1 %v5939_v59 }
 0x79e   : > { %4529 = vmatpush1.bf16.msra.mxu0 %v5959_v10  ;;  %4561 = vmatpush1.bf16.msra.mxu1 %v5963_v11 }
 0x79f   : > { %4531 = vmatprep.subr.bf16.mxu0 %v5965_v21  ;;  %4563 = vmatprep.subr.bf16.mxu1 %v5977_v30 }
 0x7a2   : > { %4533 = vmatpush1.bf16.msra.mxu0 %v7163_v51  ;;  %4565 = vmatpush1.bf16.msra.mxu1 %v7164_v53 }
 0x7a3   : > { %4535 = vmatprep.subr.bf16.mxu0 %v7165_v16  ;;  %4567 = vmatprep.subr.bf16.mxu1 %v7166_v24 }
 0x7a6   : > { %4537 = vmatpush1.bf16.msra.mxu0 %v7167_v1  ;;  %4569 = vmatpush1.bf16.msra.mxu1 %v7168_v58 }
 0x7a7   : > { %4539 = vmatprep.subr.bf16.mxu0 %v7169_v60  ;;  %4571 = vmatprep.subr.bf16.mxu1 %v7170_v40 }
 0x7aa   : > { %4541 = vmatpush1.bf16.msra.mxu0 %v6073_v42  ;;  %4573 = vmatpush1.bf16.msra.mxu1 %v6077_v23 }
 0x7ab   : > { %4543 = vmatprep.subr.bf16.mxu0 %v6079_v61  ;;  %4575 = vmatprep.subr.bf16.mxu1 %v7196_v3 }
 0x7ae   : > { %4545 = vmatpush1.bf16.msra.mxu0 %v7197_v4  ;;  %4577 = vmatpush1.bf16.msra.mxu1 %v7198_v36 }
 0x7af   : > { %4547 = vmatprep.subr.bf16.mxu0 %v7199_v41  ;;  %4579 = vmatprep.subr.bf16.mxu1 %v7200_v2  ;;  %v7230_v2 = vld [vmem:[#allocation44_spill] sm:$0xff] }
 0x7b2   : > { %4549 = vmatpush1.bf16.msra.mxu0 %v7201_v32  ;;  %4581 = vmatpush1.bf16.msra.mxu1 %v7202_v27  ;;  %v7217_v27 = vld [vmem:[#allocation40_spill] sm:$0xff] }
 0x7b3   : > { %4582 = vmatprep.subr.bf16.mxu0 %v7203_v63  ;;  %4607 = vmatprep.subr.bf16.mxu1 %v7204_v34  ;;  %v7213_v34 = vld [vmem:[#allocation9_spill] sm:$0xff] }
 0x7b5   : > { %1431 = vmatmul.mubr.f32.vlgmr.msra.gmra.mrb[6].mxu0 %v6385_v35  ;;  %1502 = vmatmul.mubr.f32.vlgmr.msra.gmra.mrb[6].mxu1 %v6385_v35 }
 0x7b6   : > { %4584 = vmatpush3.bf16.msra.mxu0 %v7205_v38  ;;  %3972 = vmatprep.mubr.msk.f32.mxu0 %vm5502_vm1, %v7150_v48  ;;  %v7212_v38 = vld [vmem:[#allocation8_spill] sm:$0xff] }
 0x7b7   : > { %4585 = vmatprep.subr.bf16.mxu0 %v7203_v63  ;;  %4609 = vmatpush1.bf16.msra.mxu1 %v7206_v29  ;;  %v7214_v29 = vld [vmem:[#allocation39_spill] sm:$0xff] }
 0x7b8   : > { %4611 = vmatprep.subr.bf16.mxu1 %v7207_v49  ;;  %1687 = vmatprep.mubr.f32.mxu1 %v7150_v48  ;;  %v7215_v49 = vld [vmem:[#allocation10_spill] sm:$0xff] }
 0x7ba   : > { %4587 = vmatpush3.bf16.msra.mxu0 %v7208_v5  ;;  %v7216_v5 = vld [vmem:[#allocation11_spill] sm:$0xff] }
 0x7bb   : > { %4588 = vmatprep.subr.bf16.mxu0 %v7203_v63  ;;  %4613 = vmatpush1.bf16.msra.mxu1 %v7209_v9  ;;  %v7220_v9 = vld [vmem:[#allocation41_spill] sm:$0xff] }
 0x7bc   : > { %4615 = vmatprep.subr.bf16.mxu1 %v7210_v50  ;;  %v7218_v50 = vld [vmem:[#allocation12_spill] sm:$0xff] }
 0x7be   : > { %4590 = vmatpush3.bf16.msra.mxu0 %v7211_v33  ;;  %v7219_v33 = vld [vmem:[#allocation13_spill] sm:$0xff] }
 0x7bf   : > { %4591 = vmatprep.subr.bf16.mxu0 %v7203_v63  ;;  %4617 = vmatpush1.bf16.msra.mxu1 %v7212_v38  ;;  %v7223_v38 = vld [vmem:[#allocation42_spill] sm:$0xff] }
 0x7c0   : > { %4619 = vmatprep.subr.bf16.mxu1 %v7213_v34  ;;  %v7221_v34 = vld [vmem:[#allocation14_spill] sm:$0xff] }
 0x7c2   : > { %4593 = vmatpush3.bf16.msra.mxu0 %v7214_v29  ;;  %v7222_v29 = vld [vmem:[#allocation15_spill] sm:$0xff] }
 0x7c3   : > { %4594 = vmatprep.subr.bf16.mxu0 %v7203_v63  ;;  %4621 = vmatpush1.bf16.msra.mxu1 %v7215_v49  ;;  %v7226_v49 = vld [vmem:[#allocation43_spill] sm:$0xff] }
 0x7c4   : > { %4623 = vmatprep.subr.bf16.mxu1 %v7216_v5  ;;  %v7224_v5 = vld [vmem:[#allocation16_spill] sm:$0xff] }
 0x7c6   : > { %4596 = vmatpush3.bf16.msra.mxu0 %v7217_v27  ;;  %v7225_v27 = vld [vmem:[#allocation17_spill] sm:$0xff] }
 0x7c7   : > { %4597 = vmatprep.subr.bf16.mxu0 %v7203_v63  ;;  %4625 = vmatpush1.bf16.msra.mxu1 %v7218_v50  ;;  %v7227_v50 = vld [vmem:[#allocation3_spill] sm:$0xff] }
 0x7c8   : > { %4627 = vmatprep.subr.bf16.mxu1 %v7219_v33  ;;  %v7228_v33 = vld [vmem:[#allocation18_spill] sm:$0xff] }
 0x7ca   : > { %4599 = vmatpush3.bf16.msra.mxu0 %v7220_v9  ;;  %v7229_v9 = vld [vmem:[#allocation19_spill] sm:$0xff] }
 0x7cb   : > { %4600 = vmatprep.subr.bf16.mxu0 %v7203_v63  ;;  %4629 = vmatpush1.bf16.msra.mxu1 %v7221_v34 }
 0x7cc   : > { %4631 = vmatprep.subr.bf16.mxu1 %v7222_v29 }
 0x7ce   : > { %4602 = vmatpush3.bf16.msra.mxu0 %v7223_v38 }
 0x7cf   : > { %4603 = vmatprep.subr.bf16.mxu0 %v7203_v63  ;;  %4633 = vmatpush1.bf16.msra.mxu1 %v7224_v5 }
 0x7d0   : > { %4635 = vmatprep.subr.bf16.mxu1 %v7225_v27 }
 0x7d2   : > { %4605 = vmatpush3.bf16.msra.mxu0 %v7226_v49 }
 0x7d3   : > { %4639 = vmatprep.subr.bf16.mxu0 %v7227_v50  ;;  %4637 = vmatpush1.bf16.msra.mxu1 %v7228_v33 }
 0x7d4   : > { %4671 = vmatprep.subr.bf16.mxu1 %v7229_v9 }
 0x888   : > { %v1432_v32 = vpop.f32.mrb[6].mxu0  ;;  %v1503_v34 = vpop.f32.mrb[6].mxu1 }
 0x889   : > { %v1508_v29 = vadd.f32 %v1432_v32, %v7230_v2  ;;  %v1434_v41 = vpop.f32.mrb[7].mxu0  ;;  %v1505_v38 = vpop.f32.mrb[7].mxu1  ;;  %v1510_v3 = vadd.f32 %v1503_v34, %v6271_v20 }
 0x88a   : > { %v1509_v63 = vadd.f32 %v1434_v41, %v6265_v7  ;;  %v1511_v33 = vadd.f32 %v1505_v38, %v6269_v54 }
 0x88b   : > { %v3705_v36 = vmul.f32 -1.442695, %v1508_v29 }
 0x88c   : > { %v3706_v5 = vmul.f32 -1.442695, %v1509_v63 }
 0x88d   : > { %5430 = vpow2.f32 %v3705_v36 }
 0x88e   : > { %5432 = vpow2.f32 %v3706_v5 }
 0x897   : > { %v5431_v27 = vpop.eup %5430 }
 0x898   : > { %v1518_v49 = vadd.f32 1.0, %v5431_v27  ;;  %v5433_v50 = vpop.eup %5432 }
 0x899   : > { %v1519_v4 = vadd.f32 1.0, %v5433_v50 }
 0x89a   : > { %5434 = vrcp.f32 %v1518_v49 }
 0x89b   : > { %5436 = vrcp.f32 %v1519_v4 }
 0x8a4   : > { %v5435_v9 = vpop.eup %5434 }
 0x8a5   : > { %v1524_v32 = vmul.f32 %v5435_v9, %v1511_v33  ;;  %v5437_v29 = vpop.eup %5436 }
 0x8a6   : > { %v1527_v61 = vsub.f32 1.0, %v5437_v29  ;;  %v1529_v36 = vmul.f32 %v5437_v29, %v6385_v35 }
 0x8a7   : > { %v1525_v2 = vadd.f32 %v1524_v32, %v1510_v3 }
 0x8a9   : > { %5438 = vtanh.f32 %v1525_v2 }
 0x8b3   : > { %v5439_v41 = vpop.eup %5438 }
 0x8b4   : > { %v1528_v63 = vmul.f32 %v5439_v41, %v1527_v61 }
 0x8b6   : > { %v6489_v5 = vadd.f32 %v1529_v36, %v1528_v63 }
 0x8b8   : > { %v1531_v27 = vmax.f32 %v6489_v5, 0.0 }
 0x8ba   : > { %3973 = vmatmul.mubr.f32.vlgmr.msra.gmra.mrb[8].mxu0 %v1531_v27  ;;  %v7231_v27 = vld [vmem:[#allocation45_spill] sm:$0xff] }
 0x8bb   : > { %4641 = vmatpush1.bf16.msra.mxu0 %v5582_v13  ;;  %1758 = vmatprep.mubr.f32.mxu0 %v7150_v48 }
 0x8bc   : > { %4643 = vmatprep.subr.bf16.mxu0 %v5597_v18 }
 0x8bf   : > { %4645 = vmatpush1.bf16.msra.mxu0 %v5622_v26 }
 0x8c0   : > { %4647 = vmatprep.subr.bf16.mxu0 %v5635_v31 }
 0x8c3   : > { %4649 = vmatpush1.bf16.msra.mxu0 %v5660_v39 }
 0x8c4   : > { %4651 = vmatprep.subr.bf16.mxu0 %v5674_v44 }
 0x8c7   : > { %4653 = vmatpush1.bf16.msra.mxu0 %v5699_v52 }
 0x8c8   : > { %4655 = vmatprep.subr.bf16.mxu0 %v5713_v57 }
 0x8cb   : > { %4657 = vmatpush1.bf16.msra.mxu0 %v5735_v0 }
 0x8cc   : > { %4659 = vmatprep.subr.bf16.mxu0 %v5749_v6 }
 0x8cf   : > { %4661 = vmatpush1.bf16.msra.mxu0 %v5771_v19 }
 0x8d0   : > { %4663 = vmatprep.subr.bf16.mxu0 %v5785_v25 }
 0x8d3   : > { %4665 = vmatpush1.bf16.msra.mxu0 %v5807_v37 }
 0x8d4   : > { %4667 = vmatprep.subr.bf16.mxu0 %v5821_v45 }
 0x8d7   : > { %4669 = vmatpush1.bf16.msra.mxu0 %v5846_v56 }
 0x8d8   : > { %4703 = vmatprep.subr.bf16.mxu0 %v5860_v62 }
 0x98d   : > { %v1598_v61 = vpop.f32.mrb[8].mxu0 }
 0x98e   : > { %v1599_v35 = vadd.f32 %v6299_v17, %v1598_v61  ;;  %v3974_v3 = vpop.f32.mrb[9].mxu0  ;;  %v3616_v61 = vsel %vm3615_vm10, %v7231_v27, %v6407_v8  ;;  %v7232_v8 = vld [vmem:[#allocation28_spill] sm:$0xff]  ;;  %v7247_v27 = vld [vmem:[#allocation7_spill] sm:$0xff] }
 0x98f   : > { %v7233_v3 = vld [vmem:[#allocation29_spill] sm:$0xff] }
 0x990   : > { %1602 = vmax.xlane.f32.xlu0 %v1599_v35 }
 0xa1d   : > { %v1603_v4 = vpop.xlane.xlu0 %1602 }
 0xa1e   : > { %vm1604_vm8 = vcmp.ge.f32.partialorder %v1599_v35, %v1603_v4  ;;  %v7234_v4 = vld [vmem:[#allocation30_spill] sm:$0xff] }
 0xa1f   : > { %v1605_v2 = vsel %vm1604_vm8, %v5842_v55, 128  ;;  %vm3623_vm8 = vcmask 39936  }
 0xa20   : > { %v1607_v34 = vshra.s32 %v1605_v2, 16  ;;  %v1606_v49 = vand.u32 65535, %v1605_v2  ;;  %v7235_v2 = vld [vmem:[#allocation31_spill] sm:$0xff] }
 0xa22   : > { %v1609_v38 = vcvt.s32.f32 %v1607_v34  ;;  %v1608_v50 = vcvt.s32.f32 %v1606_v49  ;;  %v7236_v34 = vld [vmem:[#allocation32_spill] sm:$0xff]  ;;  %v7238_v49 = vld [vmem:[#allocation34_spill] sm:$0xff] }
 0xa24   : > { %1610 = vmin.xlane.f32.xlu1 %v1609_v38 }
 0xab1   : > { %v1611_v9 = vpop.xlane.xlu1 %1610 }
 0xab2   : > { %vm1612_vm9 = vcmp.eq.f32.partialorder %v1609_v38, %v1611_v9  ;;  %v1617_v32 = vcvt.f32.s32 %v1611_v9  ;;  %v7237_v38 = vld [vmem:[#allocation33_spill] sm:$0xff]  ;;  %v7239_v9 = vld [vmem:[#allocation35_spill] sm:$0xff] }
 0xab3   : > { %v1613_v33 = vsel %vm1612_vm9, %v1608_v50, inf  ;;  %v7240_v50 = vmov 0.0|0.0  }
 0xab4   : > { %1614 = vmin.xlane.f32.xlu0 %v1613_v33  ;;  %v1618_v41 = vshll.u32 %v1617_v32, 16  ;;  %v7241_v33 = vld [vmem:[#allocation2_spill] sm:$0xff]  ;;  %v7242_v32 = vld [vmem:[#allocation36_spill] sm:$0xff] }
 0xb41   : > { %v1615_v29 = vpop.xlane.xlu0 %1614 }
 0xb42   : > { %v1616_v36 = vcvt.f32.s32 %v1615_v29  ;;  %v7243_v29 = vld [vmem:[#allocation4_spill] sm:$0xff] }
 0xb44   : > { %v1619_v63 = vadd.s32 %v1618_v41, %v1616_v36  ;;  %v7244_v41 = vld [vmem:[#allocation5_spill] sm:$0xff] }
 0xb45   : > { %v7245_v36 = vld [vmem:[#allocation37_spill] sm:$0xff] }
 0xb46   : > { %vm1620_vm12 = vcmp.eq.s32.totalorder %v5842_v55, %v1619_v63  ;;  %v6514_v35 = vsel %vm3617_vm11, %v3616_v61, %v1619_v63  ;;  %v7246_v63 = vld [vmem:[#allocation6_spill] sm:$0xff] }
 0xb47   : > { %3708 = vmatmul.mubr.msk.f32.vlgmr.msra.gmra.mrb[8].mxu1 %vm1620_vm12, %v7162_v22  ;;  %3709 = vmatmul.mubr.msk.f32.vlgmr.msra.gmra.mrb[10].mxu0 %vm1620_vm12, %v7162_v22  ;;  %v7248_v61 = vld [vmem:[#allocation38_spill] sm:$0xff]  ;;  %vm3625_vm12 = vcmask 48128  }
 0xb48   : > { %4673 = vmatpush1.bf16.msra.mxu1 %v5879_v12  ;;  %4705 = vmatpush1.bf16.msra.mxu0 %v5883_v14 }
 0xb49   : > { %4675 = vmatprep.subr.bf16.mxu1 %v5885_v15  ;;  %4707 = vmatprep.subr.bf16.mxu0 %v5897_v28 }
 0xb4a   : > { %1829 = vmatprep.mubr.f32.mxu1 %v7150_v48  ;;  %1900 = vmatprep.mubr.f32.mxu0 %v7150_v48 }
 0xb4c   : > { %4677 = vmatpush1.bf16.msra.mxu1 %v5921_v43  ;;  %4709 = vmatpush1.bf16.msra.mxu0 %v5925_v46 }
 0xb4d   : > { %4679 = vmatprep.subr.bf16.mxu1 %v5927_v47  ;;  %4711 = vmatprep.subr.bf16.mxu0 %v5939_v59 }
 0xb50   : > { %4681 = vmatpush1.bf16.msra.mxu1 %v5959_v10  ;;  %4713 = vmatpush1.bf16.msra.mxu0 %v5963_v11 }
 0xb51   : > { %4683 = vmatprep.subr.bf16.mxu1 %v5965_v21  ;;  %4715 = vmatprep.subr.bf16.mxu0 %v5977_v30 }
 0xb54   : > { %4685 = vmatpush1.bf16.msra.mxu1 %v7163_v51  ;;  %4717 = vmatpush1.bf16.msra.mxu0 %v7164_v53 }
 0xb55   : > { %4687 = vmatprep.subr.bf16.mxu1 %v7165_v16  ;;  %4719 = vmatprep.subr.bf16.mxu0 %v7166_v24 }
 0xb58   : > { %4689 = vmatpush1.bf16.msra.mxu1 %v7167_v1  ;;  %4721 = vmatpush1.bf16.msra.mxu0 %v7168_v58 }
 0xb59   : > { %4691 = vmatprep.subr.bf16.mxu1 %v7169_v60  ;;  %4723 = vmatprep.subr.bf16.mxu0 %v7170_v40 }
 0xb5c   : > { %4693 = vmatpush1.bf16.msra.mxu1 %v6073_v42  ;;  %4725 = vmatpush1.bf16.msra.mxu0 %v6077_v23 }
 0xb5d   : > { %4695 = vmatprep.subr.bf16.mxu1 %v7232_v8  ;;  %4727 = vmatprep.subr.bf16.mxu0 %v7233_v3 }
 0xb60   : > { %4697 = vmatpush1.bf16.msra.mxu1 %v7234_v4  ;;  %4729 = vmatpush1.bf16.msra.mxu0 %v7235_v2 }
 0xb61   : > { %4699 = vmatprep.subr.bf16.mxu1 %v7236_v34  ;;  %4731 = vmatprep.subr.bf16.mxu0 %v7237_v38  ;;  %v7267_v38 = vld [vmem:[#allocation44_spill] sm:$0xff] }
 0xb64   : > { %4701 = vmatpush1.bf16.msra.mxu1 %v7238_v49  ;;  %4733 = vmatpush1.bf16.msra.mxu0 %v7239_v9  ;;  %v7254_v9 = vld [vmem:[#allocation40_spill] sm:$0xff] }
 0xb65   : > { %4734 = vmatprep.subr.bf16.mxu1 %v7240_v50  ;;  %4759 = vmatprep.subr.bf16.mxu0 %v7241_v33  ;;  %v7250_v33 = vld [vmem:[#allocation9_spill] sm:$0xff] }
 0xb67   : > { %1830 = vmatmul.mubr.f32.vlgmr.msra.gmra.mrb[8].mxu1 %v6489_v5  ;;  %1901 = vmatmul.mubr.f32.vlgmr.msra.gmra.mrb[10].mxu0 %v6489_v5 }
 0xb68   : > { %4736 = vmatpush3.bf16.msra.mxu1 %v7242_v32  ;;  %4007 = vmatprep.mubr.msk.f32.mxu1 %vm5502_vm1, %v7150_v48  ;;  %v7249_v32 = vld [vmem:[#allocation8_spill] sm:$0xff] }
 0xb69   : > { %4737 = vmatprep.subr.bf16.mxu1 %v7240_v50  ;;  %4761 = vmatpush1.bf16.msra.mxu0 %v7243_v29  ;;  %v7251_v29 = vld [vmem:[#allocation39_spill] sm:$0xff] }
 0xb6a   : > { %4763 = vmatprep.subr.bf16.mxu0 %v7244_v41  ;;  %2086 = vmatprep.mubr.f32.mxu0 %v7150_v48  ;;  %v7252_v41 = vld [vmem:[#allocation10_spill] sm:$0xff] }
 0xb6c   : > { %4739 = vmatpush3.bf16.msra.mxu1 %v7245_v36  ;;  %v7253_v36 = vld [vmem:[#allocation11_spill] sm:$0xff] }
 0xb6d   : > { %4740 = vmatprep.subr.bf16.mxu1 %v7240_v50  ;;  %4765 = vmatpush1.bf16.msra.mxu0 %v7246_v63  ;;  %v7257_v63 = vld [vmem:[#allocation41_spill] sm:$0xff] }
 0xb6e   : > { %4767 = vmatprep.subr.bf16.mxu0 %v7247_v27  ;;  %v7255_v27 = vld [vmem:[#allocation12_spill] sm:$0xff] }
 0xb70   : > { %4742 = vmatpush3.bf16.msra.mxu1 %v7248_v61  ;;  %v7256_v61 = vld [vmem:[#allocation13_spill] sm:$0xff] }
 0xb71   : > { %4743 = vmatprep.subr.bf16.mxu1 %v7240_v50  ;;  %4769 = vmatpush1.bf16.msra.mxu0 %v7249_v32  ;;  %v7260_v32 = vld [vmem:[#allocation42_spill] sm:$0xff] }
 0xb72   : > { %4771 = vmatprep.subr.bf16.mxu0 %v7250_v33  ;;  %v7258_v33 = vld [vmem:[#allocation14_spill] sm:$0xff] }
 0xb74   : > { %4745 = vmatpush3.bf16.msra.mxu1 %v7251_v29  ;;  %v7259_v29 = vld [vmem:[#allocation15_spill] sm:$0xff] }
 0xb75   : > { %4746 = vmatprep.subr.bf16.mxu1 %v7240_v50  ;;  %4773 = vmatpush1.bf16.msra.mxu0 %v7252_v41  ;;  %v7263_v41 = vld [vmem:[#allocation43_spill] sm:$0xff] }
 0xb76   : > { %4775 = vmatprep.subr.bf16.mxu0 %v7253_v36  ;;  %v7261_v36 = vld [vmem:[#allocation16_spill] sm:$0xff] }
 0xb78   : > { %4748 = vmatpush3.bf16.msra.mxu1 %v7254_v9  ;;  %v7262_v9 = vld [vmem:[#allocation17_spill] sm:$0xff] }
 0xb79   : > { %4749 = vmatprep.subr.bf16.mxu1 %v7240_v50  ;;  %4777 = vmatpush1.bf16.msra.mxu0 %v7255_v27  ;;  %v7264_v27 = vld [vmem:[#allocation3_spill] sm:$0xff] }
 0xb7a   : > { %4779 = vmatprep.subr.bf16.mxu0 %v7256_v61  ;;  %v7265_v61 = vld [vmem:[#allocation18_spill] sm:$0xff] }
 0xb7c   : > { %4751 = vmatpush3.bf16.msra.mxu1 %v7257_v63  ;;  %v7266_v63 = vld [vmem:[#allocation19_spill] sm:$0xff] }
 0xb7d   : > { %4752 = vmatprep.subr.bf16.mxu1 %v7240_v50  ;;  %4781 = vmatpush1.bf16.msra.mxu0 %v7258_v33 }
 0xb7e   : > { %4783 = vmatprep.subr.bf16.mxu0 %v7259_v29 }
 0xb80   : > { %4754 = vmatpush3.bf16.msra.mxu1 %v7260_v32 }
 0xb81   : > { %4755 = vmatprep.subr.bf16.mxu1 %v7240_v50  ;;  %4785 = vmatpush1.bf16.msra.mxu0 %v7261_v36 }
 0xb82   : > { %4787 = vmatprep.subr.bf16.mxu0 %v7262_v9 }
 0xb84   : > { %4757 = vmatpush3.bf16.msra.mxu1 %v7263_v41 }
 0xb85   : > { %4791 = vmatprep.subr.bf16.mxu1 %v7264_v27  ;;  %4789 = vmatpush1.bf16.msra.mxu0 %v7265_v61 }
 0xb86   : > { %4823 = vmatprep.subr.bf16.mxu0 %v7266_v63 }
 0xc3a   : > { %v1831_v49 = vpop.f32.mrb[8].mxu1  ;;  %v1902_v33 = vpop.f32.mrb[10].mxu0 }
 0xc3b   : > { %v1907_v29 = vadd.f32 %v1831_v49, %v7267_v38  ;;  %v1833_v34 = vpop.f32.mrb[9].mxu1  ;;  %v1904_v32 = vpop.f32.mrb[11].mxu0  ;;  %v1909_v3 = vadd.f32 %v1902_v33, %v6271_v20 }
 0xc3c   : > { %v1908_v50 = vadd.f32 %v1833_v34, %v6265_v7  ;;  %v1910_v61 = vadd.f32 %v1904_v32, %v6269_v54 }
 0xc3d   : > { %v3710_v2 = vmul.f32 -1.442695, %v1907_v29 }
 0xc3e   : > { %v3711_v36 = vmul.f32 -1.442695, %v1908_v50 }
 0xc3f   : > { %5440 = vpow2.f32 %v3710_v2 }
 0xc40   : > { %5442 = vpow2.f32 %v3711_v36 }
 0xc49   : > { %v5441_v9 = vpop.eup %5440 }
 0xc4a   : > { %v1917_v41 = vadd.f32 1.0, %v5441_v9  ;;  %v5443_v27 = vpop.eup %5442 }
 0xc4b   : > { %v1918_v4 = vadd.f32 1.0, %v5443_v27 }
 0xc4c   : > { %5444 = vrcp.f32 %v1917_v41 }
 0xc4d   : > { %5446 = vrcp.f32 %v1918_v4 }
 0xc56   : > { %v5445_v63 = vpop.eup %5444 }
 0xc57   : > { %v1923_v49 = vmul.f32 %v5445_v63, %v1910_v61  ;;  %v5447_v29 = vpop.eup %5446 }
 0xc58   : > { %v1926_v8 = vsub.f32 1.0, %v5447_v29  ;;  %v1928_v2 = vmul.f32 %v5447_v29, %v6489_v5 }
 0xc59   : > { %v1924_v38 = vadd.f32 %v1923_v49, %v1909_v3 }
 0xc5b   : > { %5448 = vtanh.f32 %v1924_v38 }
 0xc65   : > { %v5449_v34 = vpop.eup %5448 }
 0xc66   : > { %v1927_v50 = vmul.f32 %v5449_v34, %v1926_v8 }
 0xc68   : > { %v6594_v36 = vadd.f32 %v1928_v2, %v1927_v50 }
 0xc6a   : > { %v1930_v9 = vmax.f32 %v6594_v36, 0.0 }
 0xc6c   : > { %4008 = vmatmul.mubr.f32.vlgmr.msra.gmra.mrb[10].mxu1 %v1930_v9  ;;  %v7269_v9 = vld [vmem:[#allocation29_spill] sm:$0xff] }
 0xc6d   : > { %4793 = vmatpush1.bf16.msra.mxu1 %v5582_v13  ;;  %2157 = vmatprep.mubr.f32.mxu1 %v7150_v48 }
 0xc6e   : > { %4795 = vmatprep.subr.bf16.mxu1 %v5597_v18 }
 0xc71   : > { %4797 = vmatpush1.bf16.msra.mxu1 %v5622_v26 }
 0xc72   : > { %4799 = vmatprep.subr.bf16.mxu1 %v5635_v31 }
 0xc75   : > { %4801 = vmatpush1.bf16.msra.mxu1 %v5660_v39 }
 0xc76   : > { %4803 = vmatprep.subr.bf16.mxu1 %v5674_v44 }
 0xc79   : > { %4805 = vmatpush1.bf16.msra.mxu1 %v5699_v52 }
 0xc7a   : > { %4807 = vmatprep.subr.bf16.mxu1 %v5713_v57 }
 0xc7d   : > { %4809 = vmatpush1.bf16.msra.mxu1 %v5735_v0 }
 0xc7e   : > { %4811 = vmatprep.subr.bf16.mxu1 %v5749_v6 }
 0xc81   : > { %4813 = vmatpush1.bf16.msra.mxu1 %v5771_v19 }
 0xc82   : > { %4815 = vmatprep.subr.bf16.mxu1 %v5785_v25 }
 0xc85   : > { %4817 = vmatpush1.bf16.msra.mxu1 %v5807_v37 }
 0xc86   : > { %4819 = vmatprep.subr.bf16.mxu1 %v5821_v45 }
 0xc89   : > { %4821 = vmatpush1.bf16.msra.mxu1 %v5846_v56 }
 0xc8a   : > { %4855 = vmatprep.subr.bf16.mxu1 %v5860_v62 }
 0xd3f   : > { %v1997_v5 = vpop.f32.mrb[10].mxu1 }
 0xd40   : > { %v1998_v8 = vadd.f32 %v6299_v17, %v1997_v5  ;;  %v4009_v3 = vpop.f32.mrb[11].mxu1  ;;  %v7270_v5 = vld [vmem:[#allocation30_spill] sm:$0xff] }
 0xd41   : > { %v7272_v3 = vld [vmem:[#allocation32_spill] sm:$0xff] }
 0xd42   : > { %2001 = vmax.xlane.f32.xlu1 %v1998_v8 }
 0xdcf   : > { %v2002_v4 = vpop.xlane.xlu1 %2001 }
 0xdd0   : > { %vm2003_vm13 = vcmp.ge.f32.partialorder %v1998_v8, %v2002_v4  ;;  %v7271_v8 = vld [vmem:[#allocation31_spill] sm:$0xff]  ;;  %v7273_v4 = vld [vmem:[#allocation33_spill] sm:$0xff] }
 0xdd1   : > { %v2004_v38 = vsel %vm2003_vm13, %v5842_v55, 128 }
 0xdd2   : > { %v2006_v33 = vshra.s32 %v2004_v38, 16  ;;  %v2005_v41 = vand.u32 65535, %v2004_v38  ;;  %v7274_v38 = vld [vmem:[#allocation34_spill] sm:$0xff] }
 0xdd4   : > { %v2008_v32 = vcvt.s32.f32 %v2006_v33  ;;  %v2007_v27 = vcvt.s32.f32 %v2005_v41  ;;  %v7275_v33 = vld [vmem:[#allocation35_spill] sm:$0xff]  ;;  %v7277_v41 = vld [vmem:[#allocation2_spill] sm:$0xff] }
 0xdd6   : > { %2009 = vmin.xlane.f32.xlu0 %v2008_v32 }
 0xe63   : > { %v2010_v63 = vpop.xlane.xlu0 %2009 }
 0xe64   : > { %vm2011_vm14 = vcmp.eq.f32.partialorder %v2008_v32, %v2010_v63  ;;  %v2016_v49 = vcvt.f32.s32 %v2010_v63  ;;  %v7276_v32 = vmov 0.0|0.0   ;;  %v7278_v63 = vld [vmem:[#allocation36_spill] sm:$0xff] }
 0xe65   : > { %v2012_v61 = vsel %vm2011_vm14, %v2007_v27, inf  ;;  %v7279_v27 = vld [vmem:[#allocation4_spill] sm:$0xff] }
 0xe66   : > { %2013 = vmin.xlane.f32.xlu1 %v2012_v61  ;;  %v2017_v34 = vshll.u32 %v2016_v49, 16  ;;  %v7280_v61 = vld [vmem:[#allocation5_spill] sm:$0xff] }
 0xe67   : > { %v7281_v49 = vld [vmem:[#allocation37_spill] sm:$0xff] }
 0xef3   : > { %v2014_v29 = vpop.xlane.xlu1 %2013 }
 0xef4   : > { %v2015_v2 = vcvt.f32.s32 %v2014_v29  ;;  %v7282_v29 = vld [vmem:[#allocation6_spill] sm:$0xff] }
 0xef6   : > { %v2018_v17 = vadd.s32 %v2017_v34, %v2015_v2  ;;  %v7283_v34 = vld [vmem:[#allocation7_spill] sm:$0xff]  ;;  %v7284_v2 = vld [vmem:[#allocation38_spill] sm:$0xff] }
 0xef8   : > { %vm2019_vm0 = vcmp.eq.s32.totalorder %v5842_v55, %v2018_v17  ;;  %v6618_v50 = vsel %vm3619_vm15, %v6514_v35, %v2018_v17  ;;  %v7268_v35 = vld [vmem:[#allocation28_spill] sm:$0xff]  ;;  %vm3627_vm15 = vcmask 56320  }
 0xef9   : > { %3713 = vmatmul.mubr.msk.f32.vlgmr.msra.gmra.mrb[12].mxu0 %vm2019_vm0, %v7162_v22  ;;  %3714 = vmatmul.mubr.msk.f32.vlgmr.msra.gmra.mrb[12].mxu1 %vm2019_vm0, %v7162_v22  ;;  %v7285_v17 = vld [vmem:[#allocation8_spill] sm:$0xff]  ;;  %vm3629_vm0 = vcmask 64512  }
 0xefa   : > { %4825 = vmatpush1.bf16.msra.mxu0 %v5879_v12  ;;  %4857 = vmatpush1.bf16.msra.mxu1 %v5883_v14 }
 0xefb   : > { %4827 = vmatprep.subr.bf16.mxu0 %v5885_v15  ;;  %4859 = vmatprep.subr.bf16.mxu1 %v5897_v28 }
 0xefc   : > { %2228 = vmatprep.mubr.f32.mxu0 %v7150_v48  ;;  %2299 = vmatprep.mubr.f32.mxu1 %v7150_v48 }
 0xefe   : > { %4829 = vmatpush1.bf16.msra.mxu0 %v5921_v43  ;;  %4861 = vmatpush1.bf16.msra.mxu1 %v5925_v46 }
 0xeff   : > { %4831 = vmatprep.subr.bf16.mxu0 %v5927_v47  ;;  %4863 = vmatprep.subr.bf16.mxu1 %v5939_v59 }
 0xf02   : > { %4833 = vmatpush1.bf16.msra.mxu0 %v5959_v10  ;;  %4865 = vmatpush1.bf16.msra.mxu1 %v5963_v11 }
 0xf03   : > { %4835 = vmatprep.subr.bf16.mxu0 %v5965_v21  ;;  %4867 = vmatprep.subr.bf16.mxu1 %v5977_v30 }
 0xf06   : > { %4837 = vmatpush1.bf16.msra.mxu0 %v7163_v51  ;;  %4869 = vmatpush1.bf16.msra.mxu1 %v7164_v53 }
 0xf07   : > { %4839 = vmatprep.subr.bf16.mxu0 %v7165_v16  ;;  %4871 = vmatprep.subr.bf16.mxu1 %v7166_v24 }
 0xf0a   : > { %4841 = vmatpush1.bf16.msra.mxu0 %v7167_v1  ;;  %4873 = vmatpush1.bf16.msra.mxu1 %v7168_v58 }
 0xf0b   : > { %4843 = vmatprep.subr.bf16.mxu0 %v7169_v60  ;;  %4875 = vmatprep.subr.bf16.mxu1 %v7170_v40 }
 0xf0e   : > { %4845 = vmatpush1.bf16.msra.mxu0 %v6073_v42  ;;  %4877 = vmatpush1.bf16.msra.mxu1 %v6077_v23 }
 0xf0f   : > { %4847 = vmatprep.subr.bf16.mxu0 %v7268_v35  ;;  %4879 = vmatprep.subr.bf16.mxu1 %v7269_v9 }
 0xf12   : > { %4849 = vmatpush1.bf16.msra.mxu0 %v7270_v5  ;;  %4881 = vmatpush1.bf16.msra.mxu1 %v7271_v8 }
 0xf13   : > { %4851 = vmatprep.subr.bf16.mxu0 %v7272_v3  ;;  %4883 = vmatprep.subr.bf16.mxu1 %v7273_v4 }
 0xf16   : > { %4853 = vmatpush1.bf16.msra.mxu0 %v7274_v38  ;;  %4885 = vmatpush1.bf16.msra.mxu1 %v7275_v33  ;;  %v7303_v38 = vld [vmem:[#allocation44_spill] sm:$0xff] }
 0xf17   : > { %4886 = vmatprep.subr.bf16.mxu0 %v7276_v32  ;;  %4911 = vmatprep.subr.bf16.mxu1 %v7277_v41  ;;  %v7290_v41 = vld [vmem:[#allocation40_spill] sm:$0xff] }
 0xf19   : > { %2229 = vmatmul.mubr.f32.vlgmr.msra.gmra.mrb[12].mxu0 %v6594_v36  ;;  %2300 = vmatmul.mubr.f32.vlgmr.msra.gmra.mrb[12].mxu1 %v6594_v36 }
 0xf1a   : > { %4888 = vmatpush3.bf16.msra.mxu0 %v7278_v63  ;;  %4042 = vmatprep.mubr.msk.f32.mxu0 %vm5502_vm1, %v7150_v48  ;;  %v7286_v63 = vld [vmem:[#allocation9_spill] sm:$0xff] }
 0xf1b   : > { %4889 = vmatprep.subr.bf16.mxu0 %v7276_v32  ;;  %4913 = vmatpush1.bf16.msra.mxu1 %v7279_v27  ;;  %v7287_v27 = vld [vmem:[#allocation39_spill] sm:$0xff] }
 0xf1c   : > { %4915 = vmatprep.subr.bf16.mxu1 %v7280_v61  ;;  %2485 = vmatprep.mubr.f32.mxu1 %v7150_v48  ;;  %v7288_v61 = vld [vmem:[#allocation10_spill] sm:$0xff] }
 0xf1e   : > { %4891 = vmatpush3.bf16.msra.mxu0 %v7281_v49  ;;  %v7289_v49 = vld [vmem:[#allocation11_spill] sm:$0xff] }
 0xf1f   : > { %4892 = vmatprep.subr.bf16.mxu0 %v7276_v32  ;;  %4917 = vmatpush1.bf16.msra.mxu1 %v7282_v29  ;;  %v7293_v29 = vld [vmem:[#allocation41_spill] sm:$0xff] }
 0xf20   : > { %4919 = vmatprep.subr.bf16.mxu1 %v7283_v34  ;;  %v7291_v34 = vld [vmem:[#allocation12_spill] sm:$0xff] }
 0xf22   : > { %4894 = vmatpush3.bf16.msra.mxu0 %v7284_v2  ;;  %v7292_v2 = vld [vmem:[#allocation13_spill] sm:$0xff] }
 0xf23   : > { %4895 = vmatprep.subr.bf16.mxu0 %v7276_v32  ;;  %4921 = vmatpush1.bf16.msra.mxu1 %v7285_v17  ;;  %v7296_v17 = vld [vmem:[#allocation42_spill] sm:$0xff] }
 0xf24   : > { %4923 = vmatprep.subr.bf16.mxu1 %v7286_v63  ;;  %v7294_v63 = vld [vmem:[#allocation14_spill] sm:$0xff] }
 0xf26   : > { %4897 = vmatpush3.bf16.msra.mxu0 %v7287_v27  ;;  %v7295_v27 = vld [vmem:[#allocation15_spill] sm:$0xff] }
 0xf27   : > { %4898 = vmatprep.subr.bf16.mxu0 %v7276_v32  ;;  %4925 = vmatpush1.bf16.msra.mxu1 %v7288_v61  ;;  %v7299_v61 = vld [vmem:[#allocation43_spill] sm:$0xff] }
 0xf28   : > { %4927 = vmatprep.subr.bf16.mxu1 %v7289_v49  ;;  %v7297_v49 = vld [vmem:[#allocation16_spill] sm:$0xff] }
 0xf2a   : > { %4900 = vmatpush3.bf16.msra.mxu0 %v7290_v41  ;;  %v7298_v41 = vld [vmem:[#allocation17_spill] sm:$0xff] }
 0xf2b   : > { %4901 = vmatprep.subr.bf16.mxu0 %v7276_v32  ;;  %4929 = vmatpush1.bf16.msra.mxu1 %v7291_v34  ;;  %v7300_v34 = vld [vmem:[#allocation3_spill] sm:$0xff] }
 0xf2c   : > { %4931 = vmatprep.subr.bf16.mxu1 %v7292_v2  ;;  %v7301_v2 = vld [vmem:[#allocation18_spill] sm:$0xff] }
 0xf2e   : > { %4903 = vmatpush3.bf16.msra.mxu0 %v7293_v29  ;;  %v7302_v29 = vld [vmem:[#allocation19_spill] sm:$0xff] }
 0xf2f   : > { %4904 = vmatprep.subr.bf16.mxu0 %v7276_v32  ;;  %4933 = vmatpush1.bf16.msra.mxu1 %v7294_v63 }
 0xf30   : > { %4935 = vmatprep.subr.bf16.mxu1 %v7295_v27 }
 0xf32   : > { %4906 = vmatpush3.bf16.msra.mxu0 %v7296_v17 }
 0xf33   : > { %4907 = vmatprep.subr.bf16.mxu0 %v7276_v32  ;;  %4937 = vmatpush1.bf16.msra.mxu1 %v7297_v49 }
 0xf34   : > { %4939 = vmatprep.subr.bf16.mxu1 %v7298_v41 }
 0xf36   : > { %4909 = vmatpush3.bf16.msra.mxu0 %v7299_v61 }
 0xf37   : > { %4943 = vmatprep.subr.bf16.mxu0 %v7300_v34  ;;  %4941 = vmatpush1.bf16.msra.mxu1 %v7301_v2 }
 0xf38   : > { %4975 = vmatprep.subr.bf16.mxu1 %v7302_v29 }
 0xfec   : > { %v2230_v33 = vpop.f32.mrb[12].mxu0  ;;  %v2301_v63 = vpop.f32.mrb[12].mxu1 }
 0xfed   : > { %v2306_v27 = vadd.f32 %v2230_v33, %v7303_v38  ;;  %v2232_v4 = vpop.f32.mrb[13].mxu0  ;;  %v2303_v17 = vpop.f32.mrb[13].mxu1  ;;  %v2308_v5 = vadd.f32 %v2301_v63, %v6271_v20 }
 0xfee   : > { %v2307_v32 = vadd.f32 %v2232_v4, %v6265_v7  ;;  %v2309_v2 = vadd.f32 %v2303_v17, %v6269_v54 }
 0xfef   : > { %v3715_v3 = vmul.f32 -1.442695, %v2306_v27 }
 0xff0   : > { %v3716_v49 = vmul.f32 -1.442695, %v2307_v32 }
 0xff1   : > { %5450 = vpow2.f32 %v3715_v3 }
 0xff2   : > { %5452 = vpow2.f32 %v3716_v49 }
 0xffb   : > { %v5451_v41 = vpop.eup %5450 }
 0xffc   : > { %v2316_v61 = vadd.f32 1.0, %v5451_v41  ;;  %v5453_v34 = vpop.eup %5452 }
 0xffd   : > { %v2317_v8 = vadd.f32 1.0, %v5453_v34 }
 0xffe   : > { %5454 = vrcp.f32 %v2316_v61 }
 0xfff   : > { %5456 = vrcp.f32 %v2317_v8 }
0x1008   : > { %v5455_v29 = vpop.eup %5454 }
0x1009   : > { %v2322_v33 = vmul.f32 %v5455_v29, %v2309_v2  ;;  %v5457_v27 = vpop.eup %5456 }
0x100a   : > { %v2325_v9 = vsub.f32 1.0, %v5457_v27  ;;  %v2327_v3 = vmul.f32 %v5457_v27, %v6594_v36 }
0x100b   : > { %v2323_v38 = vadd.f32 %v2322_v33, %v2308_v5 }
0x100d   : > { %5458 = vtanh.f32 %v2323_v38 }
0x1017   : > { %v5459_v4 = vpop.eup %5458 }
0x1018   : > { %v2326_v32 = vmul.f32 %v5459_v4, %v2325_v9  ;;  %v6721_v9 = vld [vmem:[%s7012_s5] ss:$0 sm:$0xff] }
0x101a   : > { %v6698_v49 = vadd.f32 %v2327_v3, %v2326_v32 }
0x101c   : > { %v2329_v41 = vmax.f32 %v6698_v49, 0.0 }
0x101e   : > { %4043 = vmatmul.mubr.f32.vlgmr.msra.gmra.mrb[14].mxu0 %v2329_v41 }
0x101f   : > { %4945 = vmatpush1.bf16.msra.mxu0 %v5582_v13  ;;  %2556 = vmatprep.mubr.f32.mxu0 %v7150_v48 }
0x1020   : > { %4947 = vmatprep.subr.bf16.mxu0 %v5597_v18 }
0x1023   : > { %4949 = vmatpush1.bf16.msra.mxu0 %v5622_v26 }
0x1024   : > { %4951 = vmatprep.subr.bf16.mxu0 %v5635_v31 }
0x1027   : > { %4953 = vmatpush1.bf16.msra.mxu0 %v5660_v39 }
0x1028   : > { %4955 = vmatprep.subr.bf16.mxu0 %v5674_v44 }
0x102b   : > { %4957 = vmatpush1.bf16.msra.mxu0 %v5699_v52 }
0x102c   : > { %4959 = vmatprep.subr.bf16.mxu0 %v5713_v57 }
0x102f   : > { %4961 = vmatpush1.bf16.msra.mxu0 %v5735_v0 }
0x1030   : > { %4963 = vmatprep.subr.bf16.mxu0 %v5749_v6 }
0x1033   : > { %4965 = vmatpush1.bf16.msra.mxu0 %v5771_v19 }
0x1034   : > { %4967 = vmatprep.subr.bf16.mxu0 %v5785_v25 }
0x1037   : > { %4969 = vmatpush1.bf16.msra.mxu0 %v5807_v37 }
0x1038   : > { %4971 = vmatprep.subr.bf16.mxu0 %v5821_v45 }
0x103b   : > { %4973 = vmatpush1.bf16.msra.mxu0 %v5846_v56 }
0x103c   : > { %5007 = vmatprep.subr.bf16.mxu0 %v5860_v62 }
0x10f1   : > { %v2396_v36 = vpop.f32.mrb[14].mxu0 }
0x10f2   : > { %v2397_v5 = vadd.f32 %v6721_v9, %v2396_v36  ;;  %v4044_v8 = vpop.f32.mrb[15].mxu0 }
0x10f3   : > { %v7306_v8 = vld [vmem:[#allocation31_spill] sm:$0xff] }
0x10f4   : > { %2400 = vmax.xlane.f32.xlu0 %v2397_v5 }
0x1181   : > { %v2401_v38 = vpop.xlane.xlu0 %2400 }
0x1182   : > { %vm2402_vm2 = vcmp.ge.f32.partialorder %v2397_v5, %v2401_v38  ;;  %v7305_v5 = vld [vmem:[#allocation30_spill] sm:$0xff]  ;;  %v7307_v38 = vld [vmem:[#allocation32_spill] sm:$0xff] }
0x1183   : > { %v2403_v63 = vsel %vm2402_vm2, %v5842_v55, 128 }
0x1184   : > { %v2405_v61 = vshra.s32 %v2403_v63, 16  ;;  %v2404_v34 = vand.u32 65535, %v2403_v63  ;;  %v7308_v63 = vld [vmem:[#allocation33_spill] sm:$0xff] }
0x1186   : > { %v2407_v29 = vcvt.s32.f32 %v2405_v61  ;;  %v2406_v17 = vcvt.s32.f32 %v2404_v34  ;;  %v7309_v61 = vld [vmem:[#allocation34_spill] sm:$0xff]  ;;  %v7311_v34 = vmov 0.0|0.0  }
0x1188   : > { %2408 = vmin.xlane.f32.xlu1 %v2407_v29 }
0x1215   : > { %v2409_v2 = vpop.xlane.xlu1 %2408 }
0x1216   : > { %vm2410_vm3 = vcmp.eq.f32.partialorder %v2407_v29, %v2409_v2  ;;  %v2415_v27 = vcvt.f32.s32 %v2409_v2  ;;  %v7310_v29 = vld [vmem:[#allocation35_spill] sm:$0xff]  ;;  %v7312_v2 = vld [vmem:[#allocation2_spill] sm:$0xff] }
0x1217   : > { %v2411_v33 = vsel %vm2410_vm3, %v2406_v17, inf  ;;  %v7313_v17 = vld [vmem:[#allocation36_spill] sm:$0xff] }
0x1218   : > { %2412 = vmin.xlane.f32.xlu0 %v2411_v33  ;;  %v2416_v3 = vshll.u32 %v2415_v27, 16  ;;  %v7314_v33 = vld [vmem:[#allocation4_spill] sm:$0xff]  ;;  %v7315_v27 = vld [vmem:[#allocation5_spill] sm:$0xff] }
0x12a5   : > { %v2413_v4 = vpop.xlane.xlu0 %2412 }
0x12a6   : > { %v2414_v32 = vcvt.f32.s32 %v2413_v4  ;;  %v7316_v4 = vld [vmem:[#allocation37_spill] sm:$0xff] }
0x12a8   : > { %v2417_v41 = vadd.s32 %v2416_v3, %v2414_v32  ;;  %v7317_v3 = vld [vmem:[#allocation6_spill] sm:$0xff]  ;;  %v7318_v32 = vld [vmem:[#allocation7_spill] sm:$0xff] }
0x12aa   : > { %vm2418_vm5 = vcmp.eq.s32.totalorder %v5842_v55, %v2417_v41  ;;  %v6727_v36 = vsel %vm3621_vm4, %v6618_v50, %v2417_v41  ;;  %v7304_v50 = vld [vmem:[#allocation29_spill] sm:$0xff]  ;;  %v7319_v41 = vld [vmem:[#allocation38_spill] sm:$0xff] }
0x12ab   : > { %3718 = vmatmul.mubr.msk.f32.vlgmr.msra.gmra.mrb[14].mxu1 %vm2418_vm5, %v7162_v22  ;;  %3719 = vmatmul.mubr.msk.f32.vlgmr.msra.gmra.mrb[16].mxu0 %vm2418_vm5, %v7162_v22 }
0x12ac   : > { %4977 = vmatpush1.bf16.msra.mxu1 %v5879_v12  ;;  %5009 = vmatpush1.bf16.msra.mxu0 %v5883_v14 }
0x12ad   : > { %4979 = vmatprep.subr.bf16.mxu1 %v5885_v15  ;;  %5011 = vmatprep.subr.bf16.mxu0 %v5897_v28 }
0x12ae   : > { %2627 = vmatprep.mubr.f32.mxu1 %v7150_v48  ;;  %2698 = vmatprep.mubr.f32.mxu0 %v7150_v48 }
0x12b0   : > { %4981 = vmatpush1.bf16.msra.mxu1 %v5921_v43  ;;  %5013 = vmatpush1.bf16.msra.mxu0 %v5925_v46 }
0x12b1   : > { %4983 = vmatprep.subr.bf16.mxu1 %v5927_v47  ;;  %5015 = vmatprep.subr.bf16.mxu0 %v5939_v59 }
0x12b4   : > { %4985 = vmatpush1.bf16.msra.mxu1 %v5959_v10  ;;  %5017 = vmatpush1.bf16.msra.mxu0 %v5963_v11 }
0x12b5   : > { %4987 = vmatprep.subr.bf16.mxu1 %v5965_v21  ;;  %5019 = vmatprep.subr.bf16.mxu0 %v5977_v30 }
0x12b8   : > { %4989 = vmatpush1.bf16.msra.mxu1 %v7163_v51  ;;  %5021 = vmatpush1.bf16.msra.mxu0 %v7164_v53 }
0x12b9   : > { %4991 = vmatprep.subr.bf16.mxu1 %v7165_v16  ;;  %5023 = vmatprep.subr.bf16.mxu0 %v7166_v24 }
0x12bc   : > { %4993 = vmatpush1.bf16.msra.mxu1 %v7167_v1  ;;  %5025 = vmatpush1.bf16.msra.mxu0 %v7168_v58 }
0x12bd   : > { %4995 = vmatprep.subr.bf16.mxu1 %v7169_v60  ;;  %5027 = vmatprep.subr.bf16.mxu0 %v7170_v40 }
0x12c0   : > { %4997 = vmatpush1.bf16.msra.mxu1 %v6073_v42  ;;  %5029 = vmatpush1.bf16.msra.mxu0 %v6077_v23 }
0x12c1   : > { %4999 = vmatprep.subr.bf16.mxu1 %v7268_v35  ;;  %5031 = vmatprep.subr.bf16.mxu0 %v7304_v50 }
0x12c4   : > { %5001 = vmatpush1.bf16.msra.mxu1 %v7305_v5  ;;  %5033 = vmatpush1.bf16.msra.mxu0 %v7306_v8 }
0x12c5   : > { %5003 = vmatprep.subr.bf16.mxu1 %v7307_v38  ;;  %5035 = vmatprep.subr.bf16.mxu0 %v7308_v63  ;;  %v7338_v63 = vld [vmem:[#allocation44_spill] sm:$0xff] }
0x12c8   : > { %5005 = vmatpush1.bf16.msra.mxu1 %v7309_v61  ;;  %5037 = vmatpush1.bf16.msra.mxu0 %v7310_v29  ;;  %v7325_v29 = vld [vmem:[#allocation40_spill] sm:$0xff] }
0x12c9   : > { %5038 = vmatprep.subr.bf16.mxu1 %v7311_v34  ;;  %5063 = vmatprep.subr.bf16.mxu0 %v7312_v2  ;;  %v7321_v2 = vld [vmem:[#allocation9_spill] sm:$0xff] }
0x12cb   : > { %2628 = vmatmul.mubr.f32.vlgmr.msra.gmra.mrb[14].mxu1 %v6698_v49  ;;  %2699 = vmatmul.mubr.f32.vlgmr.msra.gmra.mrb[16].mxu0 %v6698_v49 }
0x12cc   : > { %5040 = vmatpush3.bf16.msra.mxu1 %v7313_v17  ;;  %4077 = vmatprep.mubr.msk.f32.mxu1 %vm5502_vm1, %v7150_v48  ;;  %v7320_v17 = vld [vmem:[#allocation8_spill] sm:$0xff] }
0x12cd   : > { %5041 = vmatprep.subr.bf16.mxu1 %v7311_v34  ;;  %5065 = vmatpush1.bf16.msra.mxu0 %v7314_v33  ;;  %v7322_v33 = vld [vmem:[#allocation39_spill] sm:$0xff] }
0x12ce   : > { %5067 = vmatprep.subr.bf16.mxu0 %v7315_v27  ;;  %2884 = vmatprep.mubr.f32.mxu0 %v7150_v48  ;;  %v7323_v27 = vld [vmem:[#allocation10_spill] sm:$0xff] }
0x12d0   : > { %5043 = vmatpush3.bf16.msra.mxu1 %v7316_v4  ;;  %v7324_v4 = vld [vmem:[#allocation11_spill] sm:$0xff] }
0x12d1   : > { %5044 = vmatprep.subr.bf16.mxu1 %v7311_v34  ;;  %5069 = vmatpush1.bf16.msra.mxu0 %v7317_v3  ;;  %v7328_v3 = vld [vmem:[#allocation41_spill] sm:$0xff] }
0x12d2   : > { %5071 = vmatprep.subr.bf16.mxu0 %v7318_v32  ;;  %v7326_v32 = vld [vmem:[#allocation12_spill] sm:$0xff] }
0x12d4   : > { %5046 = vmatpush3.bf16.msra.mxu1 %v7319_v41  ;;  %v7327_v41 = vld [vmem:[#allocation13_spill] sm:$0xff] }
0x12d5   : > { %5047 = vmatprep.subr.bf16.mxu1 %v7311_v34  ;;  %5073 = vmatpush1.bf16.msra.mxu0 %v7320_v17  ;;  %v7331_v17 = vld [vmem:[#allocation42_spill] sm:$0xff] }
0x12d6   : > { %5075 = vmatprep.subr.bf16.mxu0 %v7321_v2  ;;  %v7329_v2 = vld [vmem:[#allocation14_spill] sm:$0xff] }
0x12d8   : > { %5049 = vmatpush3.bf16.msra.mxu1 %v7322_v33  ;;  %v7330_v33 = vld [vmem:[#allocation15_spill] sm:$0xff] }
0x12d9   : > { %5050 = vmatprep.subr.bf16.mxu1 %v7311_v34  ;;  %5077 = vmatpush1.bf16.msra.mxu0 %v7323_v27  ;;  %v7334_v27 = vld [vmem:[#allocation43_spill] sm:$0xff] }
0x12da   : > { %5079 = vmatprep.subr.bf16.mxu0 %v7324_v4  ;;  %v7332_v4 = vld [vmem:[#allocation16_spill] sm:$0xff] }
0x12dc   : > { %5052 = vmatpush3.bf16.msra.mxu1 %v7325_v29  ;;  %v7333_v29 = vld [vmem:[#allocation17_spill] sm:$0xff] }
0x12dd   : > { %5053 = vmatprep.subr.bf16.mxu1 %v7311_v34  ;;  %5081 = vmatpush1.bf16.msra.mxu0 %v7326_v32  ;;  %v7335_v32 = vld [vmem:[#allocation3_spill] sm:$0xff] }
0x12de   : > { %5083 = vmatprep.subr.bf16.mxu0 %v7327_v41  ;;  %v7336_v41 = vld [vmem:[#allocation18_spill] sm:$0xff] }
0x12e0   : > { %5055 = vmatpush3.bf16.msra.mxu1 %v7328_v3  ;;  %v7337_v3 = vld [vmem:[#allocation19_spill] sm:$0xff] }
0x12e1   : > { %5056 = vmatprep.subr.bf16.mxu1 %v7311_v34  ;;  %5085 = vmatpush1.bf16.msra.mxu0 %v7329_v2 }
0x12e2   : > { %5087 = vmatprep.subr.bf16.mxu0 %v7330_v33 }
0x12e4   : > { %5058 = vmatpush3.bf16.msra.mxu1 %v7331_v17 }
0x12e5   : > { %5059 = vmatprep.subr.bf16.mxu1 %v7311_v34  ;;  %5089 = vmatpush1.bf16.msra.mxu0 %v7332_v4 }
0x12e6   : > { %5091 = vmatprep.subr.bf16.mxu0 %v7333_v29 }
0x12e8   : > { %5061 = vmatpush3.bf16.msra.mxu1 %v7334_v27 }
0x12e9   : > { %5095 = vmatprep.subr.bf16.mxu1 %v7335_v32  ;;  %5093 = vmatpush1.bf16.msra.mxu0 %v7336_v41 }
0x12ea   : > { %5127 = vmatprep.subr.bf16.mxu0 %v7337_v3 }
0x139e   : > { %v2629_v61 = vpop.f32.mrb[14].mxu1  ;;  %v2700_v2 = vpop.f32.mrb[16].mxu0 }
0x139f   : > { %v2705_v33 = vadd.f32 %v2629_v61, %v7338_v63  ;;  %v2631_v38 = vpop.f32.mrb[15].mxu1  ;;  %v2702_v17 = vpop.f32.mrb[17].mxu0  ;;  %v2707_v50 = vadd.f32 %v2700_v2, %v6271_v20 }
0x13a0   : > { %v2706_v34 = vadd.f32 %v2631_v38, %v6265_v7  ;;  %v2708_v41 = vadd.f32 %v2702_v17, %v6269_v54 }
0x13a1   : > { %v3720_v8 = vmul.f32 -1.442695, %v2705_v33 }
0x13a2   : > { %v3721_v4 = vmul.f32 -1.442695, %v2706_v34 }
0x13a3   : > { %5460 = vpow2.f32 %v3720_v8 }
0x13a4   : > { %5462 = vpow2.f32 %v3721_v4 }
0x13ad   : > { %v5461_v29 = vpop.eup %5460 }
0x13ae   : > { %v2715_v27 = vadd.f32 1.0, %v5461_v29  ;;  %v5463_v32 = vpop.eup %5462 }
0x13af   : > { %v2716_v5 = vadd.f32 1.0, %v5463_v32 }
0x13b0   : > { %5464 = vrcp.f32 %v2715_v27 }
0x13b1   : > { %5466 = vrcp.f32 %v2716_v5 }
0x13ba   : > { %v5465_v3 = vpop.eup %5464 }
0x13bb   : > { %v2721_v61 = vmul.f32 %v5465_v3, %v2708_v41  ;;  %v5467_v33 = vpop.eup %5466 }
0x13bc   : > { %v2724_v35 = vsub.f32 1.0, %v5467_v33  ;;  %v2726_v8 = vmul.f32 %v5467_v33, %v6698_v49 }
0x13bd   : > { %v2722_v63 = vadd.f32 %v2721_v61, %v2707_v50 }
0x13bf   : > { %5468 = vtanh.f32 %v2722_v63 }
0x13c9   : > { %v5469_v38 = vpop.eup %5468 }
0x13ca   : > { %v2725_v34 = vmul.f32 %v5469_v38, %v2724_v35 }
0x13cc   : > { %v6807_v4 = vadd.f32 %v2726_v8, %v2725_v34 }
0x13ce   : > { %v2728_v29 = vmax.f32 %v6807_v4, 0.0 }
0x13d0   : > { %4078 = vmatmul.mubr.f32.vlgmr.msra.gmra.mrb[16].mxu1 %v2728_v29 }
0x13d1   : > { %5097 = vmatpush1.bf16.msra.mxu1 %v5582_v13  ;;  %2955 = vmatprep.mubr.f32.mxu1 %v7150_v48 }
0x13d2   : > { %5099 = vmatprep.subr.bf16.mxu1 %v5597_v18 }
0x13d5   : > { %5101 = vmatpush1.bf16.msra.mxu1 %v5622_v26 }
0x13d6   : > { %5103 = vmatprep.subr.bf16.mxu1 %v5635_v31 }
0x13d9   : > { %5105 = vmatpush1.bf16.msra.mxu1 %v5660_v39 }
0x13da   : > { %5107 = vmatprep.subr.bf16.mxu1 %v5674_v44 }
0x13dd   : > { %5109 = vmatpush1.bf16.msra.mxu1 %v5699_v52 }
0x13de   : > { %5111 = vmatprep.subr.bf16.mxu1 %v5713_v57 }
0x13e1   : > { %5113 = vmatpush1.bf16.msra.mxu1 %v5735_v0 }
0x13e2   : > { %5115 = vmatprep.subr.bf16.mxu1 %v5749_v6 }
0x13e5   : > { %5117 = vmatpush1.bf16.msra.mxu1 %v5771_v19 }
0x13e6   : > { %5119 = vmatprep.subr.bf16.mxu1 %v5785_v25 }
0x13e9   : > { %5121 = vmatpush1.bf16.msra.mxu1 %v5807_v37 }
0x13ea   : > { %5123 = vmatprep.subr.bf16.mxu1 %v5821_v45 }
0x13ed   : > { %5125 = vmatpush1.bf16.msra.mxu1 %v5846_v56 }
0x13ee   : > { %5159 = vmatprep.subr.bf16.mxu1 %v5860_v62 }
0x14a3   : > { %v2795_v35 = vpop.f32.mrb[16].mxu1 }
0x14a4   : > { %v2796_v49 = vadd.f32 %v6721_v9, %v2795_v35  ;;  %v4079_v50 = vpop.f32.mrb[17].mxu1  ;;  %v7340_v35 = vld [vmem:[#allocation29_spill] sm:$0xff] }
0x14a5   : > { %v7342_v50 = vld [vmem:[#allocation31_spill] sm:$0xff] }
0x14a6   : > { %2799 = vmax.xlane.f32.xlu1 %v2796_v49 }
0x1533   : > { %v2800_v5 = vpop.xlane.xlu1 %2799 }
0x1534   : > { %vm2801_vm6 = vcmp.ge.f32.partialorder %v2796_v49, %v2800_v5  ;;  %v7341_v49 = vld [vmem:[#allocation30_spill] sm:$0xff]  ;;  %v7343_v5 = vld [vmem:[#allocation32_spill] sm:$0xff] }
0x1535   : > { %v2802_v63 = vsel %vm2801_vm6, %v5842_v55, 128 }
0x1536   : > { %v2804_v2 = vshra.s32 %v2802_v63, 16  ;;  %v2803_v27 = vand.u32 65535, %v2802_v63  ;;  %v7344_v63 = vld [vmem:[#allocation33_spill] sm:$0xff] }
0x1538   : > { %v2806_v17 = vcvt.s32.f32 %v2804_v2  ;;  %v2805_v32 = vcvt.s32.f32 %v2803_v27  ;;  %v7345_v2 = vld [vmem:[#allocation34_spill] sm:$0xff]  ;;  %v7347_v27 = vmov 0.0|0.0  }
0x153a   : > { %2807 = vmin.xlane.f32.xlu0 %v2806_v17 }
0x15c7   : > { %v2808_v3 = vpop.xlane.xlu0 %2807 }
0x15c8   : > { %vm2809_vm7 = vcmp.eq.f32.partialorder %v2806_v17, %v2808_v3  ;;  %v2814_v61 = vcvt.f32.s32 %v2808_v3  ;;  %v7346_v17 = vld [vmem:[#allocation35_spill] sm:$0xff]  ;;  %v7348_v3 = vld [vmem:[#allocation2_spill] sm:$0xff] }
0x15c9   : > { %v2810_v41 = vsel %vm2809_vm7, %v2805_v32, inf  ;;  %v7349_v32 = vld [vmem:[#allocation36_spill] sm:$0xff] }
0x15ca   : > { %2811 = vmin.xlane.f32.xlu1 %v2810_v41  ;;  %v2815_v38 = vshll.u32 %v2814_v61, 16  ;;  %v7350_v41 = vld [vmem:[#allocation4_spill] sm:$0xff]  ;;  %v7351_v61 = vld [vmem:[#allocation5_spill] sm:$0xff] }
0x1657   : > { %v2812_v33 = vpop.xlane.xlu1 %2811 }
0x1658   : > { %v2813_v8 = vcvt.f32.s32 %v2812_v33  ;;  %v7352_v33 = vld [vmem:[#allocation37_spill] sm:$0xff] }
0x165a   : > { %v2816_v34 = vadd.s32 %v2815_v38, %v2813_v8  ;;  %v7353_v38 = vld [vmem:[#allocation6_spill] sm:$0xff]  ;;  %v7354_v8 = vld [vmem:[#allocation7_spill] sm:$0xff] }
0x165c   : > { %vm2817_vm9 = vcmp.eq.s32.totalorder %v5842_v55, %v2816_v34  ;;  %v6831_v29 = vsel %vm3623_vm8, %v6727_v36, %v2816_v34  ;;  %v7339_v36 = vld [vmem:[#allocation28_spill] sm:$0xff]  ;;  %v7355_v34 = vld [vmem:[#allocation38_spill] sm:$0xff] }
0x165d   : > { %3723 = vmatmul.mubr.msk.f32.vlgmr.msra.gmra.mrb[18].mxu0 %vm2817_vm9, %v7162_v22  ;;  %3724 = vmatmul.mubr.msk.f32.vlgmr.msra.gmra.mrb[18].mxu1 %vm2817_vm9, %v7162_v22 }
0x165e   : > { %5129 = vmatpush1.bf16.msra.mxu0 %v5879_v12  ;;  %5161 = vmatpush1.bf16.msra.mxu1 %v5883_v14 }
0x165f   : > { %5131 = vmatprep.subr.bf16.mxu0 %v5885_v15  ;;  %5163 = vmatprep.subr.bf16.mxu1 %v5897_v28 }
0x1660   : > { %3026 = vmatprep.mubr.f32.mxu0 %v7150_v48  ;;  %3097 = vmatprep.mubr.f32.mxu1 %v7150_v48 }
0x1662   : > { %5133 = vmatpush1.bf16.msra.mxu0 %v5921_v43  ;;  %5165 = vmatpush1.bf16.msra.mxu1 %v5925_v46 }
0x1663   : > { %5135 = vmatprep.subr.bf16.mxu0 %v5927_v47  ;;  %5167 = vmatprep.subr.bf16.mxu1 %v5939_v59 }
0x1666   : > { %5137 = vmatpush1.bf16.msra.mxu0 %v5959_v10  ;;  %5169 = vmatpush1.bf16.msra.mxu1 %v5963_v11 }
0x1667   : > { %5139 = vmatprep.subr.bf16.mxu0 %v5965_v21  ;;  %5171 = vmatprep.subr.bf16.mxu1 %v5977_v30 }
0x166a   : > { %5141 = vmatpush1.bf16.msra.mxu0 %v7163_v51  ;;  %5173 = vmatpush1.bf16.msra.mxu1 %v7164_v53 }
0x166b   : > { %5143 = vmatprep.subr.bf16.mxu0 %v7165_v16  ;;  %5175 = vmatprep.subr.bf16.mxu1 %v7166_v24 }
0x166e   : > { %5145 = vmatpush1.bf16.msra.mxu0 %v7167_v1  ;;  %5177 = vmatpush1.bf16.msra.mxu1 %v7168_v58 }
0x166f   : > { %5147 = vmatprep.subr.bf16.mxu0 %v7169_v60  ;;  %5179 = vmatprep.subr.bf16.mxu1 %v7170_v40 }
0x1672   : > { %5149 = vmatpush1.bf16.msra.mxu0 %v6073_v42  ;;  %5181 = vmatpush1.bf16.msra.mxu1 %v6077_v23 }
0x1673   : > { %5151 = vmatprep.subr.bf16.mxu0 %v7339_v36  ;;  %5183 = vmatprep.subr.bf16.mxu1 %v7340_v35 }
0x1676   : > { %5153 = vmatpush1.bf16.msra.mxu0 %v7341_v49  ;;  %5185 = vmatpush1.bf16.msra.mxu1 %v7342_v50 }
0x1677   : > { %5155 = vmatprep.subr.bf16.mxu0 %v7343_v5  ;;  %5187 = vmatprep.subr.bf16.mxu1 %v7344_v63  ;;  %v7374_v63 = vld [vmem:[#allocation44_spill] sm:$0xff] }
0x167a   : > { %5157 = vmatpush1.bf16.msra.mxu0 %v7345_v2  ;;  %5189 = vmatpush1.bf16.msra.mxu1 %v7346_v17  ;;  %v7361_v17 = vld [vmem:[#allocation40_spill] sm:$0xff] }
0x167b   : > { %5190 = vmatprep.subr.bf16.mxu0 %v7347_v27  ;;  %5215 = vmatprep.subr.bf16.mxu1 %v7348_v3  ;;  %v7356_v3 = vld [vmem:[#allocation8_spill] sm:$0xff] }
0x167d   : > { %3027 = vmatmul.mubr.f32.vlgmr.msra.gmra.mrb[18].mxu0 %v6807_v4  ;;  %3098 = vmatmul.mubr.f32.vlgmr.msra.gmra.mrb[18].mxu1 %v6807_v4 }
0x167e   : > { %5192 = vmatpush3.bf16.msra.mxu0 %v7349_v32  ;;  %4112 = vmatprep.mubr.msk.f32.mxu0 %vm5502_vm1, %v7150_v48  ;;  %v7357_v32 = vld [vmem:[#allocation9_spill] sm:$0xff] }
0x167f   : > { %5193 = vmatprep.subr.bf16.mxu0 %v7347_v27  ;;  %5217 = vmatpush1.bf16.msra.mxu1 %v7350_v41  ;;  %v7358_v41 = vld [vmem:[#allocation39_spill] sm:$0xff] }
0x1680   : > { %5219 = vmatprep.subr.bf16.mxu1 %v7351_v61  ;;  %3283 = vmatprep.mubr.f32.mxu1 %v7150_v48  ;;  %v7359_v61 = vld [vmem:[#allocation10_spill] sm:$0xff] }
0x1682   : > { %5195 = vmatpush3.bf16.msra.mxu0 %v7352_v33  ;;  %v7360_v33 = vld [vmem:[#allocation11_spill] sm:$0xff] }
0x1683   : > { %5196 = vmatprep.subr.bf16.mxu0 %v7347_v27  ;;  %5221 = vmatpush1.bf16.msra.mxu1 %v7353_v38  ;;  %v7362_v38 = vld [vmem:[#allocation12_spill] sm:$0xff] }
0x1684   : > { %5223 = vmatprep.subr.bf16.mxu1 %v7354_v8  ;;  %v7363_v8 = vld [vmem:[#allocation13_spill] sm:$0xff] }
0x1686   : > { %5198 = vmatpush3.bf16.msra.mxu0 %v7355_v34  ;;  %v7364_v34 = vld [vmem:[#allocation41_spill] sm:$0xff] }
0x1687   : > { %5199 = vmatprep.subr.bf16.mxu0 %v7347_v27  ;;  %5225 = vmatpush1.bf16.msra.mxu1 %v7356_v3  ;;  %v7366_v3 = vld [vmem:[#allocation15_spill] sm:$0xff] }
0x1688   : > { %5227 = vmatprep.subr.bf16.mxu1 %v7357_v32  ;;  %v7365_v32 = vld [vmem:[#allocation14_spill] sm:$0xff] }
0x168a   : > { %5201 = vmatpush3.bf16.msra.mxu0 %v7358_v41  ;;  %v7367_v41 = vld [vmem:[#allocation42_spill] sm:$0xff] }
0x168b   : > { %5202 = vmatprep.subr.bf16.mxu0 %v7347_v27  ;;  %5229 = vmatpush1.bf16.msra.mxu1 %v7359_v61  ;;  %v7369_v61 = vld [vmem:[#allocation17_spill] sm:$0xff] }
0x168c   : > { %5231 = vmatprep.subr.bf16.mxu1 %v7360_v33  ;;  %v7368_v33 = vld [vmem:[#allocation16_spill] sm:$0xff] }
0x168e   : > { %5204 = vmatpush3.bf16.msra.mxu0 %v7361_v17  ;;  %v7370_v17 = vld [vmem:[#allocation43_spill] sm:$0xff] }
0x168f   : > { %5205 = vmatprep.subr.bf16.mxu0 %v7347_v27  ;;  %5233 = vmatpush1.bf16.msra.mxu1 %v7362_v38  ;;  %v7371_v38 = vld [vmem:[#allocation3_spill] sm:$0xff] }
0x1690   : > { %5235 = vmatprep.subr.bf16.mxu1 %v7363_v8  ;;  %v7372_v8 = vld [vmem:[#allocation18_spill] sm:$0xff] }
0x1692   : > { %5207 = vmatpush3.bf16.msra.mxu0 %v7364_v34  ;;  %v7373_v34 = vld [vmem:[#allocation19_spill] sm:$0xff] }
0x1693   : > { %5208 = vmatprep.subr.bf16.mxu0 %v7347_v27  ;;  %5237 = vmatpush1.bf16.msra.mxu1 %v7365_v32 }
0x1694   : > { %5239 = vmatprep.subr.bf16.mxu1 %v7366_v3 }
0x1696   : > { %5210 = vmatpush3.bf16.msra.mxu0 %v7367_v41 }
0x1697   : > { %5211 = vmatprep.subr.bf16.mxu0 %v7347_v27  ;;  %5241 = vmatpush1.bf16.msra.mxu1 %v7368_v33 }
0x1698   : > { %5243 = vmatprep.subr.bf16.mxu1 %v7369_v61 }
0x169a   : > { %5213 = vmatpush3.bf16.msra.mxu0 %v7370_v17 }
0x169b   : > { %5247 = vmatprep.subr.bf16.mxu0 %v7371_v38  ;;  %5245 = vmatpush1.bf16.msra.mxu1 %v7372_v8 }
0x169c   : > { %5279 = vmatprep.subr.bf16.mxu1 %v7373_v34 }
0x1750   : > { %v3028_v2 = vpop.f32.mrb[18].mxu0  ;;  %v3099_v32 = vpop.f32.mrb[18].mxu1 }
0x1751   : > { %v3104_v3 = vadd.f32 %v3028_v2, %v7374_v63  ;;  %v3030_v5 = vpop.f32.mrb[19].mxu0  ;;  %v3101_v41 = vpop.f32.mrb[19].mxu1  ;;  %v3106_v35 = vadd.f32 %v3099_v32, %v6271_v20 }
0x1752   : > { %v3105_v27 = vadd.f32 %v3030_v5, %v6265_v7  ;;  %v3107_v8 = vadd.f32 %v3101_v41, %v6269_v54 }
0x1753   : > { %v3725_v50 = vmul.f32 -1.442695, %v3104_v3 }
0x1754   : > { %v3726_v33 = vmul.f32 -1.442695, %v3105_v27 }
0x1755   : > { %5470 = vpow2.f32 %v3725_v50 }
0x1756   : > { %5472 = vpow2.f32 %v3726_v33 }
0x175f   : > { %v5471_v61 = vpop.eup %5470 }
0x1760   : > { %v3114_v17 = vadd.f32 1.0, %v5471_v61  ;;  %v5473_v38 = vpop.eup %5472 }
0x1761   : > { %v3115_v49 = vadd.f32 1.0, %v5473_v38 }
0x1762   : > { %5474 = vrcp.f32 %v3114_v17 }
0x1763   : > { %5476 = vrcp.f32 %v3115_v49 }
0x176c   : > { %v5475_v34 = vpop.eup %5474 }
0x176d   : > { %v3120_v2 = vmul.f32 %v5475_v34, %v3107_v8  ;;  %v5477_v3 = vpop.eup %5476 }
0x176e   : > { %v3123_v36 = vsub.f32 1.0, %v5477_v3  ;;  %v3125_v50 = vmul.f32 %v5477_v3, %v6807_v4 }
0x176f   : > { %v3121_v63 = vadd.f32 %v3120_v2, %v3106_v35 }
0x1771   : > { %5478 = vtanh.f32 %v3121_v63 }
0x177b   : > { %v5479_v5 = vpop.eup %5478 }
0x177c   : > { %v3124_v27 = vmul.f32 %v5479_v5, %v3123_v36 }
0x177e   : > { %v6911_v33 = vadd.f32 %v3125_v50, %v3124_v27 }
0x1780   : > { %v3127_v17 = vmax.f32 %v6911_v33, 0.0 }
0x1782   : > { %4113 = vmatmul.mubr.f32.vlgmr.msra.gmra.mrb[20].mxu0 %v3127_v17 }
0x1783   : > { %5249 = vmatpush1.bf16.msra.mxu0 %v5582_v13  ;;  %3354 = vmatprep.mubr.f32.mxu0 %v7150_v48 }
0x1784   : > { %5251 = vmatprep.subr.bf16.mxu0 %v5597_v18 }
0x1787   : > { %5253 = vmatpush1.bf16.msra.mxu0 %v5622_v26 }
0x1788   : > { %5255 = vmatprep.subr.bf16.mxu0 %v5635_v31 }
0x178b   : > { %5257 = vmatpush1.bf16.msra.mxu0 %v5660_v39 }
0x178c   : > { %5259 = vmatprep.subr.bf16.mxu0 %v5674_v44 }
0x178f   : > { %5261 = vmatpush1.bf16.msra.mxu0 %v5699_v52 }
0x1790   : > { %5263 = vmatprep.subr.bf16.mxu0 %v5713_v57 }
0x1793   : > { %5265 = vmatpush1.bf16.msra.mxu0 %v5735_v0 }
0x1794   : > { %5267 = vmatprep.subr.bf16.mxu0 %v5749_v6 }
0x1797   : > { %5269 = vmatpush1.bf16.msra.mxu0 %v5771_v19 }
0x1798   : > { %5271 = vmatprep.subr.bf16.mxu0 %v5785_v25 }
0x179b   : > { %5273 = vmatpush1.bf16.msra.mxu0 %v5807_v37 }
0x179c   : > { %5275 = vmatprep.subr.bf16.mxu0 %v5821_v45 }
0x179f   : > { %5277 = vmatpush1.bf16.msra.mxu0 %v5846_v56 }
0x17a0   : > { %5311 = vmatprep.subr.bf16.mxu0 %v5860_v62 }
0x1855   : > { %v3194_v13 = vpop.f32.mrb[20].mxu0 }
0x1856   : > { %v3195_v18 = vadd.f32 %v6721_v9, %v3194_v13  ;;  %v4114_v26 = vpop.f32.mrb[21].mxu0 }
0x1858   : > { %3198 = vmax.xlane.f32.xlu0 %v3195_v18 }
0x18e5   : > { %v3199_v31 = vpop.xlane.xlu0 %3198 }
0x18e6   : > { %vm3200_vm10 = vcmp.ge.f32.partialorder %v3195_v18, %v3199_v31 }
0x18e7   : > { %v3201_v39 = vsel %vm3200_vm10, %v5842_v55, 128 }
0x18e8   : > { %v3203_v44 = vshra.s32 %v3201_v39, 16  ;;  %v3202_v57 = vand.u32 65535, %v3201_v39 }
0x18ea   : > { %v3205_v52 = vcvt.s32.f32 %v3203_v44  ;;  %v3204_v6 = vcvt.s32.f32 %v3202_v57 }
0x18ec   : > { %3206 = vmin.xlane.f32.xlu1 %v3205_v52 }
0x1979   : > { %v3207_v0 = vpop.xlane.xlu1 %3206 }
0x197a   : > { %vm3208_vm11 = vcmp.eq.f32.partialorder %v3205_v52, %v3207_v0  ;;  %v3213_v25 = vcvt.f32.s32 %v3207_v0 }
0x197b   : > { %v3209_v19 = vsel %vm3208_vm11, %v3204_v6, inf }
0x197c   : > { %3210 = vmin.xlane.f32.xlu0 %v3209_v19  ;;  %v3214_v45 = vshll.u32 %v3213_v25, 16 }
0x1a09   : > { %v3211_v37 = vpop.xlane.xlu0 %3210 }
0x1a0a   : > { %v3212_v56 = vcvt.f32.s32 %v3211_v37 }
0x1a0c   : > { %v3215_v62 = vadd.s32 %v3214_v45, %v3212_v56 }
0x1a0e   : > { %vm3216_vm13 = vcmp.eq.s32.totalorder %v5842_v55, %v3215_v62  ;;  %v6935_v4 = vsel %vm3625_vm12, %v6831_v29, %v3215_v62 }
0x1a0f   : > { %3728 = vmatmul.mubr.msk.f32.vlgmr.msra.gmra.mrb[20].mxu1 %vm3216_vm13, %v7162_v22  ;;  %3729 = vmatmul.mubr.msk.f32.vlgmr.msra.gmra.mrb[22].mxu0 %vm3216_vm13, %v7162_v22  ;;  %v7389_v22 = vld [vmem:[#allocation41_spill] sm:$0xff] }
0x1a10   : > { %5281 = vmatpush1.bf16.msra.mxu1 %v5879_v12  ;;  %5313 = vmatpush1.bf16.msra.mxu0 %v5883_v14  ;;  %v7375_v12 = vld [vmem:[#allocation28_spill] sm:$0xff]  ;;  %v7376_v14 = vld [vmem:[#allocation29_spill] sm:$0xff] }
0x1a11   : > { %5283 = vmatprep.subr.bf16.mxu1 %v5885_v15  ;;  %5315 = vmatprep.subr.bf16.mxu0 %v5897_v28  ;;  %v7377_v15 = vld [vmem:[#allocation30_spill] sm:$0xff]  ;;  %v7378_v28 = vld [vmem:[#allocation31_spill] sm:$0xff] }
0x1a12   : > { %3425 = vmatprep.mubr.f32.mxu1 %v7150_v48  ;;  %3496 = vmatprep.mubr.f32.mxu0 %v7150_v48 }
0x1a14   : > { %5285 = vmatpush1.bf16.msra.mxu1 %v5921_v43  ;;  %5317 = vmatpush1.bf16.msra.mxu0 %v5925_v46  ;;  %v7379_v43 = vld [vmem:[#allocation32_spill] sm:$0xff]  ;;  %v7380_v46 = vld [vmem:[#allocation33_spill] sm:$0xff] }
0x1a15   : > { %5287 = vmatprep.subr.bf16.mxu1 %v5927_v47  ;;  %5319 = vmatprep.subr.bf16.mxu0 %v5939_v59  ;;  %v7381_v47 = vld [vmem:[#allocation34_spill] sm:$0xff]  ;;  %v7382_v59 = vld [vmem:[#allocation35_spill] sm:$0xff] }
0x1a18   : > { %5289 = vmatpush1.bf16.msra.mxu1 %v5959_v10  ;;  %5321 = vmatpush1.bf16.msra.mxu0 %v5963_v11  ;;  %v7383_v10 = vmov 0.0|0.0   ;;  %v7384_v11 = vld [vmem:[#allocation36_spill] sm:$0xff] }
0x1a19   : > { %5291 = vmatprep.subr.bf16.mxu1 %v5965_v21  ;;  %5323 = vmatprep.subr.bf16.mxu0 %v5977_v30  ;;  %v7385_v21 = vld [vmem:[#allocation37_spill] sm:$0xff]  ;;  %v7386_v30 = vld [vmem:[#allocation38_spill] sm:$0xff] }
0x1a1c   : > { %5293 = vmatpush1.bf16.msra.mxu1 %v7163_v51  ;;  %5325 = vmatpush1.bf16.msra.mxu0 %v7164_v53  ;;  %v7391_v51 = vld [vmem:[#allocation43_spill] sm:$0xff] }
0x1a1d   : > { %5295 = vmatprep.subr.bf16.mxu1 %v7165_v16  ;;  %5327 = vmatprep.subr.bf16.mxu0 %v7166_v24  ;;  %v7392_v24 = vld [vmem:[#allocation44_spill] sm:$0xff] }
0x1a20   : > { %5297 = vmatpush1.bf16.msra.mxu1 %v7167_v1  ;;  %5329 = vmatpush1.bf16.msra.mxu0 %v7168_v58 }
0x1a21   : > { %5299 = vmatprep.subr.bf16.mxu1 %v7169_v60  ;;  %5331 = vmatprep.subr.bf16.mxu0 %v7170_v40 }
0x1a24   : > { %5301 = vmatpush1.bf16.msra.mxu1 %v6073_v42  ;;  %5333 = vmatpush1.bf16.msra.mxu0 %v6077_v23  ;;  %v7387_v23 = vld [vmem:[#allocation39_spill] sm:$0xff]  ;;  %v7388_v42 = vld [vmem:[#allocation40_spill] sm:$0xff] }
0x1a25   : > { %5303 = vmatprep.subr.bf16.mxu1 %v7375_v12  ;;  %5335 = vmatprep.subr.bf16.mxu0 %v7376_v14 }
0x1a28   : > { %5305 = vmatpush1.bf16.msra.mxu1 %v7377_v15  ;;  %5337 = vmatpush1.bf16.msra.mxu0 %v7378_v28 }
0x1a29   : > { %5307 = vmatprep.subr.bf16.mxu1 %v7379_v43  ;;  %5339 = vmatprep.subr.bf16.mxu0 %v7380_v46 }
0x1a2c   : > { %5309 = vmatpush1.bf16.msra.mxu1 %v7381_v47  ;;  %5341 = vmatpush1.bf16.msra.mxu0 %v7382_v59 }
0x1a2d   : > { %5342 = vmatprep.subr.bf16.mxu1 %v7383_v10 }
0x1a2f   : > { %3426 = vmatmul.mubr.f32.vlgmr.msra.gmra.mrb[20].mxu1 %v6911_v33  ;;  %3497 = vmatmul.mubr.f32.vlgmr.msra.gmra.mrb[22].mxu0 %v6911_v33 }
0x1a30   : > { %5344 = vmatpush3.bf16.msra.mxu1 %v7384_v11  ;;  %4147 = vmatprep.mubr.msk.f32.mxu1 %vm5502_vm1, %v7150_v48  ;;  %v7390_v48 = vld [vmem:[#allocation42_spill] sm:$0xff] }
0x1a31   : > { %5345 = vmatprep.subr.bf16.mxu1 %v7383_v10 }
0x1a34   : > { %5347 = vmatpush3.bf16.msra.mxu1 %v7385_v21 }
0x1a35   : > { %5348 = vmatprep.subr.bf16.mxu1 %v7383_v10 }
0x1a38   : > { %5350 = vmatpush3.bf16.msra.mxu1 %v7386_v30 }
0x1a39   : > { %5351 = vmatprep.subr.bf16.mxu1 %v7383_v10 }
0x1a3c   : > { %5353 = vmatpush3.bf16.msra.mxu1 %v7387_v23 }
0x1a3d   : > { %5354 = vmatprep.subr.bf16.mxu1 %v7383_v10 }
0x1a40   : > { %5356 = vmatpush3.bf16.msra.mxu1 %v7388_v42 }
0x1a41   : > { %5357 = vmatprep.subr.bf16.mxu1 %v7383_v10 }
0x1a44   : > { %5359 = vmatpush3.bf16.msra.mxu1 %v7389_v22 }
0x1a45   : > { %5360 = vmatprep.subr.bf16.mxu1 %v7383_v10 }
0x1a48   : > { %5362 = vmatpush3.bf16.msra.mxu1 %v7390_v48 }
0x1a49   : > { %5363 = vmatprep.subr.bf16.mxu1 %v7383_v10 }
0x1a4c   : > { %5365 = vmatpush3.bf16.msra.mxu1 %v7391_v51 }
0x1b02   : > { %v3427_v53 = vpop.f32.mrb[20].mxu1  ;;  %v3498_v16 = vpop.f32.mrb[22].mxu0 }
0x1b03   : > { %v3503_v1 = vadd.f32 %v3427_v53, %v7392_v24  ;;  %v3429_v58 = vpop.f32.mrb[21].mxu1  ;;  %v3500_v60 = vpop.f32.mrb[23].mxu0  ;;  %v3505_v38 = vadd.f32 %v3498_v16, %v6271_v20 }
0x1b04   : > { %v3504_v29 = vadd.f32 %v3429_v58, %v6265_v7  ;;  %v3506_v32 = vadd.f32 %v3500_v60, %v6269_v54 }
0x1b05   : > { %v3730_v40 = vmul.f32 -1.442695, %v3503_v1 }
0x1b06   : > { %v3731_v36 = vmul.f32 -1.442695, %v3504_v29 }
0x1b07   : > { %5480 = vpow2.f32 %v3730_v40 }
0x1b08   : > { %5482 = vpow2.f32 %v3731_v36 }
0x1b11   : > { %v5481_v35 = vpop.eup %5480 }
0x1b12   : > { %v3513_v49 = vadd.f32 1.0, %v5481_v35  ;;  %v5483_v63 = vpop.eup %5482 }
0x1b13   : > { %v3514_v41 = vadd.f32 1.0, %v5483_v63 }
0x1b14   : > { %5484 = vrcp.f32 %v3513_v49 }
0x1b15   : > { %5486 = vrcp.f32 %v3514_v41 }
0x1b1e   : > { %v5485_v61 = vpop.eup %5484 }
0x1b1f   : > { %v3519_v8 = vmul.f32 %v5485_v61, %v3506_v32  ;;  %v5487_v2 = vpop.eup %5486 }
0x1b20   : > { %v3522_v3 = vsub.f32 1.0, %v5487_v2  ;;  %v3524_v50 = vmul.f32 %v5487_v2, %v6911_v33 }
0x1b21   : > { %v3520_v34 = vadd.f32 %v3519_v8, %v3505_v38 }
0x1b23   : > { %5488 = vtanh.f32 %v3520_v34 }
0x1b2d   : > { %v5489_v7 = vpop.eup %5488 }
0x1b2e   : > { %v3523_v5 = vmul.f32 %v5489_v7, %v3522_v3 }
0x1b30   : > { %v3525_v27 = vadd.f32 %v3524_v50, %v3523_v5 }
0x1b32   : > { %v3526_v17 = vmax.f32 %v3525_v27, 0.0 }
0x1b34   : > { %4148 = vmatmul.mubr.f32.vlgmr.msra.gmra.mrb[22].mxu1 %v3526_v17 }
0x1c07   : > { %v3593_v13 = vpop.f32.mrb[22].mxu1 }
0x1c08   : > { %v3594_v18 = vadd.f32 %v6721_v9, %v3593_v13  ;;  %v4149_v54 = vpop.f32.mrb[23].mxu1 }
0x1c0a   : > { %3597 = vmax.xlane.f32.xlu1 %v3594_v18 }
0x1c97   : > { %v3598_v26 = vpop.xlane.xlu1 %3597 }
0x1c98   : > { %vm3599_vm1 = vcmp.ge.f32.partialorder %v3594_v18, %v3598_v26 }
0x1c99   : > { %v3600_v20 = vsel %vm3599_vm1, %v5842_v55, 128 }
0x1c9a   : > { %v3602_v31 = vshra.s32 %v3600_v20, 16  ;;  %v3601_v44 = vand.u32 65535, %v3600_v20 }
0x1c9c   : > { %v3604_v39 = vcvt.s32.f32 %v3602_v31  ;;  %v3603_v57 = vcvt.s32.f32 %v3601_v44 }
0x1c9e   : > { %3605 = vmin.xlane.f32.xlu0 %v3604_v39 }
0x1d2b   : > { %v3606_v52 = vpop.xlane.xlu0 %3605 }
0x1d2c   : > { %vm3607_vm14 = vcmp.eq.f32.partialorder %v3604_v39, %v3606_v52  ;;  %v3612_v0 = vcvt.f32.s32 %v3606_v52 }
0x1d2d   : > { %v3608_v33 = vsel %vm3607_vm14, %v3603_v57, inf }
0x1d2e   : > { %3609 = vmin.xlane.f32.xlu1 %v3608_v33  ;;  %v3613_v19 = vshll.u32 %v3612_v0, 16 }
0x1dbb   : > { %v3610_v6 = vpop.xlane.xlu1 %3609 }
0x1dbc   : > { %v3611_v9 = vcvt.f32.s32 %v3610_v6 }
0x1dbe   : > { %v3614_v55 = vadd.s32 %v3613_v19, %v3611_v9 }
0x1dc0   : > { %v3628_v25 = vsel %vm3627_vm15, %v6935_v4, %v3614_v55 }
0x1dc1   : > { %3630 = vst.msk [vmem:[%s246_s16] sm:$0xff] %vm3629_vm0, %v3628_v25 }
0x1dc2 PF: > { %s16_s21 = sadd.s32 1, %s5497_s21  }
0x1dc3   : > { %p13_p4 = scmp.ge.s32.totalorder %s16_s21, 4  }
0x1dc5   :  { %15 = sbr.rel (!%p13_p4) target bundleno = 1 (0x1), region = 74 }

</bundles_post_ra>
